<compile_context>
chip_gen: v7x
topology: tpu7x:2x2x1
jax: 0.10.0
libtpu: 0.0.40
codegen_flags: <defaults>
</compile_context>

<pallas_src>
import numpy as np
import jax
import jax.numpy as jnp
from jax import lax
from jax.experimental import pallas as pl
from jax.experimental.pallas import tpu as pltpu

_SQRT_HALF = 0.7071067811865476

# First-layer widths of the four heads (classifier, grade, ordinal, domain);
# fused into one (C, 2048) matmul inside the kernel and sliced at these
# 128-aligned boundaries.
_D_CLS1, _D_GRD1, _D_ORD1, _D_DOM1 = 1024, 512, 256, 256
_S1 = _D_CLS1
_S2 = _S1 + _D_GRD1
_S3 = _S2 + _D_ORD1
_S4 = _S3 + _D_DOM1

_SLAB = 128   # lane-dense packed-output width (h | logits | grade | ordinal | domain)


# ----------------------------------------------------------------------------- helpers
def _erf(x):
    # Abramowitz & Stegun 7.1.26 (|err| < 1.5e-7 ~ f32 eps).  Kept (instead of
    # lax.erf) for guaranteed Mosaic lowering; matches PyTorch's exact-erf GELU
    # to f32 tolerance.
    a1, a2, a3, a4, a5 = 0.254829592, -0.284496736, 1.421413741, -1.453152027, 1.061405429
    p = 0.3275911
    ax = jnp.abs(x)
    t = 1.0 / (1.0 + p * ax)
    poly = ((((a5 * t + a4) * t + a3) * t + a2) * t + a1) * t
    y = 1.0 - poly * jnp.exp(-ax * ax)
    return jnp.where(x >= 0.0, y, -y)


def _gelu(x):
    return 0.5 * x * (1.0 + _erf(x * _SQRT_HALF))


def _bn_eval(v, p):
    # p rows: gamma, beta, running_mean, running_var (BatchNorm1d, eval mode)
    gamma, beta, mean, var = p[0:1], p[1:2], p[2:3], p[3:4]
    return (v - mean) * (gamma * lax.rsqrt(var + 1e-5)) + beta


def _dot(a_f32, w_ref):
    # bf16 operands on the MXU, f32 accumulation.
    return jnp.dot(a_f32.astype(jnp.bfloat16), w_ref[...],
                   preferred_element_type=jnp.float32)


# ----------------------------------------------------------------------------- kernel
def make_fused_kernel(B, P, C, nc, with_attention):
    n_in = 24

    def kernel(*refs):
        (patches_ref,
         stem_w, stem_b,
         att_w1, att_w2, sp_catT,
         w1cat, b1cat,
         p_c1, w_c2, b_c2, p_c2, w_c3, b_c3,
         p_g1, w_g2, b_g2, p_g2, w_g3, b_g3,
         w_o2, b_o2, w_d2, b_d2) = refs[:n_in]
        out_ref = refs[n_in]
        if with_attention:
            att_ref = refs[n_in + 1]
            stat_scr, h_scr, col_scr = refs[n_in + 2:n_in + 5]
        else:
            att_ref = None
            stat_scr, h_scr, col_scr = refs[n_in + 1:n_in + 4]

        # ---- backbone stub: patchify "conv" as ONE batched matmul ----------
        f = _dot(patches_ref[...], stem_w) + stem_b[...]              # (B*P, C) f32

        # ---- channel attention: per-image stats, shared MLP run once -------
        for b in range(B):                                            # static loop
            fb = f[b * P:(b + 1) * P, :]
            stat_scr[b:b + 1, :] = jnp.mean(fb, axis=0, keepdims=True)
            stat_scr[B + b:B + b + 1, :] = jnp.max(fb, axis=0, keepdims=True)
        stat = stat_scr[...]                                          # (2B, C)
        z = _dot(jnp.maximum(_dot(stat, att_w1), 0.0), att_w2)        # (2B, C)
        ch_att = jax.nn.sigmoid(z[0:B, :] + z[B:2 * B, :])            # (B, C)

        # ---- spatial attention (merged Toeplitz conv) + mean pool ----------
        for b in range(B):
            xcb = f[b * P:(b + 1) * P, :] * ch_att[b:b + 1, :]        # (P, C)
            col_scr[0:P, :] = jnp.mean(xcb, axis=1, keepdims=True)    # avg over C
            col_scr[P:2 * P, :] = jnp.max(xcb, axis=1, keepdims=True) # max over C
            conv = jnp.dot(sp_catT[...], col_scr[...].astype(jnp.bfloat16),
                           preferred_element_type=jnp.float32)        # (P, 1)
            attended = xcb * jax.nn.sigmoid(conv)                     # (P, C)
            if with_attention:                                        # optional writeback
                att_ref[b * P:(b + 1) * P, :] = attended.astype(jnp.bfloat16)
            h_scr[b:b + 1, :] = jnp.mean(attended, axis=0, keepdims=True)
        h = h_scr[...]                                                # (B, C)

        # ---- heads: fused first-layer matmul (C, 2048), batched over B -----
        h1 = _dot(h, w1cat) + b1cat[...]                              # (B, 2048)
        c1 = _gelu(_bn_eval(h1[:, 0:_S1], p_c1[...]))                 # classifier (B,1024)
        g1 = _gelu(_bn_eval(h1[:, _S1:_S2], p_g1[...]))               # grade      (B, 512)
        o1 = _gelu(h1[:, _S2:_S3])                                    # ordinal    (B, 256)
        d1 = jnp.maximum(h1[:, _S3:_S4], 0.0)                         # domain     (B, 256)

        c2 = _gelu(_bn_eval(_dot(c1, w_c2) + b_c2[...], p_c2[...]))   # (B, 512)
        g2 = _gelu(_bn_eval(_dot(g1, w_g2) + b_g2[...], p_g2[...]))   # (B, 256)

        logits = _dot(c2, w_c3) + b_c3[...]                           # (B, nc)
        grade = _dot(g2, w_g3) + b_g3[...]                            # (B, nc)
        ordth = _dot(o1, w_o2) + b_o2[...]                            # (B, nc-1)
        # GradientReversal is identity forward; domain logits are nearly free
        # inside the fused kernel and exposed only when alpha > 0 (wrapper).
        dom = _dot(d1, w_d2) + b_d2[...]                              # (B, 5)

        # ---- one lane-dense (B, 128) output slab ----------------------------
        out_ref[...] = jnp.zeros_like(out_ref)
        out_ref[:, 0:C] = h
        o0 = C
        out_ref[:, o0:o0 + nc] = logits
        o0 += nc
        out_ref[:, o0:o0 + nc] = grade
        o0 += nc
        out_ref[:, o0:o0 + nc - 1] = ordth
        o0 += nc - 1
        out_ref[:, o0:o0 + 5] = dom

    return kernel


# ----------------------------------------------------------------------------- wrapper
def fused_forward_pallas(patches2d, params, B, P, get_attention=False):
    C = params["feature_dim"]
    nc = params["num_classes"]
    weights = params["weights"]
    assert C + 3 * nc - 1 + 5 <= _SLAB, "packed output slab overflow"

    out_shape = [jax.ShapeDtypeStruct((B, _SLAB), jnp.float32)]       # packed results
    if get_attention:
        out_shape.append(jax.ShapeDtypeStruct((B * P, C), jnp.bfloat16))

    # Single invocation (no grid): all weights (~1.7 MB bf16) + activations fit
    # easily in VMEM on every generation, so every array is a full-block input.
    return pl.pallas_call(
        make_fused_kernel(B, P, C, nc, get_attention),
        out_shape=tuple(out_shape),
        scratch_shapes=[pltpu.VMEM((2 * B, C), jnp.float32),   # avg/max channel stats
                        pltpu.VMEM((B, C), jnp.float32),       # pooled features h
                        pltpu.VMEM((2 * P, 1), jnp.float32)],  # stacked spatial stats
    )(patches2d, *weights)


# ----------------------------------------------------------------------------- params
def build_spatial_conv_mat(w_spatial, Hf, Wf):
    """Lower the 7x7 / pad=3 / (2->1 ch) Conv2d to one (HW, 2*HW) matrix S so that
    conv_out (HW,1) = S @ vstack(avg (HW,1), max (HW,1))."""
    k = w_spatial.shape[-1]
    pad = (k - 1) // 2
    HW = Hf * Wf
    S = np.zeros((HW, 2 * HW), np.float32)
    for oy in range(Hf):
        for ox in range(Wf):
            o = oy * Wf + ox
            for ky in range(k):
                for kx in range(k):
                    iy, ix = oy + ky - pad, ox + kx - pad
                    if 0 <= iy < Hf and 0 <= ix < Wf:
                        i = iy * Wf + ix
                        S[o, i] += w_spatial[0, 0, ky, kx]
                        S[o, HW + i] += w_spatial[0, 1, ky, kx]
    return S


def init_params(key, *, in_ch=4, feature_dim=64, num_classes=5, patch=4,
                reduction_ratio=8, kernel_size=7, feat_hw=4):
    ks = jax.random.split(key, 16)
    Cr = feature_dim // reduction_ratio
    Kp = in_ch * patch * patch

    def lin(k, fan_in, fan_out):
        # kaiming_normal_(mode='fan_out', nonlinearity='relu'): std = sqrt(2/fan_out)
        w = jax.random.normal(k, (fan_in, fan_out), jnp.float32) * np.sqrt(2.0 / fan_out)
        return w, jnp.zeros((1, fan_out), jnp.float32)

    def bn(n):   # packed rows: gamma, beta, running_mean, running_var (eval mode)
        return jnp.stack([jnp.ones((n,)), jnp.zeros((n,)),
                          jnp.zeros((n,)), jnp.ones((n,))]).astype(jnp.float32)

    bf = lambda a: jnp.asarray(a, jnp.bfloat16)

    # TODO(synk): timm convnext_small backbone is not reproduced; a deterministic
    # patchify-conv stub (a single matmul) stands in for forward_features.
    stem_w = jax.random.normal(ks[0], (Kp, feature_dim), jnp.float32) * np.sqrt(2.0 / Kp)
    stem_b = jnp.zeros((1, feature_dim), jnp.float32)

    # LesionAttentionModule: 1x1-conv MLP and 7x7 spatial conv (both bias=False,
    # as in the reference module).  Weights stored (in, out) for row-vector matmuls.
    att_w1 = jax.random.normal(ks[1], (feature_dim, Cr), jnp.float32) * np.sqrt(2.0 / feature_dim)
    att_w2 = jax.random.normal(ks[2], (Cr, feature_dim), jnp.float32) * np.sqrt(2.0 / Cr)
    w_sp = np.asarray(jax.random.normal(ks[3], (1, 2, kernel_size, kernel_size), jnp.float32)
                      * np.sqrt(2.0 / (2 * kernel_size * kernel_size)))
    sp_catT = build_spatial_conv_mat(w_sp, feat_hw, feat_hw)   # (HW, 2*HW)

    # Heads (Linear weights pre-transposed to (in, out)).
    c_w1, c_b1 = lin(ks[4], feature_dim, _D_CLS1)
    c_w2, c_b2 = lin(ks[5], _D_CLS1, 512)
    c_w3, c_b3 = lin(ks[6], 512, num_classes)
    g_w1, g_b1 = lin(ks[7], feature_dim, _D_GRD1)
    g_w2, g_b2 = lin(ks[8], _D_GRD1, 256)
    g_w3, g_b3 = lin(ks[9], 256, num_classes)
    o_w1, o_b1 = lin(ks[10], feature_dim, _D_ORD1)
    o_w2, o_b2 = lin(ks[11], _D_ORD1, num_classes - 1)
    d_w1, d_b1 = lin(ks[12], feature_dim, _D_DOM1)
    d_w2, d_b2 = lin(ks[13], _D_DOM1, 5)

    # Fuse the four heads' first layers into one (C, 2048) matmul.
    w1cat = jnp.concatenate([c_w1, g_w1, o_w1, d_w1], axis=1)
    b1cat = jnp.concatenate([c_b1, g_b1, o_b1, d_b1], axis=1)

    weights = (bf(stem_w), stem_b,
               bf(att_w1), bf(att_w2), bf(sp_catT),
               bf(w1cat), b1cat,
               bn(_D_CLS1), bf(c_w2), c_b2, bn(512), bf(c_w3), c_b3,
               bn(_D_GRD1), bf(g_w2), g_b2, bn(256), bf(g_w3), g_b3,
               bf(o_w2), o_b2,
               bf(d_w2), d_b2)

    return dict(patch=patch, feature_dim=feature_dim, num_classes=num_classes,
                weights=weights)


# ----------------------------------------------------------------------------- forward
def enhanced_dr_classifier_forward(x, params, alpha=0.0, get_attention=False):
    B, Cin, H, W = x.shape
    patch = params["patch"]
    C = params["feature_dim"]
    nc = params["num_classes"]
    Hf, Wf = H // patch, W // patch
    P = Hf * Wf

    # im2col glue (pure JAX reshape/transpose): NCHW -> (B*HW, Cin*patch*patch)
    patches = (x.reshape(B, Cin, Hf, patch, Wf, patch)
                 .transpose(0, 2, 4, 1, 3, 5)
                 .reshape(B * P, Cin * patch * patch))

    outs = fused_forward_pallas(patches, params, B, P, get_attention=get_attention)
    slab = outs[0]                                       # (B, 128) packed
    h = slab[:, 0:C]                                     # (B, C)
    o0 = C
    logits = slab[:, o0:o0 + nc]; o0 += nc               # (B, nc)
    grade_logits = slab[:, o0:o0 + nc]; o0 += nc         # (B, nc)
    ordinal_thresholds = slab[:, o0:o0 + nc - 1]; o0 += nc - 1
    grade_outputs = (grade_logits, ordinal_thresholds)
    # GradientReversal.apply is identity in the forward pass.
    domain_logits = slab[:, o0:o0 + 5] if alpha > 0 else None

    # TODO(synk): training-only prototype buffer updates (in-place scatter) are omitted.
    if get_attention:
        attended = (outs[1].astype(jnp.float32)
                    .reshape(B, Hf, Wf, C).transpose(0, 3, 1, 2))    # back to NCHW
        return logits, grade_outputs, domain_logits, h, attended
    return logits, grade_outputs, domain_logits


# ----------------------------------------------------------------------------- main
if __name__ == "__main__":
    root = jax.random.PRNGKey(0)
    k_x, k_p = jax.random.split(root)

    B, Cin, H, W = 2, 4, 16, 16
    x = jax.random.normal(k_x, (B, Cin, H, W), jnp.float32)

    params = init_params(k_p, in_ch=Cin, feature_dim=64, num_classes=5, patch=4,
                         reduction_ratio=8, kernel_size=7, feat_hw=H // 4)

    # default path (no attended-feature writeback), with domain head exposed
    logits, (grade_logits, ordinal_thr), domain_logits = enhanced_dr_classifier_forward(
        x, params, alpha=1.0)
    jax.block_until_ready((logits, grade_logits, ordinal_thr, domain_logits))
    assert logits.shape == (B, 5)
    assert grade_logits.shape == (B, 5)
    assert ordinal_thr.shape == (B, 4)
    assert domain_logits.shape == (B, 5)

    # attention-returning variant (extra bf16 output only in this variant)
    l2, (g2, o2), d2, h, att = enhanced_dr_classifier_forward(
        x, params, alpha=0.0, get_attention=True)
    jax.block_until_ready((l2, g2, o2, h, att))
    assert d2 is None
    assert h.shape == (B, 64)
    assert att.shape == (B, 64, 4, 4)
    np.testing.assert_allclose(np.asarray(logits), np.asarray(l2), rtol=1e-4, atol=1e-4)

    print("KERNEL_OK")
</pallas_src>

<mosaic_0001>
module attributes {stable_mosaic.version = 11 : i64} {
  func.func @kernel(%arg0: memref<32x64xf32, #tpu.memory_space<vmem>>, %arg1: memref<64x64xbf16, #tpu.memory_space<vmem>>, %arg2: memref<1x64xf32, #tpu.memory_space<vmem>>, %arg3: memref<64x8xbf16, #tpu.memory_space<vmem>>, %arg4: memref<8x64xbf16, #tpu.memory_space<vmem>>, %arg5: memref<16x32xbf16, #tpu.memory_space<vmem>>, %arg6: memref<64x2048xbf16, #tpu.memory_space<vmem>>, %arg7: memref<1x2048xf32, #tpu.memory_space<vmem>>, %arg8: memref<4x1024xf32, #tpu.memory_space<vmem>>, %arg9: memref<1024x512xbf16, #tpu.memory_space<vmem>>, %arg10: memref<1x512xf32, #tpu.memory_space<vmem>>, %arg11: memref<4x512xf32, #tpu.memory_space<vmem>>, %arg12: memref<512x5xbf16, #tpu.memory_space<vmem>>, %arg13: memref<1x5xf32, #tpu.memory_space<vmem>>, %arg14: memref<4x512xf32, #tpu.memory_space<vmem>>, %arg15: memref<512x256xbf16, #tpu.memory_space<vmem>>, %arg16: memref<1x256xf32, #tpu.memory_space<vmem>>, %arg17: memref<4x256xf32, #tpu.memory_space<vmem>>, %arg18: memref<256x5xbf16, #tpu.memory_space<vmem>>, %arg19: memref<1x5xf32, #tpu.memory_space<vmem>>, %arg20: memref<256x4xbf16, #tpu.memory_space<vmem>>, %arg21: memref<1x4xf32, #tpu.memory_space<vmem>>, %arg22: memref<256x5xbf16, #tpu.memory_space<vmem>>, %arg23: memref<1x5xf32, #tpu.memory_space<vmem>>, %arg24: memref<2x128xf32, #tpu.memory_space<vmem>>, %arg25: memref<4x64xf32, #tpu.memory_space<vmem>>, %arg26: memref<2x64xf32, #tpu.memory_space<vmem>>, %arg27: memref<32x1xf32, #tpu.memory_space<vmem>>) attributes {dimension_semantics = [], scalar_prefetch = 0 : i64, scratch_operands = 3 : i64, tpu.core_type = #tpu.core_type<tc>} {
    %c0 = arith.constant 0 : index
    %c0_0 = arith.constant 0 : index
    %0 = vector.load %arg0[%c0, %c0_0] : memref<32x64xf32, #tpu.memory_space<vmem>>, vector<32x64xf32>
    %1 = arith.truncf %0 : vector<32x64xf32> to vector<32x64xbf16>
    %c0_1 = arith.constant 0 : index
    %c0_2 = arith.constant 0 : index
    %2 = vector.load %arg1[%c0_1, %c0_2] : memref<64x64xbf16, #tpu.memory_space<vmem>>, vector<64x64xbf16>
    %cst = arith.constant dense<0.000000e+00> : vector<32x64xf32>
    %3 = tpu.matmul %1, %2, %cst {dimension_numbers = #tpu.dot_dimension_numbers<[1], [0], [0], [1], [0, 0, 1, 1], [], []>} : vector<32x64xbf16>, vector<64x64xbf16>, vector<32x64xf32> -> vector<32x64xf32>
    %c0_3 = arith.constant 0 : index
    %c0_4 = arith.constant 0 : index
    %4 = vector.load %arg2[%c0_3, %c0_4] : memref<1x64xf32, #tpu.memory_space<vmem>>, vector<1x64xf32>
    %5 = vector.broadcast %4 : vector<1x64xf32> to vector<32x64xf32>
    %6 = arith.addf %3, %5 : vector<32x64xf32>
    %7 = vector.extract_strided_slice %6 {offsets = [0, 0], sizes = [16, 64], strides = [1, 1]} : vector<32x64xf32> to vector<16x64xf32>
    %cst_5 = arith.constant dense<0.000000e+00> : vector<64xf32>
    %8 = vector.multi_reduction <add>, %7, %cst_5 [0] : vector<16x64xf32> to vector<64xf32>
    %9 = vector.shape_cast %8 : vector<64xf32> to vector<1x64xf32>
    %cst_6 = arith.constant 1.600000e+01 : f32
    %10 = vector.broadcast %cst_6 : f32 to vector<1x64xf32>
    %11 = arith.divf %9, %10 : vector<1x64xf32>
    %c0_7 = arith.constant 0 : index
    %c0_8 = arith.constant 0 : index
    %12 = vector.load %arg25[%c0_7, %c0_8] : memref<4x64xf32, #tpu.memory_space<vmem>>, vector<1x64xf32>
    tpu.vector_store %arg25[%c0_7, %c0_8], %11 {strides = array<i32>} : memref<4x64xf32, #tpu.memory_space<vmem>>, vector<1x64xf32>,
    %cst_9 = arith.constant dense<0xFF800000> : vector<64xf32>
    %13 = vector.multi_reduction <maximumf>, %7, %cst_9 [0] : vector<16x64xf32> to vector<64xf32>
    %14 = vector.shape_cast %13 : vector<64xf32> to vector<1x64xf32>
    %c2 = arith.constant 2 : index
    %c0_10 = arith.constant 0 : index
    %15 = vector.load %arg25[%c2, %c0_10] : memref<4x64xf32, #tpu.memory_space<vmem>>, vector<1x64xf32>
    tpu.vector_store %arg25[%c2, %c0_10], %14 {strides = array<i32>} : memref<4x64xf32, #tpu.memory_space<vmem>>, vector<1x64xf32>,
    %16 = vector.extract_strided_slice %6 {offsets = [16, 0], sizes = [16, 64], strides = [1, 1]} : vector<32x64xf32> to vector<16x64xf32>
    %cst_11 = arith.constant dense<0.000000e+00> : vector<64xf32>
    %17 = vector.multi_reduction <add>, %16, %cst_11 [0] : vector<16x64xf32> to vector<64xf32>
    %18 = vector.shape_cast %17 : vector<64xf32> to vector<1x64xf32>
    %cst_12 = arith.constant 1.600000e+01 : f32
    %19 = vector.broadcast %cst_12 : f32 to vector<1x64xf32>
    %20 = arith.divf %18, %19 : vector<1x64xf32>
    %c1 = arith.constant 1 : index
    %c0_13 = arith.constant 0 : index
    %21 = vector.load %arg25[%c1, %c0_13] : memref<4x64xf32, #tpu.memory_space<vmem>>, vector<1x64xf32>
    tpu.vector_store %arg25[%c1, %c0_13], %20 {strides = array<i32>} : memref<4x64xf32, #tpu.memory_space<vmem>>, vector<1x64xf32>,
    %cst_14 = arith.constant dense<0xFF800000> : vector<64xf32>
    %22 = vector.multi_reduction <maximumf>, %16, %cst_14 [0] : vector<16x64xf32> to vector<64xf32>
    %23 = vector.shape_cast %22 : vector<64xf32> to vector<1x64xf32>
    %c3 = arith.constant 3 : index
    %c0_15 = arith.constant 0 : index
    %24 = vector.load %arg25[%c3, %c0_15] : memref<4x64xf32, #tpu.memory_space<vmem>>, vector<1x64xf32>
    tpu.vector_store %arg25[%c3, %c0_15], %23 {strides = array<i32>} : memref<4x64xf32, #tpu.memory_space<vmem>>, vector<1x64xf32>,
    %c0_16 = arith.constant 0 : index
    %c0_17 = arith.constant 0 : index
    %25 = vector.load %arg25[%c0_16, %c0_17] : memref<4x64xf32, #tpu.memory_space<vmem>>, vector<4x64xf32>
    %26 = arith.truncf %25 : vector<4x64xf32> to vector<4x64xbf16>
    %c0_18 = arith.constant 0 : index
    %c0_19 = arith.constant 0 : index
    %27 = vector.load %arg3[%c0_18, %c0_19] : memref<64x8xbf16, #tpu.memory_space<vmem>>, vector<64x8xbf16>
    %cst_20 = arith.constant dense<0.000000e+00> : vector<4x8xf32>
    %28 = tpu.matmul %26, %27, %cst_20 {dimension_numbers = #tpu.dot_dimension_numbers<[1], [0], [0], [1], [0, 0, 1, 1], [], []>} : vector<4x64xbf16>, vector<64x8xbf16>, vector<4x8xf32> -> vector<4x8xf32>
    %cst_21 = arith.constant 0.000000e+00 : f32
    %29 = vector.broadcast %cst_21 : f32 to vector<4x8xf32>
    %30 = arith.maximumf %28, %29 : vector<4x8xf32>
    %31 = arith.truncf %30 : vector<4x8xf32> to vector<4x8xbf16>
    %c0_22 = arith.constant 0 : index
    %c0_23 = arith.constant 0 : index
    %32 = vector.load %arg4[%c0_22, %c0_23] : memref<8x64xbf16, #tpu.memory_space<vmem>>, vector<8x64xbf16>
    %cst_24 = arith.constant dense<0.000000e+00> : vector<4x64xf32>
    %33 = tpu.matmul %31, %32, %cst_24 {dimension_numbers = #tpu.dot_dimension_numbers<[1], [0], [0], [1], [0, 0, 1, 1], [], []>} : vector<4x8xbf16>, vector<8x64xbf16>, vector<4x64xf32> -> vector<4x64xf32>
    %34 = vector.extract_strided_slice %33 {offsets = [0, 0], sizes = [2, 64], strides = [1, 1]} : vector<4x64xf32> to vector<2x64xf32>
    %35 = vector.extract_strided_slice %33 {offsets = [2, 0], sizes = [2, 64], strides = [1, 1]} : vector<4x64xf32> to vector<2x64xf32>
    %36 = arith.addf %34, %35 : vector<2x64xf32>
    %37 = arith.negf %36 : vector<2x64xf32>
    %38 = math.exp %37 : vector<2x64xf32>
    %cst_25 = arith.constant 1.000000e+00 : f32
    %39 = vector.broadcast %cst_25 : f32 to vector<2x64xf32>
    %40 = arith.addf %39, %38 : vector<2x64xf32>
    %41 = arith.divf %39, %40 : vector<2x64xf32>
    %42 = vector.extract_strided_slice %6 {offsets = [0, 0], sizes = [16, 64], strides = [1, 1]} : vector<32x64xf32> to vector<16x64xf32>
    %43 = vector.extract_strided_slice %41 {offsets = [0, 0], sizes = [1, 64], strides = [1, 1]} : vector<2x64xf32> to vector<1x64xf32>
    %44 = vector.broadcast %43 : vector<1x64xf32> to vector<16x64xf32>
    %45 = arith.mulf %42, %44 : vector<16x64xf32>
    %cst_26 = arith.constant dense<0.000000e+00> : vector<16xf32>
    %46 = vector.multi_reduction <add>, %45, %cst_26 [1] : vector<16x64xf32> to vector<16xf32>
    %47 = vector.shape_cast %46 : vector<16xf32> to vector<16x1xf32>
    %cst_27 = arith.constant 6.400000e+01 : f32
    %48 = vector.broadcast %cst_27 : f32 to vector<16x1xf32>
    %49 = arith.divf %47, %48 : vector<16x1xf32>
    %c0_28 = arith.constant 0 : index
    %c0_29 = arith.constant 0 : index
    %50 = vector.load %arg27[%c0_28, %c0_29] : memref<32x1xf32, #tpu.memory_space<vmem>>, vector<16x1xf32>
    tpu.vector_store %arg27[%c0_28, %c0_29], %49 {strides = array<i32>} : memref<32x1xf32, #tpu.memory_space<vmem>>, vector<16x1xf32>,
    %cst_30 = arith.constant dense<0xFF800000> : vector<16xf32>
    %51 = vector.multi_reduction <maximumf>, %45, %cst_30 [1] : vector<16x64xf32> to vector<16xf32>
    %52 = vector.shape_cast %51 : vector<16xf32> to vector<16x1xf32>
    %c16 = arith.constant 16 : index
    %c0_31 = arith.constant 0 : index
    %53 = vector.load %arg27[%c16, %c0_31] : memref<32x1xf32, #tpu.memory_space<vmem>>, vector<16x1xf32>
    tpu.vector_store %arg27[%c16, %c0_31], %52 {strides = array<i32>} : memref<32x1xf32, #tpu.memory_space<vmem>>, vector<16x1xf32>,
    %c0_32 = arith.constant 0 : index
    %c0_33 = arith.constant 0 : index
    %54 = vector.load %arg5[%c0_32, %c0_33] : memref<16x32xbf16, #tpu.memory_space<vmem>>, vector<16x32xbf16>
    %c0_34 = arith.constant 0 : index
    %c0_35 = arith.constant 0 : index
    %55 = vector.load %arg27[%c0_34, %c0_35] : memref<32x1xf32, #tpu.memory_space<vmem>>, vector<32x1xf32>
    %56 = arith.truncf %55 : vector<32x1xf32> to vector<32x1xbf16>
    %cst_36 = arith.constant dense<0.000000e+00> : vector<16x1xf32>
    %57 = tpu.matmul %54, %56, %cst_36 {dimension_numbers = #tpu.dot_dimension_numbers<[1], [0], [0], [1], [0, 0, 1, 1], [], []>} : vector<16x32xbf16>, vector<32x1xbf16>, vector<16x1xf32> -> vector<16x1xf32>
    %58 = arith.negf %57 : vector<16x1xf32>
    %59 = math.exp %58 : vector<16x1xf32>
    %cst_37 = arith.constant 1.000000e+00 : f32
    %60 = vector.broadcast %cst_37 : f32 to vector<16x1xf32>
    %61 = arith.addf %60, %59 : vector<16x1xf32>
    %62 = arith.divf %60, %61 : vector<16x1xf32>
    %63 = vector.broadcast %62 : vector<16x1xf32> to vector<16x64xf32>
    %64 = arith.mulf %45, %63 : vector<16x64xf32>
    %cst_38 = arith.constant dense<0.000000e+00> : vector<64xf32>
    %65 = vector.multi_reduction <add>, %64, %cst_38 [0] : vector<16x64xf32> to vector<64xf32>
    %66 = vector.shape_cast %65 : vector<64xf32> to vector<1x64xf32>
    %cst_39 = arith.constant 1.600000e+01 : f32
    %67 = vector.broadcast %cst_39 : f32 to vector<1x64xf32>
    %68 = arith.divf %66, %67 : vector<1x64xf32>
    %c0_40 = arith.constant 0 : index
    %c0_41 = arith.constant 0 : index
    %69 = vector.load %arg26[%c0_40, %c0_41] : memref<2x64xf32, #tpu.memory_space<vmem>>, vector<1x64xf32>
    tpu.vector_store %arg26[%c0_40, %c0_41], %68 {strides = array<i32>} : memref<2x64xf32, #tpu.memory_space<vmem>>, vector<1x64xf32>,
    %70 = vector.extract_strided_slice %6 {offsets = [16, 0], sizes = [16, 64], strides = [1, 1]} : vector<32x64xf32> to vector<16x64xf32>
    %71 = vector.extract_strided_slice %41 {offsets = [1, 0], sizes = [1, 64], strides = [1, 1]} : vector<2x64xf32> to vector<1x64xf32>
    %72 = vector.broadcast %71 : vector<1x64xf32> to vector<16x64xf32>
    %73 = arith.mulf %70, %72 : vector<16x64xf32>
    %cst_42 = arith.constant dense<0.000000e+00> : vector<16xf32>
    %74 = vector.multi_reduction <add>, %73, %cst_42 [1] : vector<16x64xf32> to vector<16xf32>
    %75 = vector.shape_cast %74 : vector<16xf32> to vector<16x1xf32>
    %cst_43 = arith.constant 6.400000e+01 : f32
    %76 = vector.broadcast %cst_43 : f32 to vector<16x1xf32>
    %77 = arith.divf %75, %76 : vector<16x1xf32>
    %c0_44 = arith.constant 0 : index
    %c0_45 = arith.constant 0 : index
    %78 = vector.load %arg27[%c0_44, %c0_45] : memref<32x1xf32, #tpu.memory_space<vmem>>, vector<16x1xf32>
    tpu.vector_store %arg27[%c0_44, %c0_45], %77 {strides = array<i32>} : memref<32x1xf32, #tpu.memory_space<vmem>>, vector<16x1xf32>,
    %cst_46 = arith.constant dense<0xFF800000> : vector<16xf32>
    %79 = vector.multi_reduction <maximumf>, %73, %cst_46 [1] : vector<16x64xf32> to vector<16xf32>
    %80 = vector.shape_cast %79 : vector<16xf32> to vector<16x1xf32>
    %c16_47 = arith.constant 16 : index
    %c0_48 = arith.constant 0 : index
    %81 = vector.load %arg27[%c16_47, %c0_48] : memref<32x1xf32, #tpu.memory_space<vmem>>, vector<16x1xf32>
    tpu.vector_store %arg27[%c16_47, %c0_48], %80 {strides = array<i32>} : memref<32x1xf32, #tpu.memory_space<vmem>>, vector<16x1xf32>,
    %c0_49 = arith.constant 0 : index
    %c0_50 = arith.constant 0 : index
    %82 = vector.load %arg5[%c0_49, %c0_50] : memref<16x32xbf16, #tpu.memory_space<vmem>>, vector<16x32xbf16>
    %c0_51 = arith.constant 0 : index
    %c0_52 = arith.constant 0 : index
    %83 = vector.load %arg27[%c0_51, %c0_52] : memref<32x1xf32, #tpu.memory_space<vmem>>, vector<32x1xf32>
    %84 = arith.truncf %83 : vector<32x1xf32> to vector<32x1xbf16>
    %cst_53 = arith.constant dense<0.000000e+00> : vector<16x1xf32>
    %85 = tpu.matmul %82, %84, %cst_53 {dimension_numbers = #tpu.dot_dimension_numbers<[1], [0], [0], [1], [0, 0, 1, 1], [], []>} : vector<16x32xbf16>, vector<32x1xbf16>, vector<16x1xf32> -> vector<16x1xf32>
    %86 = arith.negf %85 : vector<16x1xf32>
    %87 = math.exp %86 : vector<16x1xf32>
    %cst_54 = arith.constant 1.000000e+00 : f32
    %88 = vector.broadcast %cst_54 : f32 to vector<16x1xf32>
    %89 = arith.addf %88, %87 : vector<16x1xf32>
    %90 = arith.divf %88, %89 : vector<16x1xf32>
    %91 = vector.broadcast %90 : vector<16x1xf32> to vector<16x64xf32>
    %92 = arith.mulf %73, %91 : vector<16x64xf32>
    %cst_55 = arith.constant dense<0.000000e+00> : vector<64xf32>
    %93 = vector.multi_reduction <add>, %92, %cst_55 [0] : vector<16x64xf32> to vector<64xf32>
    %94 = vector.shape_cast %93 : vector<64xf32> to vector<1x64xf32>
    %cst_56 = arith.constant 1.600000e+01 : f32
    %95 = vector.broadcast %cst_56 : f32 to vector<1x64xf32>
    %96 = arith.divf %94, %95 : vector<1x64xf32>
    %c1_57 = arith.constant 1 : index
    %c0_58 = arith.constant 0 : index
    %97 = vector.load %arg26[%c1_57, %c0_58] : memref<2x64xf32, #tpu.memory_space<vmem>>, vector<1x64xf32>
    tpu.vector_store %arg26[%c1_57, %c0_58], %96 {strides = array<i32>} : memref<2x64xf32, #tpu.memory_space<vmem>>, vector<1x64xf32>,
    %c0_59 = arith.constant 0 : index
    %c0_60 = arith.constant 0 : index
    %98 = vector.load %arg26[%c0_59, %c0_60] : memref<2x64xf32, #tpu.memory_space<vmem>>, vector<2x64xf32>
    %99 = arith.truncf %98 : vector<2x64xf32> to vector<2x64xbf16>
    %c0_61 = arith.constant 0 : index
    %c0_62 = arith.constant 0 : index
    %100 = vector.load %arg6[%c0_61, %c0_62] : memref<64x2048xbf16, #tpu.memory_space<vmem>>, vector<64x2048xbf16>
    %cst_63 = arith.constant dense<0.000000e+00> : vector<2x2048xf32>
    %101 = tpu.matmul %99, %100, %cst_63 {dimension_numbers = #tpu.dot_dimension_numbers<[1], [0], [0], [1], [0, 0, 1, 1], [], []>} : vector<2x64xbf16>, vector<64x2048xbf16>, vector<2x2048xf32> -> vector<2x2048xf32>
    %c0_64 = arith.constant 0 : index
    %c0_65 = arith.constant 0 : index
    %102 = vector.load %arg7[%c0_64, %c0_65] : memref<1x2048xf32, #tpu.memory_space<vmem>>, vector<1x2048xf32>
    %103 = vector.broadcast %102 : vector<1x2048xf32> to vector<2x2048xf32>
    %104 = arith.addf %101, %103 : vector<2x2048xf32>
    %105 = vector.extract_strided_slice %104 {offsets = [0, 0], sizes = [2, 1024], strides = [1, 1]} : vector<2x2048xf32> to vector<2x1024xf32>
    %c0_66 = arith.constant 0 : index
    %c0_67 = arith.constant 0 : index
    %106 = vector.load %arg8[%c0_66, %c0_67] : memref<4x1024xf32, #tpu.memory_space<vmem>>, vector<4x1024xf32>
    %107 = vector.extract_strided_slice %106 {offsets = [0, 0], sizes = [1, 1024], strides = [1, 1]} : vector<4x1024xf32> to vector<1x1024xf32>
    %108 = vector.extract_strided_slice %106 {offsets = [1, 0], sizes = [1, 1024], strides = [1, 1]} : vector<4x1024xf32> to vector<1x1024xf32>
    %109 = vector.extract_strided_slice %106 {offsets = [2, 0], sizes = [1, 1024], strides = [1, 1]} : vector<4x1024xf32> to vector<1x1024xf32>
    %110 = vector.extract_strided_slice %106 {offsets = [3, 0], sizes = [1, 1024], strides = [1, 1]} : vector<4x1024xf32> to vector<1x1024xf32>
    %111 = vector.broadcast %109 : vector<1x1024xf32> to vector<2x1024xf32>
    %112 = arith.subf %105, %111 : vector<2x1024xf32>
    %cst_68 = arith.constant 9.99999974E-6 : f32
    %113 = vector.broadcast %cst_68 : f32 to vector<1x1024xf32>
    %114 = arith.addf %110, %113 : vector<1x1024xf32>
    %115 = math.rsqrt %114 : vector<1x1024xf32>
    %116 = arith.mulf %107, %115 : vector<1x1024xf32>
    %117 = vector.broadcast %116 : vector<1x1024xf32> to vector<2x1024xf32>
    %118 = arith.mulf %112, %117 : vector<2x1024xf32>
    %119 = vector.broadcast %108 : vector<1x1024xf32> to vector<2x1024xf32>
    %120 = arith.addf %118, %119 : vector<2x1024xf32>
    %cst_69 = arith.constant 5.000000e-01 : f32
    %121 = vector.broadcast %cst_69 : f32 to vector<2x1024xf32>
    %122 = arith.mulf %121, %120 : vector<2x1024xf32>
    %cst_70 = arith.constant 0.707106769 : f32
    %123 = vector.broadcast %cst_70 : f32 to vector<2x1024xf32>
    %124 = arith.mulf %120, %123 : vector<2x1024xf32>
    %125 = math.absf %124 : vector<2x1024xf32>
    %cst_71 = arith.constant 0.327591091 : f32
    %126 = vector.broadcast %cst_71 : f32 to vector<2x1024xf32>
    %127 = arith.mulf %126, %125 : vector<2x1024xf32>
    %cst_72 = arith.constant 1.000000e+00 : f32
    %128 = vector.broadcast %cst_72 : f32 to vector<2x1024xf32>
    %129 = arith.addf %128, %127 : vector<2x1024xf32>
    %cst_73 = arith.constant 1.000000e+00 : f32
    %130 = vector.broadcast %cst_73 : f32 to vector<2x1024xf32>
    %131 = arith.divf %130, %129 : vector<2x1024xf32>
    %cst_74 = arith.constant 1.06140542 : f32
    %132 = vector.broadcast %cst_74 : f32 to vector<2x1024xf32>
    %133 = arith.mulf %132, %131 : vector<2x1024xf32>
    %cst_75 = arith.constant -1.45315206 : f32
    %134 = vector.broadcast %cst_75 : f32 to vector<2x1024xf32>
    %135 = arith.addf %133, %134 : vector<2x1024xf32>
    %136 = arith.mulf %135, %131 : vector<2x1024xf32>
    %cst_76 = arith.constant 1.42141378 : f32
    %137 = vector.broadcast %cst_76 : f32 to vector<2x1024xf32>
    %138 = arith.addf %136, %137 : vector<2x1024xf32>
    %139 = arith.mulf %138, %131 : vector<2x1024xf32>
    %cst_77 = arith.constant -0.284496725 : f32
    %140 = vector.broadcast %cst_77 : f32 to vector<2x1024xf32>
    %141 = arith.addf %139, %140 : vector<2x1024xf32>
    %142 = arith.mulf %141, %131 : vector<2x1024xf32>
    %cst_78 = arith.constant 0.254829586 : f32
    %143 = vector.broadcast %cst_78 : f32 to vector<2x1024xf32>
    %144 = arith.addf %142, %143 : vector<2x1024xf32>
    %145 = arith.mulf %144, %131 : vector<2x1024xf32>
    %cst_79 = arith.constant 0.000000e+00 : f32
    %146 = vector.broadcast %cst_79 : f32 to vector<2x1024xf32>
    %147 = arith.subf %146, %125 : vector<2x1024xf32>
    %148 = arith.mulf %147, %125 : vector<2x1024xf32>
    %149 = math.exp %148 : vector<2x1024xf32>
    %150 = arith.mulf %145, %149 : vector<2x1024xf32>
    %cst_80 = arith.constant 1.000000e+00 : f32
    %151 = vector.broadcast %cst_80 : f32 to vector<2x1024xf32>
    %152 = arith.subf %151, %150 : vector<2x1024xf32>
    %cst_81 = arith.constant 0.000000e+00 : f32
    %153 = vector.broadcast %cst_81 : f32 to vector<2x1024xf32>
    %154 = arith.cmpf oge, %124, %153 : vector<2x1024xf32>
    %cst_82 = arith.constant 0.000000e+00 : f32
    %155 = vector.broadcast %cst_82 : f32 to vector<2x1024xf32>
    %156 = arith.subf %155, %152 : vector<2x1024xf32>
    %157 = arith.select %154, %152, %156 : vector<2x1024xi1>, vector<2x1024xf32>
    %cst_83 = arith.constant 1.000000e+00 : f32
    %158 = vector.broadcast %cst_83 : f32 to vector<2x1024xf32>
    %159 = arith.addf %158, %157 : vector<2x1024xf32>
    %160 = arith.mulf %122, %159 : vector<2x1024xf32>
    %161 = vector.extract_strided_slice %104 {offsets = [0, 1024], sizes = [2, 512], strides = [1, 1]} : vector<2x2048xf32> to vector<2x512xf32>
    %c0_84 = arith.constant 0 : index
    %c0_85 = arith.constant 0 : index
    %162 = vector.load %arg14[%c0_84, %c0_85] : memref<4x512xf32, #tpu.memory_space<vmem>>, vector<4x512xf32>
    %163 = vector.extract_strided_slice %162 {offsets = [0, 0], sizes = [1, 512], strides = [1, 1]} : vector<4x512xf32> to vector<1x512xf32>
    %164 = vector.extract_strided_slice %162 {offsets = [1, 0], sizes = [1, 512], strides = [1, 1]} : vector<4x512xf32> to vector<1x512xf32>
    %165 = vector.extract_strided_slice %162 {offsets = [2, 0], sizes = [1, 512], strides = [1, 1]} : vector<4x512xf32> to vector<1x512xf32>
    %166 = vector.extract_strided_slice %162 {offsets = [3, 0], sizes = [1, 512], strides = [1, 1]} : vector<4x512xf32> to vector<1x512xf32>
    %167 = vector.broadcast %165 : vector<1x512xf32> to vector<2x512xf32>
    %168 = arith.subf %161, %167 : vector<2x512xf32>
    %cst_86 = arith.constant 9.99999974E-6 : f32
    %169 = vector.broadcast %cst_86 : f32 to vector<1x512xf32>
    %170 = arith.addf %166, %169 : vector<1x512xf32>
    %171 = math.rsqrt %170 : vector<1x512xf32>
    %172 = arith.mulf %163, %171 : vector<1x512xf32>
    %173 = vector.broadcast %172 : vector<1x512xf32> to vector<2x512xf32>
    %174 = arith.mulf %168, %173 : vector<2x512xf32>
    %175 = vector.broadcast %164 : vector<1x512xf32> to vector<2x512xf32>
    %176 = arith.addf %174, %175 : vector<2x512xf32>
    %cst_87 = arith.constant 5.000000e-01 : f32
    %177 = vector.broadcast %cst_87 : f32 to vector<2x512xf32>
    %178 = arith.mulf %177, %176 : vector<2x512xf32>
    %cst_88 = arith.constant 0.707106769 : f32
    %179 = vector.broadcast %cst_88 : f32 to vector<2x512xf32>
    %180 = arith.mulf %176, %179 : vector<2x512xf32>
    %181 = math.absf %180 : vector<2x512xf32>
    %cst_89 = arith.constant 0.327591091 : f32
    %182 = vector.broadcast %cst_89 : f32 to vector<2x512xf32>
    %183 = arith.mulf %182, %181 : vector<2x512xf32>
    %cst_90 = arith.constant 1.000000e+00 : f32
    %184 = vector.broadcast %cst_90 : f32 to vector<2x512xf32>
    %185 = arith.addf %184, %183 : vector<2x512xf32>
    %cst_91 = arith.constant 1.000000e+00 : f32
    %186 = vector.broadcast %cst_91 : f32 to vector<2x512xf32>
    %187 = arith.divf %186, %185 : vector<2x512xf32>
    %cst_92 = arith.constant 1.06140542 : f32
    %188 = vector.broadcast %cst_92 : f32 to vector<2x512xf32>
    %189 = arith.mulf %188, %187 : vector<2x512xf32>
    %cst_93 = arith.constant -1.45315206 : f32
    %190 = vector.broadcast %cst_93 : f32 to vector<2x512xf32>
    %191 = arith.addf %189, %190 : vector<2x512xf32>
    %192 = arith.mulf %191, %187 : vector<2x512xf32>
    %cst_94 = arith.constant 1.42141378 : f32
    %193 = vector.broadcast %cst_94 : f32 to vector<2x512xf32>
    %194 = arith.addf %192, %193 : vector<2x512xf32>
    %195 = arith.mulf %194, %187 : vector<2x512xf32>
    %cst_95 = arith.constant -0.284496725 : f32
    %196 = vector.broadcast %cst_95 : f32 to vector<2x512xf32>
    %197 = arith.addf %195, %196 : vector<2x512xf32>
    %198 = arith.mulf %197, %187 : vector<2x512xf32>
    %cst_96 = arith.constant 0.254829586 : f32
    %199 = vector.broadcast %cst_96 : f32 to vector<2x512xf32>
    %200 = arith.addf %198, %199 : vector<2x512xf32>
    %201 = arith.mulf %200, %187 : vector<2x512xf32>
    %cst_97 = arith.constant 0.000000e+00 : f32
    %202 = vector.broadcast %cst_97 : f32 to vector<2x512xf32>
    %203 = arith.subf %202, %181 : vector<2x512xf32>
    %204 = arith.mulf %203, %181 : vector<2x512xf32>
    %205 = math.exp %204 : vector<2x512xf32>
    %206 = arith.mulf %201, %205 : vector<2x512xf32>
    %cst_98 = arith.constant 1.000000e+00 : f32
    %207 = vector.broadcast %cst_98 : f32 to vector<2x512xf32>
    %208 = arith.subf %207, %206 : vector<2x512xf32>
    %cst_99 = arith.constant 0.000000e+00 : f32
    %209 = vector.broadcast %cst_99 : f32 to vector<2x512xf32>
    %210 = arith.cmpf oge, %180, %209 : vector<2x512xf32>
    %cst_100 = arith.constant 0.000000e+00 : f32
    %211 = vector.broadcast %cst_100 : f32 to vector<2x512xf32>
    %212 = arith.subf %211, %208 : vector<2x512xf32>
    %213 = arith.select %210, %208, %212 : vector<2x512xi1>, vector<2x512xf32>
    %cst_101 = arith.constant 1.000000e+00 : f32
    %214 = vector.broadcast %cst_101 : f32 to vector<2x512xf32>
    %215 = arith.addf %214, %213 : vector<2x512xf32>
    %216 = arith.mulf %178, %215 : vector<2x512xf32>
    %217 = vector.extract_strided_slice %104 {offsets = [0, 1536], sizes = [2, 256], strides = [1, 1]} : vector<2x2048xf32> to vector<2x256xf32>
    %cst_102 = arith.constant 5.000000e-01 : f32
    %218 = vector.broadcast %cst_102 : f32 to vector<2x256xf32>
    %219 = arith.mulf %218, %217 : vector<2x256xf32>
    %cst_103 = arith.constant 0.707106769 : f32
    %220 = vector.broadcast %cst_103 : f32 to vector<2x256xf32>
    %221 = arith.mulf %217, %220 : vector<2x256xf32>
    %222 = math.absf %221 : vector<2x256xf32>
    %cst_104 = arith.constant 0.327591091 : f32
    %223 = vector.broadcast %cst_104 : f32 to vector<2x256xf32>
    %224 = arith.mulf %223, %222 : vector<2x256xf32>
    %cst_105 = arith.constant 1.000000e+00 : f32
    %225 = vector.broadcast %cst_105 : f32 to vector<2x256xf32>
    %226 = arith.addf %225, %224 : vector<2x256xf32>
    %cst_106 = arith.constant 1.000000e+00 : f32
    %227 = vector.broadcast %cst_106 : f32 to vector<2x256xf32>
    %228 = arith.divf %227, %226 : vector<2x256xf32>
    %cst_107 = arith.constant 1.06140542 : f32
    %229 = vector.broadcast %cst_107 : f32 to vector<2x256xf32>
    %230 = arith.mulf %229, %228 : vector<2x256xf32>
    %cst_108 = arith.constant -1.45315206 : f32
    %231 = vector.broadcast %cst_108 : f32 to vector<2x256xf32>
    %232 = arith.addf %230, %231 : vector<2x256xf32>
    %233 = arith.mulf %232, %228 : vector<2x256xf32>
    %cst_109 = arith.constant 1.42141378 : f32
    %234 = vector.broadcast %cst_109 : f32 to vector<2x256xf32>
    %235 = arith.addf %233, %234 : vector<2x256xf32>
    %236 = arith.mulf %235, %228 : vector<2x256xf32>
    %cst_110 = arith.constant -0.284496725 : f32
    %237 = vector.broadcast %cst_110 : f32 to vector<2x256xf32>
    %238 = arith.addf %236, %237 : vector<2x256xf32>
    %239 = arith.mulf %238, %228 : vector<2x256xf32>
    %cst_111 = arith.constant 0.254829586 : f32
    %240 = vector.broadcast %cst_111 : f32 to vector<2x256xf32>
    %241 = arith.addf %239, %240 : vector<2x256xf32>
    %242 = arith.mulf %241, %228 : vector<2x256xf32>
    %cst_112 = arith.constant 0.000000e+00 : f32
    %243 = vector.broadcast %cst_112 : f32 to vector<2x256xf32>
    %244 = arith.subf %243, %222 : vector<2x256xf32>
    %245 = arith.mulf %244, %222 : vector<2x256xf32>
    %246 = math.exp %245 : vector<2x256xf32>
    %247 = arith.mulf %242, %246 : vector<2x256xf32>
    %cst_113 = arith.constant 1.000000e+00 : f32
    %248 = vector.broadcast %cst_113 : f32 to vector<2x256xf32>
    %249 = arith.subf %248, %247 : vector<2x256xf32>
    %cst_114 = arith.constant 0.000000e+00 : f32
    %250 = vector.broadcast %cst_114 : f32 to vector<2x256xf32>
    %251 = arith.cmpf oge, %221, %250 : vector<2x256xf32>
    %cst_115 = arith.constant 0.000000e+00 : f32
    %252 = vector.broadcast %cst_115 : f32 to vector<2x256xf32>
    %253 = arith.subf %252, %249 : vector<2x256xf32>
    %254 = arith.select %251, %249, %253 : vector<2x256xi1>, vector<2x256xf32>
    %cst_116 = arith.constant 1.000000e+00 : f32
    %255 = vector.broadcast %cst_116 : f32 to vector<2x256xf32>
    %256 = arith.addf %255, %254 : vector<2x256xf32>
    %257 = arith.mulf %219, %256 : vector<2x256xf32>
    %258 = vector.extract_strided_slice %104 {offsets = [0, 1792], sizes = [2, 256], strides = [1, 1]} : vector<2x2048xf32> to vector<2x256xf32>
    %cst_117 = arith.constant 0.000000e+00 : f32
    %259 = vector.broadcast %cst_117 : f32 to vector<2x256xf32>
    %260 = arith.maximumf %258, %259 : vector<2x256xf32>
    %261 = arith.truncf %160 : vector<2x1024xf32> to vector<2x1024xbf16>
    %c0_118 = arith.constant 0 : index
    %c0_119 = arith.constant 0 : index
    %262 = vector.load %arg9[%c0_118, %c0_119] : memref<1024x512xbf16, #tpu.memory_space<vmem>>, vector<1024x512xbf16>
    %cst_120 = arith.constant dense<0.000000e+00> : vector<2x512xf32>
    %263 = tpu.matmul %261, %262, %cst_120 {dimension_numbers = #tpu.dot_dimension_numbers<[1], [0], [0], [1], [0, 0, 1, 1], [], []>} : vector<2x1024xbf16>, vector<1024x512xbf16>, vector<2x512xf32> -> vector<2x512xf32>
    %c0_121 = arith.constant 0 : index
    %c0_122 = arith.constant 0 : index
    %264 = vector.load %arg10[%c0_121, %c0_122] : memref<1x512xf32, #tpu.memory_space<vmem>>, vector<1x512xf32>
    %265 = vector.broadcast %264 : vector<1x512xf32> to vector<2x512xf32>
    %266 = arith.addf %263, %265 : vector<2x512xf32>
    %c0_123 = arith.constant 0 : index
    %c0_124 = arith.constant 0 : index
    %267 = vector.load %arg11[%c0_123, %c0_124] : memref<4x512xf32, #tpu.memory_space<vmem>>, vector<4x512xf32>
    %268 = vector.extract_strided_slice %267 {offsets = [0, 0], sizes = [1, 512], strides = [1, 1]} : vector<4x512xf32> to vector<1x512xf32>
    %269 = vector.extract_strided_slice %267 {offsets = [1, 0], sizes = [1, 512], strides = [1, 1]} : vector<4x512xf32> to vector<1x512xf32>
    %270 = vector.extract_strided_slice %267 {offsets = [2, 0], sizes = [1, 512], strides = [1, 1]} : vector<4x512xf32> to vector<1x512xf32>
    %271 = vector.extract_strided_slice %267 {offsets = [3, 0], sizes = [1, 512], strides = [1, 1]} : vector<4x512xf32> to vector<1x512xf32>
    %272 = vector.broadcast %270 : vector<1x512xf32> to vector<2x512xf32>
    %273 = arith.subf %266, %272 : vector<2x512xf32>
    %cst_125 = arith.constant 9.99999974E-6 : f32
    %274 = vector.broadcast %cst_125 : f32 to vector<1x512xf32>
    %275 = arith.addf %271, %274 : vector<1x512xf32>
    %276 = math.rsqrt %275 : vector<1x512xf32>
    %277 = arith.mulf %268, %276 : vector<1x512xf32>
    %278 = vector.broadcast %277 : vector<1x512xf32> to vector<2x512xf32>
    %279 = arith.mulf %273, %278 : vector<2x512xf32>
    %280 = vector.broadcast %269 : vector<1x512xf32> to vector<2x512xf32>
    %281 = arith.addf %279, %280 : vector<2x512xf32>
    %cst_126 = arith.constant 5.000000e-01 : f32
    %282 = vector.broadcast %cst_126 : f32 to vector<2x512xf32>
    %283 = arith.mulf %282, %281 : vector<2x512xf32>
    %cst_127 = arith.constant 0.707106769 : f32
    %284 = vector.broadcast %cst_127 : f32 to vector<2x512xf32>
    %285 = arith.mulf %281, %284 : vector<2x512xf32>
    %286 = math.absf %285 : vector<2x512xf32>
    %cst_128 = arith.constant 0.327591091 : f32
    %287 = vector.broadcast %cst_128 : f32 to vector<2x512xf32>
    %288 = arith.mulf %287, %286 : vector<2x512xf32>
    %cst_129 = arith.constant 1.000000e+00 : f32
    %289 = vector.broadcast %cst_129 : f32 to vector<2x512xf32>
    %290 = arith.addf %289, %288 : vector<2x512xf32>
    %cst_130 = arith.constant 1.000000e+00 : f32
    %291 = vector.broadcast %cst_130 : f32 to vector<2x512xf32>
    %292 = arith.divf %291, %290 : vector<2x512xf32>
    %cst_131 = arith.constant 1.06140542 : f32
    %293 = vector.broadcast %cst_131 : f32 to vector<2x512xf32>
    %294 = arith.mulf %293, %292 : vector<2x512xf32>
    %cst_132 = arith.constant -1.45315206 : f32
    %295 = vector.broadcast %cst_132 : f32 to vector<2x512xf32>
    %296 = arith.addf %294, %295 : vector<2x512xf32>
    %297 = arith.mulf %296, %292 : vector<2x512xf32>
    %cst_133 = arith.constant 1.42141378 : f32
    %298 = vector.broadcast %cst_133 : f32 to vector<2x512xf32>
    %299 = arith.addf %297, %298 : vector<2x512xf32>
    %300 = arith.mulf %299, %292 : vector<2x512xf32>
    %cst_134 = arith.constant -0.284496725 : f32
    %301 = vector.broadcast %cst_134 : f32 to vector<2x512xf32>
    %302 = arith.addf %300, %301 : vector<2x512xf32>
    %303 = arith.mulf %302, %292 : vector<2x512xf32>
    %cst_135 = arith.constant 0.254829586 : f32
    %304 = vector.broadcast %cst_135 : f32 to vector<2x512xf32>
    %305 = arith.addf %303, %304 : vector<2x512xf32>
    %306 = arith.mulf %305, %292 : vector<2x512xf32>
    %cst_136 = arith.constant 0.000000e+00 : f32
    %307 = vector.broadcast %cst_136 : f32 to vector<2x512xf32>
    %308 = arith.subf %307, %286 : vector<2x512xf32>
    %309 = arith.mulf %308, %286 : vector<2x512xf32>
    %310 = math.exp %309 : vector<2x512xf32>
    %311 = arith.mulf %306, %310 : vector<2x512xf32>
    %cst_137 = arith.constant 1.000000e+00 : f32
    %312 = vector.broadcast %cst_137 : f32 to vector<2x512xf32>
    %313 = arith.subf %312, %311 : vector<2x512xf32>
    %cst_138 = arith.constant 0.000000e+00 : f32
    %314 = vector.broadcast %cst_138 : f32 to vector<2x512xf32>
    %315 = arith.cmpf oge, %285, %314 : vector<2x512xf32>
    %cst_139 = arith.constant 0.000000e+00 : f32
    %316 = vector.broadcast %cst_139 : f32 to vector<2x512xf32>
    %317 = arith.subf %316, %313 : vector<2x512xf32>
    %318 = arith.select %315, %313, %317 : vector<2x512xi1>, vector<2x512xf32>
    %cst_140 = arith.constant 1.000000e+00 : f32
    %319 = vector.broadcast %cst_140 : f32 to vector<2x512xf32>
    %320 = arith.addf %319, %318 : vector<2x512xf32>
    %321 = arith.mulf %283, %320 : vector<2x512xf32>
    %322 = arith.truncf %216 : vector<2x512xf32> to vector<2x512xbf16>
    %c0_141 = arith.constant 0 : index
    %c0_142 = arith.constant 0 : index
    %323 = vector.load %arg15[%c0_141, %c0_142] : memref<512x256xbf16, #tpu.memory_space<vmem>>, vector<512x256xbf16>
    %cst_143 = arith.constant dense<0.000000e+00> : vector<2x256xf32>
    %324 = tpu.matmul %322, %323, %cst_143 {dimension_numbers = #tpu.dot_dimension_numbers<[1], [0], [0], [1], [0, 0, 1, 1], [], []>} : vector<2x512xbf16>, vector<512x256xbf16>, vector<2x256xf32> -> vector<2x256xf32>
    %c0_144 = arith.constant 0 : index
    %c0_145 = arith.constant 0 : index
    %325 = vector.load %arg16[%c0_144, %c0_145] : memref<1x256xf32, #tpu.memory_space<vmem>>, vector<1x256xf32>
    %326 = vector.broadcast %325 : vector<1x256xf32> to vector<2x256xf32>
    %327 = arith.addf %324, %326 : vector<2x256xf32>
    %c0_146 = arith.constant 0 : index
    %c0_147 = arith.constant 0 : index
    %328 = vector.load %arg17[%c0_146, %c0_147] : memref<4x256xf32, #tpu.memory_space<vmem>>, vector<4x256xf32>
    %329 = vector.extract_strided_slice %328 {offsets = [0, 0], sizes = [1, 256], strides = [1, 1]} : vector<4x256xf32> to vector<1x256xf32>
    %330 = vector.extract_strided_slice %328 {offsets = [1, 0], sizes = [1, 256], strides = [1, 1]} : vector<4x256xf32> to vector<1x256xf32>
    %331 = vector.extract_strided_slice %328 {offsets = [2, 0], sizes = [1, 256], strides = [1, 1]} : vector<4x256xf32> to vector<1x256xf32>
    %332 = vector.extract_strided_slice %328 {offsets = [3, 0], sizes = [1, 256], strides = [1, 1]} : vector<4x256xf32> to vector<1x256xf32>
    %333 = vector.broadcast %331 : vector<1x256xf32> to vector<2x256xf32>
    %334 = arith.subf %327, %333 : vector<2x256xf32>
    %cst_148 = arith.constant 9.99999974E-6 : f32
    %335 = vector.broadcast %cst_148 : f32 to vector<1x256xf32>
    %336 = arith.addf %332, %335 : vector<1x256xf32>
    %337 = math.rsqrt %336 : vector<1x256xf32>
    %338 = arith.mulf %329, %337 : vector<1x256xf32>
    %339 = vector.broadcast %338 : vector<1x256xf32> to vector<2x256xf32>
    %340 = arith.mulf %334, %339 : vector<2x256xf32>
    %341 = vector.broadcast %330 : vector<1x256xf32> to vector<2x256xf32>
    %342 = arith.addf %340, %341 : vector<2x256xf32>
    %cst_149 = arith.constant 5.000000e-01 : f32
    %343 = vector.broadcast %cst_149 : f32 to vector<2x256xf32>
    %344 = arith.mulf %343, %342 : vector<2x256xf32>
    %cst_150 = arith.constant 0.707106769 : f32
    %345 = vector.broadcast %cst_150 : f32 to vector<2x256xf32>
    %346 = arith.mulf %342, %345 : vector<2x256xf32>
    %347 = math.absf %346 : vector<2x256xf32>
    %cst_151 = arith.constant 0.327591091 : f32
    %348 = vector.broadcast %cst_151 : f32 to vector<2x256xf32>
    %349 = arith.mulf %348, %347 : vector<2x256xf32>
    %cst_152 = arith.constant 1.000000e+00 : f32
    %350 = vector.broadcast %cst_152 : f32 to vector<2x256xf32>
    %351 = arith.addf %350, %349 : vector<2x256xf32>
    %cst_153 = arith.constant 1.000000e+00 : f32
    %352 = vector.broadcast %cst_153 : f32 to vector<2x256xf32>
    %353 = arith.divf %352, %351 : vector<2x256xf32>
    %cst_154 = arith.constant 1.06140542 : f32
    %354 = vector.broadcast %cst_154 : f32 to vector<2x256xf32>
    %355 = arith.mulf %354, %353 : vector<2x256xf32>
    %cst_155 = arith.constant -1.45315206 : f32
    %356 = vector.broadcast %cst_155 : f32 to vector<2x256xf32>
    %357 = arith.addf %355, %356 : vector<2x256xf32>
    %358 = arith.mulf %357, %353 : vector<2x256xf32>
    %cst_156 = arith.constant 1.42141378 : f32
    %359 = vector.broadcast %cst_156 : f32 to vector<2x256xf32>
    %360 = arith.addf %358, %359 : vector<2x256xf32>
    %361 = arith.mulf %360, %353 : vector<2x256xf32>
    %cst_157 = arith.constant -0.284496725 : f32
    %362 = vector.broadcast %cst_157 : f32 to vector<2x256xf32>
    %363 = arith.addf %361, %362 : vector<2x256xf32>
    %364 = arith.mulf %363, %353 : vector<2x256xf32>
    %cst_158 = arith.constant 0.254829586 : f32
    %365 = vector.broadcast %cst_158 : f32 to vector<2x256xf32>
    %366 = arith.addf %364, %365 : vector<2x256xf32>
    %367 = arith.mulf %366, %353 : vector<2x256xf32>
    %cst_159 = arith.constant 0.000000e+00 : f32
    %368 = vector.broadcast %cst_159 : f32 to vector<2x256xf32>
    %369 = arith.subf %368, %347 : vector<2x256xf32>
    %370 = arith.mulf %369, %347 : vector<2x256xf32>
    %371 = math.exp %370 : vector<2x256xf32>
    %372 = arith.mulf %367, %371 : vector<2x256xf32>
    %cst_160 = arith.constant 1.000000e+00 : f32
    %373 = vector.broadcast %cst_160 : f32 to vector<2x256xf32>
    %374 = arith.subf %373, %372 : vector<2x256xf32>
    %cst_161 = arith.constant 0.000000e+00 : f32
    %375 = vector.broadcast %cst_161 : f32 to vector<2x256xf32>
    %376 = arith.cmpf oge, %346, %375 : vector<2x256xf32>
    %cst_162 = arith.constant 0.000000e+00 : f32
    %377 = vector.broadcast %cst_162 : f32 to vector<2x256xf32>
    %378 = arith.subf %377, %374 : vector<2x256xf32>
    %379 = arith.select %376, %374, %378 : vector<2x256xi1>, vector<2x256xf32>
    %cst_163 = arith.constant 1.000000e+00 : f32
    %380 = vector.broadcast %cst_163 : f32 to vector<2x256xf32>
    %381 = arith.addf %380, %379 : vector<2x256xf32>
    %382 = arith.mulf %344, %381 : vector<2x256xf32>
    %383 = arith.truncf %321 : vector<2x512xf32> to vector<2x512xbf16>
    %c0_164 = arith.constant 0 : index
    %c0_165 = arith.constant 0 : index
    %384 = vector.load %arg12[%c0_164, %c0_165] : memref<512x5xbf16, #tpu.memory_space<vmem>>, vector<512x5xbf16>
    %cst_166 = arith.constant dense<0.000000e+00> : vector<2x5xf32>
    %385 = tpu.matmul %383, %384, %cst_166 {dimension_numbers = #tpu.dot_dimension_numbers<[1], [0], [0], [1], [0, 0, 1, 1], [], []>} : vector<2x512xbf16>, vector<512x5xbf16>, vector<2x5xf32> -> vector<2x5xf32>
    %c0_167 = arith.constant 0 : index
    %c0_168 = arith.constant 0 : index
    %386 = vector.load %arg13[%c0_167, %c0_168] : memref<1x5xf32, #tpu.memory_space<vmem>>, vector<1x5xf32>
    %387 = vector.broadcast %386 : vector<1x5xf32> to vector<2x5xf32>
    %388 = arith.addf %385, %387 : vector<2x5xf32>
    %389 = arith.truncf %382 : vector<2x256xf32> to vector<2x256xbf16>
    %c0_169 = arith.constant 0 : index
    %c0_170 = arith.constant 0 : index
    %390 = vector.load %arg18[%c0_169, %c0_170] : memref<256x5xbf16, #tpu.memory_space<vmem>>, vector<256x5xbf16>
    %cst_171 = arith.constant dense<0.000000e+00> : vector<2x5xf32>
    %391 = tpu.matmul %389, %390, %cst_171 {dimension_numbers = #tpu.dot_dimension_numbers<[1], [0], [0], [1], [0, 0, 1, 1], [], []>} : vector<2x256xbf16>, vector<256x5xbf16>, vector<2x5xf32> -> vector<2x5xf32>
    %c0_172 = arith.constant 0 : index
    %c0_173 = arith.constant 0 : index
    %392 = vector.load %arg19[%c0_172, %c0_173] : memref<1x5xf32, #tpu.memory_space<vmem>>, vector<1x5xf32>
    %393 = vector.broadcast %392 : vector<1x5xf32> to vector<2x5xf32>
    %394 = arith.addf %391, %393 : vector<2x5xf32>
    %395 = arith.truncf %257 : vector<2x256xf32> to vector<2x256xbf16>
    %c0_174 = arith.constant 0 : index
    %c0_175 = arith.constant 0 : index
    %396 = vector.load %arg20[%c0_174, %c0_175] : memref<256x4xbf16, #tpu.memory_space<vmem>>, vector<256x4xbf16>
    %cst_176 = arith.constant dense<0.000000e+00> : vector<2x4xf32>
    %397 = tpu.matmul %395, %396, %cst_176 {dimension_numbers = #tpu.dot_dimension_numbers<[1], [0], [0], [1], [0, 0, 1, 1], [], []>} : vector<2x256xbf16>, vector<256x4xbf16>, vector<2x4xf32> -> vector<2x4xf32>
    %c0_177 = arith.constant 0 : index
    %c0_178 = arith.constant 0 : index
    %398 = vector.load %arg21[%c0_177, %c0_178] : memref<1x4xf32, #tpu.memory_space<vmem>>, vector<1x4xf32>
    %399 = vector.broadcast %398 : vector<1x4xf32> to vector<2x4xf32>
    %400 = arith.addf %397, %399 : vector<2x4xf32>
    %401 = arith.truncf %260 : vector<2x256xf32> to vector<2x256xbf16>
    %c0_179 = arith.constant 0 : index
    %c0_180 = arith.constant 0 : index
    %402 = vector.load %arg22[%c0_179, %c0_180] : memref<256x5xbf16, #tpu.memory_space<vmem>>, vector<256x5xbf16>
    %cst_181 = arith.constant dense<0.000000e+00> : vector<2x5xf32>
    %403 = tpu.matmul %401, %402, %cst_181 {dimension_numbers = #tpu.dot_dimension_numbers<[1], [0], [0], [1], [0, 0, 1, 1], [], []>} : vector<2x256xbf16>, vector<256x5xbf16>, vector<2x5xf32> -> vector<2x5xf32>
    %c0_182 = arith.constant 0 : index
    %c0_183 = arith.constant 0 : index
    %404 = vector.load %arg23[%c0_182, %c0_183] : memref<1x5xf32, #tpu.memory_space<vmem>>, vector<1x5xf32>
    %405 = vector.broadcast %404 : vector<1x5xf32> to vector<2x5xf32>
    %406 = arith.addf %403, %405 : vector<2x5xf32>
    %cst_184 = arith.constant 0.000000e+00 : f32
    %407 = vector.broadcast %cst_184 : f32 to vector<2x128xf32>
    %c0_185 = arith.constant 0 : index
    %c0_186 = arith.constant 0 : index
    %408 = vector.load %arg24[%c0_185, %c0_186] : memref<2x128xf32, #tpu.memory_space<vmem>>, vector<2x128xf32>
    tpu.vector_store %arg24[%c0_185, %c0_186], %407 {strides = array<i32>} : memref<2x128xf32, #tpu.memory_space<vmem>>, vector<2x128xf32>,
    %c0_187 = arith.constant 0 : index
    %c0_188 = arith.constant 0 : index
    %409 = vector.load %arg24[%c0_187, %c0_188] : memref<2x128xf32, #tpu.memory_space<vmem>>, vector<2x64xf32>
    tpu.vector_store %arg24[%c0_187, %c0_188], %98 {strides = array<i32>} : memref<2x128xf32, #tpu.memory_space<vmem>>, vector<2x64xf32>,
    %c0_189 = arith.constant 0 : index
    %c64 = arith.constant 64 : index
    %410 = vector.load %arg24[%c0_189, %c64] : memref<2x128xf32, #tpu.memory_space<vmem>>, vector<2x5xf32>
    tpu.vector_store %arg24[%c0_189, %c64], %388 {strides = array<i32>} : memref<2x128xf32, #tpu.memory_space<vmem>>, vector<2x5xf32>,
    %c0_190 = arith.constant 0 : index
    %c69 = arith.constant 69 : index
    %411 = vector.load %arg24[%c0_190, %c69] : memref<2x128xf32, #tpu.memory_space<vmem>>, vector<2x5xf32>
    tpu.vector_store %arg24[%c0_190, %c69], %394 {strides = array<i32>} : memref<2x128xf32, #tpu.memory_space<vmem>>, vector<2x5xf32>,
    %c0_191 = arith.constant 0 : index
    %c74 = arith.constant 74 : index
    %412 = vector.load %arg24[%c0_191, %c74] : memref<2x128xf32, #tpu.memory_space<vmem>>, vector<2x4xf32>
    tpu.vector_store %arg24[%c0_191, %c74], %400 {strides = array<i32>} : memref<2x128xf32, #tpu.memory_space<vmem>>, vector<2x4xf32>,
    %c0_192 = arith.constant 0 : index
    %c78 = arith.constant 78 : index
    %413 = vector.load %arg24[%c0_192, %c78] : memref<2x128xf32, #tpu.memory_space<vmem>>, vector<2x5xf32>
    tpu.vector_store %arg24[%c0_192, %c78], %406 {strides = array<i32>} : memref<2x128xf32, #tpu.memory_space<vmem>>, vector<2x5xf32>,
    return
  }
}

</mosaic_0001>

<bundles_post_ra>
// kernel: tpu_custom_call.1
= control target key start
LH: loop header
LB: loop body
LE: loop exit
PB: predicated region body
PF: predicated region fallthrough
CT: control target
= control target key end

     0   :  { %s8839_s0 = inlined_call_operand.vmem [shape: f32[32,64], index: 0, kind: input, shape index: {}]   ;;  %s8840_s1 = inlined_call_operand.vmem [shape: bf16[64,64], index: 1, kind: input, shape index: {}]   ;;  %s8841_s2 = inlined_call_operand.vmem [shape: f32[1,64], index: 2, kind: input, shape index: {}]   ;;  %s8842_s3 = inlined_call_operand.vmem [shape: bf16[64,8], index: 3, kind: input, shape index: {}]   ;;  %s8843_s4 = inlined_call_operand.vmem [shape: bf16[8,64], index: 4, kind: input, shape index: {}]   ;;  %s8844_s5 = inlined_call_operand.vmem [shape: bf16[16,32], index: 5, kind: input, shape index: {}]   ;;  %s8845_s6 = inlined_call_operand.vmem [shape: bf16[64,2048], index: 6, kind: input, shape index: {}]   ;;  %s8846_s7 = inlined_call_operand.vmem [shape: f32[1,2048], index: 7, kind: input, shape index: {}]   ;;  %s8847_s8 = inlined_call_operand.vmem [shape: f32[4,1024], index: 8, kind: input, shape index: {}]   ;;  %s8848_s9 = inlined_call_operand.hbm [shape: bf16[1024,512], index: 9, kind: input, shape index: {}]   ;;  %s8849_s10 = inlined_call_operand.vmem [shape: f32[1,512], index: 10, kind: input, shape index: {}]   ;;  %s8850_s11 = inlined_call_operand.vmem [shape: f32[4,512], index: 11, kind: input, shape index: {}]   ;;  %s8851_s12 = inlined_call_operand.vmem [shape: bf16[512,5], index: 12, kind: input, shape index: {}]   ;;  %s8852_s13 = inlined_call_operand.vmem [shape: f32[1,5], index: 13, kind: input, shape index: {}]   ;;  %s8853_s14 = inlined_call_operand.vmem [shape: f32[4,512], index: 14, kind: input, shape index: {}]   ;;  %s8854_s15 = inlined_call_operand.hbm [shape: bf16[512,256], index: 15, kind: input, shape index: {}]   ;;  %s8855_s16 = inlined_call_operand.vmem [shape: f32[1,256], index: 16, kind: input, shape index: {}]   ;;  %s8856_s17 = inlined_call_operand.vmem [shape: f32[4,256], index: 17, kind: input, shape index: {}]   ;;  %s8857_s18 = inlined_call_operand.vmem [shape: bf16[256,5], index: 18, kind: input, shape index: {}]   ;;  %s8858_s19 = inlined_call_operand.vmem [shape: f32[1,5], index: 19, kind: input, shape index: {}]   ;;  %s8859_s20 = inlined_call_operand.vmem [shape: bf16[256,4], index: 20, kind: input, shape index: {}]   ;;  %s8860_s21 = inlined_call_operand.vmem [shape: f32[1,4], index: 21, kind: input, shape index: {}]   ;;  %s8861_s22 = inlined_call_operand.vmem [shape: bf16[256,5], index: 22, kind: input, shape index: {}]   ;;  %s8862_s23 = inlined_call_operand.vmem [shape: f32[1,5], index: 23, kind: input, shape index: {}]   ;;  %s8863_s24 = inlined_call_operand.hbm [shape: f32[2,128], index: 24, kind: output, shape index: {}]  }
   0x1   :  { %8871 = sst [smem:[#allocation14_spill]] %s8839_s0 }
   0x2   :  { %8872 = sst [smem:[#allocation15_spill]] %s8840_s1 }
   0x3   :  { %8873 = sst [smem:[#allocation16_spill]] %s8841_s2 }
   0x4   :  { %8874 = sst [smem:[#allocation17_spill]] %s8842_s3 }
   0x5   :  { %8875 = sst [smem:[#allocation18_spill]] %s8843_s4 }
   0x6   :  { %8876 = sst [smem:[#allocation19_spill]] %s8844_s5 }
   0x7   :  { %8877 = sst [smem:[#allocation20_spill]] %s8845_s6 }
   0x8   :  { %8878 = sst [smem:[#allocation21_spill]] %s8846_s7 }
   0x9   :  { %8879 = sst [smem:[#allocation22_spill]] %s8847_s8 }
   0xa   :  { %29 = vsyncpa [#allocation6], 0 }
   0xb   :  { %30 = vsyncpa [#allocation9], 0 }
   0xc   :  { %31 = vsyncpa [#allocation7], 0  ;;  %s7390_s5 = smov [#allocation5]   ;;  %s7318_s6 = scalar_lea.hbm %s8848_s9, 32768 }
   0xd   :  { %s55_s26 = sshll.u32 %s7390_s5, 4  ;;  %p7319_p0 = scmp.ne.s32.totalorder %s8848_s9, %s7318_s6  ;;  %s56_s26 = int_to_ptr.vmem [resolvable:$true] %s55_s26 }
   0xe   :  { %p7322_p1 = scmp.lt.u32.totalorder %s7318_s6, %s8848_s9 }
  0x10   :  { %p7324_p2 = pnand %p7322_p1, %p7319_p0 }
  0x12   :  { %7327 = shalt.err (!%p7324_p2)
}
  0x13   :  { %s7328_s30 = scalar_lea.vmem %s56_s26, 32768  ;;  %p7333_p4 = scmp.lt.s32.totalorder %s56_s26, %s56_s26 }
  0x14   :  { %p7329_p3 = scmp.ne.s32.totalorder %s56_s26, %s7328_s30  ;;  %p7334_p5 = scmp.lt.s32.totalorder %s7328_s30, %s7328_s30 }
  0x16   :  { %p7335_p6 = por %p7334_p5, %p7333_p4 }
  0x18   :  { %p7336_p7 = pnand %p7335_p6, %p7329_p3 }
  0x1a   :  { %7339 = shalt.err (!%p7336_p7)
}
  0x1b   :  { %s7391_s3 = smov 256   ;;  %s7392_s25 = smov 16  }
  0x1c   :  { %61 = dma.hbm_to_vmem [thread:$0]  %s8848_s9, 32768, %s56_s26, [#allocation6], %s7391_s3, %s7391_s3, %s7392_s25  }
  0x1d   :  { %s7393_s1 = smov [#allocation8]   ;;  %s7340_s6 = scalar_lea.hbm %s8854_s15, 8192 }
  0x1e   :  { %s77_s5 = sshll.u32 %s7393_s1, 4  ;;  %p7341_p8 = scmp.ne.s32.totalorder %s8854_s15, %s7340_s6  ;;  %s78_s5 = int_to_ptr.vmem [resolvable:$true] %s77_s5 }
  0x1f   :  { %p7344_p9 = scmp.lt.u32.totalorder %s7340_s6, %s8854_s15 }
  0x21   :  { %p7346_p10 = pnand %p7344_p9, %p7341_p8 }
  0x23   :  { %7349 = shalt.err (!%p7346_p10)
}
  0x24   :  { %s7350_s30 = scalar_lea.vmem %s78_s5, 8192  ;;  %p7355_p12 = scmp.lt.s32.totalorder %s78_s5, %s78_s5 }
  0x25   :  { %p7351_p11 = scmp.ne.s32.totalorder %s78_s5, %s7350_s30  ;;  %p7356_p13 = scmp.lt.s32.totalorder %s7350_s30, %s7350_s30 }
  0x27   :  { %p7357_p0 = por %p7356_p13, %p7355_p12 }
  0x29   :  { %p7358_p1 = pnand %p7357_p0, %p7351_p11 }
  0x2b   :  { %7361 = shalt.err (!%p7358_p1)
}
  0x2c   :  { %s7394_s9 = smov 128   ;;  %s7395_s26 = smov 8  }
  0x2d   :  { %83 = dma.hbm_to_vmem [thread:$0]  %s8854_s15, 8192, %s78_s5, [#allocation9], %s7394_s9, %s7394_s9, %s7395_s26  }
  0x2e   :  { %7384 = dma.done.wait [#allocation6], 32768  }
  0x2f   :  { %7385 = vsyncadd [#allocation6], 4294934528 }
  0x30   :  { %7386 = dma.done.wait [#allocation9], 8192  }
  0x31   :  { %7387 = vsyncadd [#allocation9], 4294959104  ;;  %s8880_s1 = sld [smem:[#allocation15_spill]]  ;;  %s8881_s29 = sld [smem:[#allocation14_spill]]  ;;  %vm152_vm0 = vcmask 523264   ;;  %v7396_v11 = vmov 0.0  }
  0x32   :  { %s8882_s27 = sld [smem:[#allocation17_spill]]  ;;  %5852 = vst [vmem:[#allocation10] sm:$0x3] %v7396_v11  ;;  %6555 = vmatprep.subr.bf16.mxu1 %v7396_v11  ;;  %vm7397_vm1 = vmmov 0   ;;  %s8883_s30 = sld [smem:[#allocation16_spill]]  ;;  %vm219_vm2 = vcmask 516096  }
  0x33   :  { %6557 = vmatprep.mubr.msk.bf16.mxu1 %vm7397_vm1, %v7396_v11  ;;  %s8884_s3 = sld [smem:[#allocation18_spill]]  ;;  %vm336_vm3 = vcmask 1043456   ;;  %vm332_vm4 = vcmask 64512   ;;  %vm405_vm5 = vcmask 7168   ;;  %s8885_s4 = sld [smem:[#allocation19_spill]]  ;;  %vm429_vm6 = vcmask 261120  }
  0x34   :  { %s8886_s2 = sld [smem:[#allocation20_spill]]  ;;  %vm5853_vm7 = vcmask 517120   ;;  %s8887_s6 = sld [smem:[#allocation21_spill]] }
  0x37   :  { %v6627_v0 = vld [vmem:[%s8880_s1] sm:$0xff]   ;;  %v6628_v1 = vld [vmem:[%s8880_s1 + $0x8] sm:$0xff]   ;;  %v6629_v2 = vld [vmem:[%s8880_s1 + $0x10] sm:$0xff]  }
  0x38   :  { %6531 = vmatprep.subr.bf16.mxu0 %v6627_v0  ;;  %v107_v3 = vld [vmem:[%s8881_s29] sm:$0xff]  ;;  %v108_v4 = vld [vmem:[%s8881_s29 + $0x8] sm:$0xff]  ;;  %v6630_v6 = vld [vmem:[%s8880_s1 + $0x18] sm:$0xff]   ;;  %s7402_s1 = smov 78  }
  0x39   :  { %6532 = vmatpush3.bf16.msra.mxu0 %v6627_v0  ;;  %v111_v5 = vpack.c.bf16 %v108_v4, %v107_v3  ;;  %v109_v7 = vld [vmem:[%s8881_s29 + $0x10] sm:$0xff]  ;;  %v110_v8 = vld [vmem:[%s8881_s29 + $0x18] sm:$0xff]  ;;  %v6631_v10 = vld [vmem:[%s8882_s27] sm:$0xff]   ;;  %s8888_s29 = sld [smem:[#allocation22_spill]] }
  0x3a   :  { %6533 = vmatprep.subr.bf16.mxu0 %v6628_v1  ;;  %v112_v9 = vpack.c.bf16 %v110_v8, %v109_v7  ;;  %v6632_v12 = vld [vmem:[%s8882_s27 + $0x8] sm:$0xff]   ;;  %v6633_v13 = vld [vmem:[%s8882_s27 + $0x10] sm:$0xff]   ;;  %v6634_v14 = vld [vmem:[%s8882_s27 + $0x18] sm:$0xff]  }
  0x3b   :  { %6539 = vmatprep.mubr.msk.bf16.mxu0 %vm152_vm0, %v111_v5  ;;  %v5895_v15 = vld [vmem:[%s8883_s30] ss:$0 sm:$0xff] }
  0x3c   :  { %v331_v0 = vld [vmem:[%s8884_s3] sm:$0xf] }
  0x3d   :  { %6534 = vmatpush3.bf16.msra.mxu0 %v6628_v1  ;;  %v338_v1 = vsel %vm336_vm3, %v331_v0, 0 }
  0x3e   :  { %6535 = vmatprep.subr.bf16.mxu0 %v6629_v2  ;;  %6556 = vmatpush3.bf16.msra.mxu1 %v338_v1 }
  0x3f   :  { %6561 = vmatprep.subr.bf16.mxu1 %v7396_v11 }
  0x41   :  { %6536 = vmatpush3.bf16.msra.mxu0 %v6629_v2 }
  0x42   :  { %6537 = vmatprep.subr.bf16.mxu0 %v6630_v6 }
  0x45   :  { %6538 = vmatpush3.bf16.msra.mxu0 %v6630_v6 }
  0x46   :  { %6543 = vmatprep.subr.bf16.mxu0 %v7396_v11 }
  0x48   :  { %6540 = vmatmul.mubr.msk.bf16.vlgmr.msra.gmra.mrb[0].mxu0 %vm152_vm0, %v112_v9 }
  0x49   :  { %6544 = vmatpush3.bf16.msra.mxu0 %v6631_v10  ;;  %6551 = vmatprep.mubr.msk.bf16.mxu0 %vm7397_vm1, %v7396_v11 }
  0x4a   :  { %6545 = vmatprep.subr.bf16.mxu0 %v7396_v11 }
  0x4d   :  { %6546 = vmatpush3.bf16.msra.mxu0 %v6632_v12 }
  0x4e   :  { %6547 = vmatprep.subr.bf16.mxu0 %v7396_v11 }
  0x51   :  { %6548 = vmatpush3.bf16.msra.mxu0 %v6633_v13 }
  0x52   :  { %6549 = vmatprep.subr.bf16.mxu0 %v7396_v11 }
  0x55   :  { %6550 = vmatpush3.bf16.msra.mxu0 %v6634_v14 }
  0x56   :  { %6569 = vmatprep.subr.bf16.mxu0 %v7396_v11 }
 0x11b   :  { %v6541_v16 = vpop.f32.mrb[0].mxu0 }
 0x11c   :  { %v7605_v17 = vadd.f32 %v6541_v16, %v5895_v15  ;;  %v193_v18 = vpop.f32.mrb[1].mxu0 }
 0x11d   :  { %v7607_v19 = vadd.f32 %v5895_v15, %v193_v18  ;;  %v6542_v20 = vpop.f32.mrb[2].mxu0 }
 0x11e   :  { %v7609_v21 = vadd.f32 %v6542_v20, %v5895_v15  ;;  %v196_v22 = vpop.f32.mrb[3].mxu0  ;;  %v231_v23 = vsel %vm152_vm0, %v7605_v17, 0.0  ;;  %v242_v24 = vsel %vm152_vm0, %v7605_v17, -inf  ;;  %v390_v20 = vlaneseq }
 0x11f   :  { %v7615_v25 = vadd.f32 %v5895_v15, %v196_v22  ;;  %v208_v26 = vsel %vm152_vm0, %v7607_v19, 0.0  ;;  %v221_v27 = vsel %vm152_vm0, %v7607_v19, -inf }
 0x120   :  { %v232_v28 = vsel %vm152_vm0, %v7609_v21, 0.0  ;;  %v243_v29 = vsel %vm152_vm0, %v7609_v21, -inf  ;;  %v7642_v22 = vshrl.u32 %v390_v20, 7 }
 0x121   :  { %v233_v30 = vadd.f32 %v232_v28, %v231_v23  ;;  %v244_v31 = vmax.f32 %v242_v24, %v243_v29  ;;  %v209_v32 = vsel %vm152_vm0, %v7615_v25, 0.0  ;;  %v222_v33 = vsel %vm152_vm0, %v7615_v25, -inf }
 0x122   :  { %v210_v34 = vadd.f32 %v209_v32, %v208_v26  ;;  %v223_v35 = vmax.f32 %v221_v27, %v222_v33  ;;  %v7645_v23 = vsub.s32 0, %v7642_v22  ;;  %v7649_v27 = vsub.s32 1, %v7642_v22 }
 0x123   :  { %v234_v36 = vrot.slane %v233_v30, 4  ;;  %v245_v37 = vrot.slane %v244_v31, 4 }
 0x124   :  { %v211_v38 = vrot.slane %v210_v34, 4  ;;  %v224_v39 = vrot.slane %v223_v35, 4 }
 0x125   :  { %v235_v40 = vadd.f32 %v234_v36, %v233_v30  ;;  %v246_v41 = vmax.f32 %v244_v31, %v245_v37 }
 0x126   :  { %v212_v42 = vadd.f32 %v211_v38, %v210_v34  ;;  %v225_v43 = vmax.f32 %v223_v35, %v224_v39 }
 0x127   :  { %v236_v44 = vrot.slane %v235_v40, 2  ;;  %v247_v45 = vrot.slane %v246_v41, 2 }
 0x128   :  { %v213_v46 = vrot.slane %v212_v42, 2  ;;  %v226_v47 = vrot.slane %v225_v43, 2 }
 0x129   :  { %v237_v48 = vadd.f32 %v236_v44, %v235_v40  ;;  %v248_v49 = vmax.f32 %v246_v41, %v247_v45 }
 0x12a   :  { %v214_v50 = vadd.f32 %v213_v46, %v212_v42  ;;  %v227_v51 = vmax.f32 %v225_v43, %v226_v47 }
 0x12b   :  { %v238_v52 = vrot.slane %v237_v48, 1  ;;  %v249_v53 = vrot.slane %v248_v49, 1 }
 0x12c   :  { %v215_v54 = vrot.slane %v214_v50, 1  ;;  %v228_v55 = vrot.slane %v227_v51, 1 }
 0x12d   :  { %v239_v56 = vadd.f32 %v238_v52, %v237_v48  ;;  %v250_v57 = vmax.f32 %v248_v49, %v249_v53 }
 0x12e   :  { %v216_v58 = vadd.f32 %v215_v54, %v214_v50  ;;  %v229_v59 = vmax.f32 %v227_v51, %v228_v55  ;;  %v6635_v55 = vld [vmem:[%s8885_s4] sm:$0xff]  }
 0x12f   :  { %v240_v60 = vmul.f32 0.0625, %v239_v56  ;;  %251 = vst.msk [vmem:[#allocation2 + $0x3] sm:$0x1] %vm219_vm2, %v250_v57 }
 0x130   :  { %v218_v61 = vmul.f32 0.0625, %v216_v58  ;;  %230 = vst.msk [vmem:[#allocation2 + $0x2] sm:$0x1] %vm219_vm2, %v229_v59 }
 0x131   :  { %241 = vst.msk [vmem:[#allocation2 + $0x1] sm:$0x1] %vm219_vm2, %v240_v60 }
 0x132   :  { %220 = vst.msk [vmem:[#allocation2] sm:$0x1] %vm219_vm2, %v218_v61 }
 0x139   :  { %v252_v62 = vld [vmem:[#allocation2] sm:$0xf] }
 0x13a   :  { %v253_v63 = vpack.c.bf16 %v252_v62, %v252_v62  ;;  %v6636_v62 = vld [vmem:[%s8885_s4] sm:$0xff]   ;;  %s7401_s4 = smov 74  }
 0x13c   :  { %6552 = vmatmul.mubr.msk.bf16.vlgmr.msra.gmra.mrb[4].mxu0 %vm152_vm0, %v253_v63  ;;  %v7398_v63 = vmov 0  }
 0x13d   :  { %6573 = vmatprep.mubr.msk.bf16.mxu0 %vm7397_vm1, %v7396_v11  ;;  %6625 = vset.pattern.permute.xlu0 %v7398_v63 }
 0x13e   :  { %6626 = vset.pattern.permute.xlu1 %v7398_v63 }
 0x20f   :  { %v323_v2 = vpop.f32.mrb[4].mxu0 }
 0x210   :  { %v329_v3 = vmax.f32 %v323_v2, 0.0  ;;  %v6553_v4 = vpop.f32.mrb[5].mxu0 }
 0x211   :  { %v326_v5 = vpop.f32.mrb[6].mxu0 }
 0x212   :  { %v330_v6 = vpack.c.bf16 %v329_v3, %v329_v3  ;;  %v6554_v7 = vpop.f32.mrb[7].mxu0 }
 0x214   :  { %6558 = vmatmul.mubr.msk.bf16.vlgmr.msra.gmra.mrb[0].mxu1 %vm332_vm4, %v330_v6 }
 0x215   :  { %6565 = vmatprep.mubr.msk.bf16.mxu1 %vm7397_vm1, %v7396_v11 }
 0x2e7   :  { %v374_v8 = vpop.f32.mrb[0].mxu1 }
 0x2e8   :  { %v381_v9 = vrot.slane %v374_v8, 2  ;;  %v6559_v10 = vpop.f32.mrb[1].mxu1 }
 0x2e9   :  { %v377_v12 = vpop.f32.mrb[2].mxu1 }
 0x2ea   :  { %v383_v13 = vadd.f32 %v381_v9, %v374_v8  ;;  %v6560_v14 = vpop.f32.mrb[3].mxu1 }
 0x2ec   :  { %v5908_v15 = vmul.f32 -1.442695, %v383_v13 }
 0x2ee   :  { %7197 = vpow2.f32 %v5908_v15 }
 0x2f8   :  { %v7198_v16 = vpop.eup %7197 }
 0x2f9   :  { %v387_v18 = vadd.f32 1.0, %v7198_v16 }
 0x2fb   :  { %7199 = vrcp.f32 %v387_v18 }
 0x305   :  { %v7200_v24 = vpop.eup %7199 }
 0x306   :  { %v393_v26 = vrot.slane %v7200_v24, %v7645_v23  ;;  %v512_v32 = vrot.slane %v7200_v24, %v7649_v27 }
 0x308   :  { %v7652_v28 = vmul.f32 %v393_v26, %v7607_v19  ;;  %v7659_v31 = vmul.f32 %v393_v26, %v7615_v25  ;;  %v7667_v34 = vmul.f32 %v512_v32, %v7609_v21  ;;  %v7670_v35 = vmul.f32 %v512_v32, %v7605_v17 }
 0x30a   :  { %v408_v29 = vsel %vm152_vm0, %v7652_v28, -inf  ;;  %v396_v30 = vsel %vm152_vm0, %v7652_v28, 0.0  ;;  %v411_v33 = vsel %vm152_vm0, %v7659_v31, -inf  ;;  %v399_v19 = vsel %vm152_vm0, %v7659_v31, 0.0 }
 0x30b   :  { %409 = vmax.xlane.f32.xlu1 %v408_v29  ;;  %397 = vadd.xlane.f32.xlu0 %v396_v30  ;;  %v518_v25 = vsel %vm152_vm0, %v7667_v34, 0.0  ;;  %v515_v36 = vsel %vm152_vm0, %v7670_v35, 0.0  ;;  %v528_v37 = vsel %vm152_vm0, %v7667_v34, -inf  ;;  %v525_v21 = vsel %vm152_vm0, %v7670_v35, -inf }
 0x30f   :  { %412 = vmax.xlane.f32.xlu1 %v411_v33  ;;  %400 = vadd.xlane.f32.xlu0 %v399_v19  ;;  %v627_v33 = vld [vmem:[%s8886_s2] sm:$0xff] }
 0x310   :  { %v635_v19 = vld [vmem:[%s8886_s2 + $0x40] sm:$0xff] }
 0x313   :  { %519 = vadd.xlane.f32.xlu1 %v518_v25  ;;  %516 = vadd.xlane.f32.xlu0 %v515_v36  ;;  %v628_v25 = vld [vmem:[%s8886_s2 + $0x8] sm:$0xff]  ;;  %v5918_v36 = vcombine.high %v627_v33, %v635_v19 }
 0x317   :  { %529 = vmax.xlane.f32.xlu1 %v528_v37  ;;  %526 = vmax.xlane.f32.xlu0 %v525_v21  ;;  %v636_v37 = vld [vmem:[%s8886_s2 + $0x48] sm:$0xff]  ;;  %v5917_v21 = vcombine.low %v627_v33, %v635_v19 }
 0x398   :  { %v410_v17 = vpop.xlane.xlu1 %409  ;;  %v398_v38 = vpop.xlane.xlu0 %397 }
 0x399   :  { %414 = vst.msk [vmem:[#allocation4 + $0x10] sm:$0xff] %vm405_vm5, %v410_v17  ;;  %v403_v39 = vmul.f32 0.015625, %v398_v38  ;;  %v5919_v17 = vcombine.low %v628_v25, %v636_v37  ;;  %v5920_v38 = vcombine.high %v628_v25, %v636_v37 }
 0x39b   :  { %406 = vst.msk [vmem:[#allocation4] sm:$0xff] %vm405_vm5, %v403_v39  ;;  %v643_v39 = vld [vmem:[%s8886_s2 + $0x80] sm:$0xff] }
 0x39c   :  { %v413_v40 = vpop.xlane.xlu1 %412  ;;  %v401_v41 = vpop.xlane.xlu0 %400 }
 0x39d   :  { %415 = vst.msk [vmem:[#allocation4 + $0x18] sm:$0xff] %vm405_vm5, %v413_v40  ;;  %v404_v42 = vmul.f32 0.015625, %v401_v41  ;;  %v651_v40 = vld [vmem:[%s8886_s2 + $0xc0] sm:$0xff]  ;;  %v644_v41 = vld [vmem:[%s8886_s2 + $0x88] sm:$0xff] }
 0x39f   :  { %407 = vst.msk [vmem:[#allocation4 + $0x8] sm:$0xff] %vm405_vm5, %v404_v42  ;;  %v5934_v42 = vcombine.high %v643_v39, %v651_v40 }
 0x3a0   :  { %v520_v43 = vpop.xlane.xlu1 %519  ;;  %v517_v44 = vpop.xlane.xlu0 %516  ;;  %v420_v49 = vld [vmem:[#allocation4 + $0x10] sm:$0xff] }
 0x3a1   :  { %v521_v45 = vmul.f32 0.015625, %v517_v44  ;;  %v522_v51 = vmul.f32 0.015625, %v520_v43  ;;  %v652_v43 = vld [vmem:[%s8886_s2 + $0xc8] sm:$0xff]  ;;  %v5933_v44 = vcombine.low %v643_v39, %v651_v40  ;;  %v653_v40 = vld [vmem:[%s8886_s2 + $0xd0] sm:$0xff] }
 0x3a2   :  { %v418_v46 = vld [vmem:[#allocation4] sm:$0xff] }
 0x3a3   :  { %523 = vst.msk [vmem:[#allocation4] sm:$0xff] %vm405_vm5, %v521_v45  ;;  %v5935_v45 = vcombine.low %v644_v41, %v652_v43 }
 0x3a4   :  { %v421_v47 = vld [vmem:[#allocation4 + $0x18] sm:$0xff]  ;;  %v530_v48 = vpop.xlane.xlu1 %529  ;;  %v527_v50 = vpop.xlane.xlu0 %526 }
 0x3a5   :  { %532 = vst.msk [vmem:[#allocation4 + $0x18] sm:$0xff] %vm405_vm5, %v530_v48  ;;  %531 = vst.msk [vmem:[#allocation4 + $0x10] sm:$0xff] %vm405_vm5, %v527_v50  ;;  %v423_v54 = vpack.c.bf16 %v421_v47, %v420_v49  ;;  %v659_v47 = vld [vmem:[%s8886_s2 + $0x100] sm:$0xff]  ;;  %v660_v49 = vld [vmem:[%s8886_s2 + $0x108] sm:$0xff] }
 0x3a6   :  { %v419_v52 = vld [vmem:[#allocation4 + $0x8] sm:$0xff]  ;;  %v667_v48 = vld [vmem:[%s8886_s2 + $0x140] sm:$0xff] }
 0x3a7   :  { %v422_v53 = vpack.c.bf16 %v419_v52, %v418_v46  ;;  %524 = vst.msk [vmem:[#allocation4 + $0x8] sm:$0xff] %vm405_vm5, %v522_v51  ;;  %v5936_v46 = vcombine.high %v644_v41, %v652_v43  ;;  %v5949_v50 = vcombine.low %v659_v47, %v667_v48  ;;  %v5950_v51 = vcombine.high %v659_v47, %v667_v48  ;;  %v668_v52 = vld [vmem:[%s8886_s2 + $0x148] sm:$0xff]  ;;  %v646_v41 = vld [vmem:[%s8886_s2 + $0x98] sm:$0xff]  ;;  %v661_v47 = vld [vmem:[%s8886_s2 + $0x110] sm:$0xff] }
 0x3a8   :  { %v669_v48 = vld [vmem:[%s8886_s2 + $0x150] sm:$0xff] }
 0x3a9   :  { %6562 = vmatpush3.bf16.msra.mxu1 %v422_v53  ;;  %v675_v53 = vld [vmem:[%s8886_s2 + $0x180] sm:$0xff] }
 0x3aa   :  { %6563 = vmatprep.subr.bf16.mxu1 %v7396_v11  ;;  %v535_v56 = vld [vmem:[#allocation4] sm:$0xff] }
 0x3ac   :  { %v537_v59 = vld [vmem:[#allocation4 + $0x10] sm:$0xff]  ;;  %v538_v60 = vld [vmem:[#allocation4 + $0x18] sm:$0xff] }
 0x3ad   :  { %6564 = vmatpush3.bf16.msra.mxu1 %v423_v54  ;;  %v540_v61 = vpack.c.bf16 %v538_v60, %v537_v59  ;;  %v683_v54 = vld [vmem:[%s8886_s2 + $0x1c0] sm:$0xff]  ;;  %v684_v59 = vld [vmem:[%s8886_s2 + $0x1c8] sm:$0xff]  ;;  %v7751_v60 = vld [vmem:[%s8886_s2 + $0x10] sm:$0xff] }
 0x3ae   :  { %v536_v57 = vld [vmem:[#allocation4 + $0x8] sm:$0xff]  ;;  %1098 = vmatprep.subr.bf16.mxu1 %v5918_v36 }
 0x3af   :  { %v539_v58 = vpack.c.bf16 %v536_v57, %v535_v56  ;;  %v5952_v56 = vcombine.high %v660_v49, %v668_v52  ;;  %v5966_v57 = vcombine.high %v675_v53, %v683_v54 }
 0x3b0   :  { %6566 = vmatmul.mubr.msk.bf16.vlgmr.msra.gmra.mrb[4].mxu1 %vm429_vm6, %v6635_v55  ;;  %v5951_v55 = vcombine.low %v660_v49, %v668_v52  ;;  %v662_v49 = vld [vmem:[%s8886_s2 + $0x118] sm:$0xff] }
 0x3b1   :  { %6570 = vmatpush3.bf16.msra.mxu0 %v539_v58  ;;  %1130 = vmatprep.mubr.bf16.mxu1 %v7398_v63  ;;  %v676_v58 = vld [vmem:[%s8886_s2 + $0x188] sm:$0xff] }
 0x3b2   :  { %6571 = vmatprep.subr.bf16.mxu0 %v7396_v11  ;;  %1099 = vmatpush1.bf16.msra.mxu1 %v5917_v21 }
 0x3b3   :  { %1100 = vmatprep.subr.bf16.mxu1 %v5934_v42  ;;  %v654_v42 = vld [vmem:[%s8886_s2 + $0xd8] sm:$0xff] }
 0x3b4   :  { %v5939_v52 = vcombine.low %v646_v41, %v654_v42 }
 0x3b5   :  { %6572 = vmatpush3.bf16.msra.mxu0 %v540_v61  ;;  %v5968_v61 = vcombine.high %v676_v58, %v684_v59 }
 0x3b6   :  { %1139 = vmatprep.subr.bf16.mxu0 %v5920_v38  ;;  %1101 = vmatpush1.bf16.msra.mxu1 %v5933_v44 }
 0x3b7   :  { %1102 = vmatprep.subr.bf16.mxu1 %v5950_v51 }
 0x3b8   :  { %6574 = vmatmul.mubr.msk.bf16.vlgmr.msra.gmra.mrb[8].mxu0 %vm429_vm6, %v6636_v62  ;;  %v7756_v62 = vld [vmem:[%s8886_s2 + $0x50] sm:$0xff] }
 0x3b9   :  { %1171 = vmatprep.mubr.bf16.mxu0 %v7398_v63  ;;  %1140 = vmatpush1.bf16.msra.mxu0 %v5919_v17 }
 0x3ba   :  { %1141 = vmatprep.subr.bf16.mxu0 %v5936_v46  ;;  %1103 = vmatpush1.bf16.msra.mxu1 %v5949_v50  ;;  %v5940_v46 = vcombine.high %v646_v41, %v654_v42  ;;  %v670_v50 = vld [vmem:[%s8886_s2 + $0x158] sm:$0xff] }
 0x3bb   :  { %1104 = vmatprep.subr.bf16.mxu1 %v5966_v57  ;;  %v678_v57 = vld [vmem:[%s8886_s2 + $0x198] sm:$0xff] }
 0x3bd   :  { %1142 = vmatpush1.bf16.msra.mxu0 %v5935_v45 }
 0x3be   :  { %1143 = vmatprep.subr.bf16.mxu0 %v5952_v56  ;;  %v685_v56 = vld [vmem:[%s8886_s2 + $0x1d0] sm:$0xff] }
 0x3c1   :  { %1144 = vmatpush1.bf16.msra.mxu0 %v5951_v55  ;;  %v677_v55 = vld [vmem:[%s8886_s2 + $0x190] sm:$0xff] }
 0x3c2   :  { %1145 = vmatprep.subr.bf16.mxu0 %v5968_v61  ;;  %v5970_v61 = vcombine.high %v677_v55, %v685_v56 }
 0x483   :  { %v467_v0 = vpop.f32.mrb[4].mxu1 }
 0x484   :  { %v5911_v1 = vmul.f32 -1.442695, %v467_v0  ;;  %v6567_v2 = vpop.f32.mrb[5].mxu1  ;;  %v7761_v0 = vld [vmem:[%s8886_s2 + $0x18] sm:$0xff] }
 0x485   :  { %v470_v11 = vpop.f32.mrb[6].mxu1  ;;  %v5965_v2 = vcombine.low %v675_v53, %v683_v54  ;;  %v5954_v53 = vcombine.high %v661_v47, %v669_v48  ;;  %v5956_v54 = vcombine.high %v662_v49, %v670_v50 }
 0x486   :  { %7201 = vpow2.f32 %v5911_v1  ;;  %v5912_v3 = vmul.f32 -1.442695, %v470_v11  ;;  %v6568_v4 = vpop.f32.mrb[7].mxu1  ;;  %v7766_v1 = vld [vmem:[%s8886_s2 + $0x58] sm:$0xff]  ;;  %v5921_v11 = vcombine.low %v7751_v60, %v7756_v62 }
 0x487   :  { %v5967_v4 = vcombine.low %v676_v58, %v684_v59  ;;  %1105 = vmatpush1.bf16.msra.mxu1 %v5965_v2  ;;  %v686_v58 = vld [vmem:[%s8886_s2 + $0x1d8] sm:$0xff]  ;;  %v5953_v59 = vcombine.low %v661_v47, %v669_v48  ;;  %v632_v2 = vld [vmem:[%s8886_s2 + $0x28] sm:$0xff] }
 0x488   :  { %7203 = vpow2.f32 %v5912_v3  ;;  %v5923_v3 = vcombine.low %v7761_v0, %v7766_v1  ;;  %v658_v47 = vld [vmem:[%s8886_s2 + $0xf8] sm:$0xff] }
 0x489   :  { %1146 = vmatpush1.bf16.msra.mxu0 %v5967_v4  ;;  %v5971_v4 = vcombine.low %v678_v57, %v686_v58 }
 0x48b   :  { %v583_v5 = vpop.f32.mrb[8].mxu0 }
 0x48c   :  { %v5915_v6 = vmul.f32 -1.442695, %v583_v5  ;;  %v6575_v7 = vpop.f32.mrb[9].mxu0  ;;  %v5922_v5 = vcombine.high %v7751_v60, %v7756_v62  ;;  %v5955_v60 = vcombine.low %v662_v49, %v670_v50  ;;  %v5972_v62 = vcombine.high %v678_v57, %v686_v58 }
 0x48d   :  { %v586_v8 = vpop.f32.mrb[10].mxu0 }
 0x48e   :  { %7205 = vpow2.f32 %v5915_v6  ;;  %v5916_v9 = vmul.f32 -1.442695, %v586_v8  ;;  %v6576_v10 = vpop.f32.mrb[11].mxu0  ;;  %v5924_v6 = vcombine.high %v7761_v0, %v7766_v1  ;;  %1180 = vmatprep.subr.bf16.mxu1 %v5922_v5  ;;  %v631_v0 = vld [vmem:[%s8886_s2 + $0x20] sm:$0xff] }
 0x48f   :  { %v639_v1 = vld [vmem:[%s8886_s2 + $0x60] sm:$0xff] }
 0x490   :  { %v7202_v12 = vpop.eup %7201  ;;  %7207 = vpow2.f32 %v5916_v9  ;;  %1221 = vmatprep.subr.bf16.mxu0 %v5924_v6  ;;  %v5926_v5 = vcombine.high %v631_v0, %v639_v1 }
 0x491   :  { %v480_v13 = vadd.f32 1.0, %v7202_v12 }
 0x492   :  { %v7204_v14 = vpop.eup %7203 }
 0x493   :  { %7209 = vrcp.f32 %v480_v13  ;;  %v481_v15 = vadd.f32 1.0, %v7204_v14 }
 0x495   :  { %7211 = vrcp.f32 %v481_v15 }
 0x498   :  { %v7206_v16 = vpop.eup %7205 }
 0x499   :  { %v596_v18 = vadd.f32 1.0, %v7206_v16 }
 0x49a   :  { %v7208_v20 = vpop.eup %7207 }
 0x49b   :  { %7213 = vrcp.f32 %v596_v18  ;;  %v597_v24 = vadd.f32 1.0, %v7208_v20 }
 0x49d   :  { %v7210_v26 = vpop.eup %7209  ;;  %7215 = vrcp.f32 %v597_v24 }
 0x49e   :  { %488 = vperm.xlu0 %6625, %v7210_v26  }
 0x49f   :  { %v7212_v29 = vpop.eup %7211 }
 0x4a0   :  { %493 = vperm.xlu1 %6626, %v7212_v29  }
 0x4a5   :  { %v7214_v30 = vpop.eup %7213 }
 0x4a6   :  { %604 = vperm.xlu1 %6626, %v7214_v30  }
 0x4a7   :  { %v7216_v32 = vpop.eup %7215 }
 0x4aa   :  { %609 = vperm.xlu1 %6626, %v7216_v32  }
 0x51d   :  { %v489_v7 = vpop.permute.xlu0 %488 }
 0x51e   :  { %v496_v8 = vmul.f32 %v489_v7, %v7652_v28  ;;  %v647_v7 = vld [vmem:[%s8886_s2 + $0xa0] sm:$0xff] }
 0x51f   :  { %v494_v9 = vpop.permute.xlu1 %493 }
 0x520   :  { %v497_v10 = vmul.f32 %v494_v9, %v7659_v31  ;;  %v498_v12 = vsel %vm152_vm0, %v496_v8, 0.0  ;;  %v655_v8 = vld [vmem:[%s8886_s2 + $0xe0] sm:$0xff]  ;;  %v648_v9 = vld [vmem:[%s8886_s2 + $0xa8] sm:$0xff] }
 0x522   :  { %v499_v13 = vsel %vm152_vm0, %v497_v10, 0.0  ;;  %v656_v10 = vld [vmem:[%s8886_s2 + $0xe8] sm:$0xff] }
 0x523   :  { %v500_v14 = vadd.f32 %v499_v13, %v498_v12  ;;  %v5925_v12 = vcombine.low %v631_v0, %v639_v1  ;;  %v690_v0 = vld [vmem:[%s8886_s2 + $0x1f8] sm:$0xff] }
 0x525   :  { %v501_v15 = vrot.slane %v500_v14, 4  ;;  %v605_v16 = vpop.permute.xlu1 %604 }
 0x526   :  { %v612_v20 = vmul.f32 %v605_v16, %v7670_v35  ;;  %v663_v16 = vld [vmem:[%s8886_s2 + $0x120] sm:$0xff] }
 0x527   :  { %v502_v18 = vadd.f32 %v501_v15, %v500_v14  ;;  %v5942_v14 = vcombine.high %v647_v7, %v655_v8  ;;  %v5944_v15 = vcombine.high %v648_v9, %v656_v10 }
 0x528   :  { %v614_v28 = vsel %vm152_vm0, %v612_v20, 0.0  ;;  %v664_v20 = vld [vmem:[%s8886_s2 + $0x128] sm:$0xff] }
 0x529   :  { %v503_v24 = vrot.slane %v502_v18, 2  ;;  %v610_v26 = vpop.permute.xlu1 %609 }
 0x52a   :  { %v613_v29 = vmul.f32 %v610_v26, %v7667_v34  ;;  %v645_v34 = vld [vmem:[%s8886_s2 + $0x90] sm:$0xff]  ;;  %v5941_v26 = vcombine.low %v647_v7, %v655_v8 }
 0x52b   :  { %v504_v30 = vadd.f32 %v503_v24, %v502_v18  ;;  %v5938_v45 = vcombine.high %v645_v34, %v653_v40  ;;  %v5937_v51 = vcombine.low %v645_v34, %v653_v40  ;;  %v671_v18 = vld [vmem:[%s8886_s2 + $0x160] sm:$0xff]  ;;  %v672_v24 = vld [vmem:[%s8886_s2 + $0x168] sm:$0xff] }
 0x52c   :  { %v615_v32 = vsel %vm152_vm0, %v613_v29, 0.0  ;;  %v5943_v29 = vcombine.low %v648_v9, %v656_v10  ;;  %v6642_v7 = vld [vmem:[#allocation5 + $0xc] ss:$16 sps:$4 sm:$0xff]   ;;  %v6637_v8 = vld [vmem:[#allocation5] ss:$16 sps:$4 sm:$0xff]  }
 0x52d   :  { %v505_v31 = vrot.slane %v504_v30, 1  ;;  %v616_v33 = vadd.f32 %v615_v32, %v614_v28  ;;  %v5960_v28 = vcombine.high %v664_v20, %v672_v24  ;;  %v679_v32 = vld [vmem:[%s8886_s2 + $0x1a0] sm:$0xff]  ;;  %v6645_v9 = vld [vmem:[#allocation5 + $0x24] ss:$16 sps:$4 sm:$0xff]  }
 0x52e   :  { %v6648_v10 = vld [vmem:[#allocation5 + $0x2c] ss:$16 sps:$4 sm:$0xff]  }
 0x52f   :  { %v506_v19 = vadd.f32 %v505_v31, %v504_v30  ;;  %v617_v25 = vrot.slane %v616_v33, 4  ;;  %v5958_v30 = vcombine.high %v663_v16, %v671_v18  ;;  %v687_v31 = vld [vmem:[%s8886_s2 + $0x1e0] sm:$0xff] }
 0x530   :  { %v5973_v34 = vcombine.low %v679_v32, %v687_v31 }
 0x531   :  { %v507_v36 = vmul.f32 0.0625, %v506_v19  ;;  %v618_v37 = vadd.f32 %v617_v25, %v616_v33  ;;  %v680_v33 = vld [vmem:[%s8886_s2 + $0x1a8] sm:$0xff]  ;;  %v5957_v25 = vcombine.low %v663_v16, %v671_v18 }
 0x532   :  { %v688_v19 = vld [vmem:[%s8886_s2 + $0x1e8] sm:$0xff] }
 0x533   :  { %508 = vst.msk [vmem:[#allocation3] sm:$0x1] %vm219_vm2, %v507_v36  ;;  %v619_v21 = vrot.slane %v618_v37, 2  ;;  %v5959_v36 = vcombine.low %v664_v20, %v672_v24  ;;  %v5975_v40 = vcombine.low %v680_v33, %v688_v19  ;;  %v6649_v16 = vld [vmem:[#allocation5 + $0x40] ss:$16 sps:$4 sm:$0xff]  }
 0x534   :  { %v6652_v18 = vld [vmem:[#allocation5 + $0x48] ss:$16 sps:$4 sm:$0xff]   ;;  %v6657_v20 = vld [vmem:[#allocation5 + $0x64] ss:$16 sps:$4 sm:$0xff]   ;;  %v6655_v24 = vld [vmem:[#allocation5 + $0x60] ss:$16 sps:$4 sm:$0xff]  }
 0x535   :  { %v620_v17 = vadd.f32 %v619_v21, %v618_v37  ;;  %v5974_v37 = vcombine.high %v679_v32, %v687_v31  ;;  %v5976_v21 = vcombine.high %v680_v33, %v688_v19  ;;  %v6664_v32 = vld [vmem:[#allocation5 + $0x88] ss:$16 sps:$4 sm:$0xff]   ;;  %v6669_v31 = vld [vmem:[#allocation5 + $0xa4] ss:$16 sps:$4 sm:$0xff]   ;;  %v6672_v33 = vld [vmem:[#allocation5 + $0xac] ss:$16 sps:$4 sm:$0xff]  }
 0x536   :  { %v6667_v19 = vld [vmem:[#allocation5 + $0xa0] ss:$16 sps:$4 sm:$0xff]  }
 0x537   :  { %v621_v35 = vrot.slane %v620_v17, 1 }
 0x539   :  { %v622_v38 = vadd.f32 %v621_v35, %v620_v17  ;;  %v633_v17 = vld [vmem:[%s8886_s2 + $0x30] sm:$0xff] }
 0x53a   :  { %v641_v35 = vld [vmem:[%s8886_s2 + $0x70] sm:$0xff] }
 0x53b   :  { %v623_v39 = vmul.f32 0.0625, %v622_v38  ;;  %v634_v38 = vld [vmem:[%s8886_s2 + $0x38] sm:$0xff]  ;;  %v5930_v41 = vcombine.high %v633_v17, %v641_v35  ;;  %v5929_v48 = vcombine.low %v633_v17, %v641_v35 }
 0x53c   :  { %v6676_v17 = vld [vmem:[#allocation5 + $0xc8] ss:$16 sps:$4 sm:$0xff]   ;;  %v6681_v35 = vld [vmem:[#allocation5 + $0xe4] ss:$16 sps:$4 sm:$0xff]  }
 0x53d   :  { %624 = vst.msk [vmem:[#allocation3 + $0x1] sm:$0x1] %vm219_vm2, %v623_v39  ;;  %v642_v39 = vld [vmem:[%s8886_s2 + $0x78] sm:$0xff] }
 0x53e   :  { %v5932_v42 = vcombine.high %v634_v38, %v642_v39  ;;  %v5931_v49 = vcombine.low %v634_v38, %v642_v39  ;;  %v6684_v38 = vld [vmem:[#allocation5 + $0xec] ss:$16 sps:$4 sm:$0xff]   ;;  %v6679_v39 = vld [vmem:[#allocation5 + $0xe0] ss:$16 sps:$4 sm:$0xff]  }
 0x544   :  { %v625_v43 = vld [vmem:[#allocation3] sm:$0x3] }
 0x545   :  { %v7798_v44 = vpack.c.bf16 %v625_v43, %v625_v43  ;;  %5854 = vst.msk [vmem:[#allocation10] sm:$0x3] %vm5853_vm7, %v625_v43  ;;  %v649_v43 = vld [vmem:[%s8886_s2 + $0xb0] sm:$0xff] }
 0x547   :  { %5981 = vmatmul.mubr.msk.bf16.vlgmr.msra.gmra.mrb[8].mxu1 %vm152_vm0, %v7798_v44  ;;  %5982 = vmatmul.mubr.msk.bf16.vlgmr.msra.gmra.mrb[12].mxu0 %vm152_vm0, %v7798_v44 }
 0x548   :  { %1181 = vmatpush1.bf16.msra.mxu1 %v5921_v11  ;;  %1222 = vmatpush1.bf16.msra.mxu0 %v5923_v3  ;;  %v640_v11 = vld [vmem:[%s8886_s2 + $0x68] sm:$0xff]  ;;  %v5969_v3 = vcombine.low %v677_v55, %v685_v56  ;;  %v674_v55 = vld [vmem:[%s8886_s2 + $0x178] sm:$0xff] }
 0x549   :  { %1182 = vmatprep.subr.bf16.mxu1 %v5938_v45  ;;  %1223 = vmatprep.subr.bf16.mxu0 %v5940_v46  ;;  %v5928_v6 = vcombine.high %v632_v2, %v640_v11  ;;  %v5927_v13 = vcombine.low %v632_v2, %v640_v11  ;;  %v657_v45 = vld [vmem:[%s8886_s2 + $0xf0] sm:$0xff]  ;;  %v650_v46 = vld [vmem:[%s8886_s2 + $0xb8] sm:$0xff] }
 0x54a   :  { %1212 = vmatprep.mubr.bf16.mxu1 %v7398_v63  ;;  %1253 = vmatprep.mubr.bf16.mxu0 %v7398_v63  ;;  %v5946_v50 = vcombine.high %v649_v43, %v657_v45  ;;  %v5945_v56 = vcombine.low %v649_v43, %v657_v45  ;;  %v5947_v57 = vcombine.low %v650_v46, %v658_v47  ;;  %v6688_v43 = vld [vmem:[#allocation5 + $0x108] ss:$16 sps:$4 sm:$0xff]   ;;  %v6693_v45 = vld [vmem:[#allocation5 + $0x124] ss:$16 sps:$4 sm:$0xff]  }
 0x54c   :  { %1183 = vmatpush1.bf16.msra.mxu1 %v5937_v51  ;;  %1224 = vmatpush1.bf16.msra.mxu0 %v5939_v52  ;;  %v5948_v51 = vcombine.high %v650_v46, %v658_v47  ;;  %v665_v52 = vld [vmem:[%s8886_s2 + $0x130] sm:$0xff] }
 0x54d   :  { %1184 = vmatprep.subr.bf16.mxu1 %v5954_v53  ;;  %1225 = vmatprep.subr.bf16.mxu0 %v5956_v54  ;;  %v673_v53 = vld [vmem:[%s8886_s2 + $0x170] sm:$0xff]  ;;  %v666_v54 = vld [vmem:[%s8886_s2 + $0x138] sm:$0xff] }
 0x54e   :  { %v5962_v58 = vcombine.high %v665_v52, %v673_v53  ;;  %v5961_v1 = vcombine.low %v665_v52, %v673_v53  ;;  %v5963_v2 = vcombine.low %v666_v54, %v674_v55  ;;  %v6696_v46 = vld [vmem:[#allocation5 + $0x12c] ss:$16 sps:$4 sm:$0xff]   ;;  %v6691_v47 = vld [vmem:[#allocation5 + $0x120] ss:$16 sps:$4 sm:$0xff]   ;;  %v6700_v52 = vld [vmem:[#allocation5 + $0x148] ss:$16 sps:$4 sm:$0xff]  }
 0x54f   :  { %v6705_v53 = vld [vmem:[#allocation5 + $0x164] ss:$16 sps:$4 sm:$0xff]  }
 0x550   :  { %1185 = vmatpush1.bf16.msra.mxu1 %v5953_v59  ;;  %1226 = vmatpush1.bf16.msra.mxu0 %v5955_v60  ;;  %v5964_v59 = vcombine.high %v666_v54, %v674_v55  ;;  %v681_v60 = vld [vmem:[%s8886_s2 + $0x1b0] sm:$0xff] }
 0x551   :  { %1186 = vmatprep.subr.bf16.mxu1 %v5970_v61  ;;  %1227 = vmatprep.subr.bf16.mxu0 %v5972_v62  ;;  %v689_v61 = vld [vmem:[%s8886_s2 + $0x1f0] sm:$0xff]  ;;  %v682_v62 = vld [vmem:[%s8886_s2 + $0x1b8] sm:$0xff] }
 0x552   :  { %v5978_v11 = vcombine.high %v681_v60, %v689_v61  ;;  %v6708_v54 = vld [vmem:[#allocation5 + $0x16c] ss:$16 sps:$4 sm:$0xff]   ;;  %v6703_v55 = vld [vmem:[#allocation5 + $0x160] ss:$16 sps:$4 sm:$0xff]  }
 0x554   :  { %1187 = vmatpush1.bf16.msra.mxu1 %v5969_v3  ;;  %1228 = vmatpush1.bf16.msra.mxu0 %v5971_v4  ;;  %v5980_v3 = vcombine.high %v682_v62, %v690_v0  ;;  %v5977_v4 = vcombine.low %v681_v60, %v689_v61  ;;  %v6712_v60 = vld [vmem:[#allocation5 + $0x188] ss:$16 sps:$4 sm:$0xff]   ;;  %v725_v61 = vsub.s32 7, %v7642_v22 }
 0x555   :  { %1262 = vmatprep.subr.bf16.mxu1 %v5926_v5  ;;  %1303 = vmatprep.subr.bf16.mxu0 %v5928_v6  ;;  %v5979_v5 = vcombine.low %v682_v62, %v690_v0  ;;  %v6639_v6 = vld [vmem:[#allocation5 + $0x4] ss:$16 sps:$4 sm:$0xff]  }
 0x556   :  { %v7946_v62 = vld [vmem:[%s8887_s6 + $0x8] sm:$0xff] }
 0x557   :  { %5983 = vmatmul.mubr.msk.bf16.vlgmr.msra.gmra.mrb[12].mxu1 %vm152_vm0, %v7798_v44  ;;  %5984 = vmatmul.mubr.msk.bf16.vlgmr.msra.gmra.mrb[16].mxu0 %vm152_vm0, %v7798_v44  ;;  %v6717_v0 = vld [vmem:[#allocation5 + $0x1a4] ss:$16 sps:$4 sm:$0xff]  }
 0x558   :  { %1263 = vmatpush1.bf16.msra.mxu1 %v5925_v12  ;;  %1304 = vmatpush1.bf16.msra.mxu0 %v5927_v13  ;;  %v6643_v12 = vld [vmem:[#allocation5 + $0x20] ss:$16 sps:$4 sm:$0xff]   ;;  %v6646_v13 = vld [vmem:[#allocation5 + $0x28] ss:$16 sps:$4 sm:$0xff]  }
 0x559   :  { %1264 = vmatprep.subr.bf16.mxu1 %v5942_v14  ;;  %1305 = vmatprep.subr.bf16.mxu0 %v5944_v15  ;;  %v6651_v14 = vld [vmem:[#allocation5 + $0x44] ss:$16 sps:$4 sm:$0xff]   ;;  %v6654_v15 = vld [vmem:[#allocation5 + $0x4c] ss:$16 sps:$4 sm:$0xff]  }
 0x55a   :  { %1294 = vmatprep.mubr.bf16.mxu1 %v7398_v63  ;;  %1335 = vmatprep.mubr.bf16.mxu0 %v7398_v63 }
 0x55c   :  { %1265 = vmatpush1.bf16.msra.mxu1 %v5941_v26  ;;  %1306 = vmatpush1.bf16.msra.mxu0 %v5943_v29  ;;  %v6658_v26 = vld [vmem:[#allocation5 + $0x68] ss:$16 sps:$4 sm:$0xff]   ;;  %v6663_v29 = vld [vmem:[#allocation5 + $0x84] ss:$16 sps:$4 sm:$0xff]  }
 0x55d   :  { %1266 = vmatprep.subr.bf16.mxu1 %v5958_v30  ;;  %1307 = vmatprep.subr.bf16.mxu0 %v5960_v28  ;;  %v6666_v30 = vld [vmem:[#allocation5 + $0x8c] ss:$16 sps:$4 sm:$0xff]   ;;  %v6661_v28 = vld [vmem:[#allocation5 + $0x80] ss:$16 sps:$4 sm:$0xff]  }
 0x560   :  { %1267 = vmatpush1.bf16.msra.mxu1 %v5957_v25  ;;  %1308 = vmatpush1.bf16.msra.mxu0 %v5959_v36  ;;  %v6670_v25 = vld [vmem:[#allocation5 + $0xa8] ss:$16 sps:$4 sm:$0xff]   ;;  %v6675_v36 = vld [vmem:[#allocation5 + $0xc4] ss:$16 sps:$4 sm:$0xff]  }
 0x561   :  { %1268 = vmatprep.subr.bf16.mxu1 %v5974_v37  ;;  %1309 = vmatprep.subr.bf16.mxu0 %v5976_v21  ;;  %v6678_v37 = vld [vmem:[#allocation5 + $0xcc] ss:$16 sps:$4 sm:$0xff]   ;;  %v6673_v21 = vld [vmem:[#allocation5 + $0xc0] ss:$16 sps:$4 sm:$0xff]  }
 0x564   :  { %1269 = vmatpush1.bf16.msra.mxu1 %v5973_v34  ;;  %1310 = vmatpush1.bf16.msra.mxu0 %v5975_v40  ;;  %v6682_v34 = vld [vmem:[#allocation5 + $0xe8] ss:$16 sps:$4 sm:$0xff]   ;;  %v6687_v40 = vld [vmem:[#allocation5 + $0x104] ss:$16 sps:$4 sm:$0xff]  }
 0x565   :  { %1344 = vmatprep.subr.bf16.mxu1 %v5930_v41  ;;  %1385 = vmatprep.subr.bf16.mxu0 %v5932_v42  ;;  %v6690_v41 = vld [vmem:[#allocation5 + $0x10c] ss:$16 sps:$4 sm:$0xff]   ;;  %v6685_v42 = vld [vmem:[#allocation5 + $0x100] ss:$16 sps:$4 sm:$0xff]  }
 0x567   :  { %5985 = vmatmul.mubr.msk.bf16.vlgmr.msra.gmra.mrb[16].mxu1 %vm152_vm0, %v7798_v44  ;;  %5986 = vmatmul.mubr.msk.bf16.vlgmr.msra.gmra.mrb[20].mxu0 %vm152_vm0, %v7798_v44 }
 0x568   :  { %1345 = vmatpush1.bf16.msra.mxu1 %v5929_v48  ;;  %1386 = vmatpush1.bf16.msra.mxu0 %v5931_v49  ;;  %v6694_v48 = vld [vmem:[#allocation5 + $0x128] ss:$16 sps:$4 sm:$0xff]   ;;  %v6699_v49 = vld [vmem:[#allocation5 + $0x144] ss:$16 sps:$4 sm:$0xff]  }
 0x569   :  { %1346 = vmatprep.subr.bf16.mxu1 %v5946_v50  ;;  %1387 = vmatprep.subr.bf16.mxu0 %v5948_v51  ;;  %v6702_v50 = vld [vmem:[#allocation5 + $0x14c] ss:$16 sps:$4 sm:$0xff]   ;;  %v6697_v51 = vld [vmem:[#allocation5 + $0x140] ss:$16 sps:$4 sm:$0xff]  }
 0x56a   :  { %1376 = vmatprep.mubr.bf16.mxu1 %v7398_v63  ;;  %1417 = vmatprep.mubr.bf16.mxu0 %v7398_v63  ;;  %v6640_v63 = vld [vmem:[#allocation5 + $0x8] ss:$16 sps:$4 sm:$0xff]  }
 0x56c   :  { %1347 = vmatpush1.bf16.msra.mxu1 %v5945_v56  ;;  %1388 = vmatpush1.bf16.msra.mxu0 %v5947_v57  ;;  %v6706_v56 = vld [vmem:[#allocation5 + $0x168] ss:$16 sps:$4 sm:$0xff]   ;;  %v6711_v57 = vld [vmem:[#allocation5 + $0x184] ss:$16 sps:$4 sm:$0xff]  }
 0x56d   :  { %1348 = vmatprep.subr.bf16.mxu1 %v5962_v58  ;;  %1389 = vmatprep.subr.bf16.mxu0 %v5964_v59  ;;  %v6714_v58 = vld [vmem:[#allocation5 + $0x18c] ss:$16 sps:$4 sm:$0xff]   ;;  %v6709_v59 = vld [vmem:[#allocation5 + $0x180] ss:$16 sps:$4 sm:$0xff]  }
 0x570   :  { %1349 = vmatpush1.bf16.msra.mxu1 %v5961_v1  ;;  %1390 = vmatpush1.bf16.msra.mxu0 %v5963_v2  ;;  %v6720_v1 = vld [vmem:[#allocation5 + $0x1ac] ss:$16 sps:$4 sm:$0xff]   ;;  %v7951_v2 = vrot.slane %v7946_v62, %v725_v61 }
 0x571   :  { %1350 = vmatprep.subr.bf16.mxu1 %v5978_v11  ;;  %1391 = vmatprep.subr.bf16.mxu0 %v5980_v3  ;;  %v6715_v11 = vld [vmem:[#allocation5 + $0x1a0] ss:$16 sps:$4 sm:$0xff]   ;;  %v6718_v3 = vld [vmem:[#allocation5 + $0x1a8] ss:$16 sps:$4 sm:$0xff]  }
 0x574   :  { %1351 = vmatpush1.bf16.msra.mxu1 %v5977_v4  ;;  %1392 = vmatpush1.bf16.msra.mxu0 %v5979_v5  ;;  %v6723_v4 = vld [vmem:[#allocation5 + $0x1c4] ss:$16 sps:$4 sm:$0xff]   ;;  %v6726_v5 = vld [vmem:[#allocation5 + $0x1cc] ss:$16 sps:$4 sm:$0xff]  }
 0x575   :  { %3792 = vmatprep.subr.bf16.mxu1 %v6639_v6  ;;  %3956 = vmatprep.subr.bf16.mxu0 %v6642_v7  ;;  %v6721_v6 = vld [vmem:[#allocation5 + $0x1c0] ss:$16 sps:$4 sm:$0xff]   ;;  %v6724_v7 = vld [vmem:[#allocation5 + $0x1c8] ss:$16 sps:$4 sm:$0xff]  }
 0x577   :  { %5987 = vmatmul.mubr.msk.bf16.vlgmr.msra.gmra.mrb[20].mxu1 %vm152_vm0, %v7798_v44  ;;  %5988 = vmatmul.mubr.msk.bf16.vlgmr.msra.gmra.mrb[24].mxu0 %vm152_vm0, %v7798_v44  ;;  %v6660_v44 = vld [vmem:[#allocation5 + $0x6c] ss:$16 sps:$4 sm:$0xff]  }
 0x578   :  { %3793 = vmatpush1.bf16.msra.mxu1 %v6637_v8  ;;  %3957 = vmatpush1.bf16.msra.mxu0 %v6640_v63  ;;  %v6729_v8 = vld [vmem:[#allocation5 + $0x1e4] ss:$16 sps:$4 sm:$0xff]   ;;  %v6732_v63 = vld [vmem:[#allocation5 + $0x1ec] ss:$16 sps:$4 sm:$0xff]  }
 0x579   :  { %3794 = vmatprep.subr.bf16.mxu1 %v6645_v9  ;;  %3958 = vmatprep.subr.bf16.mxu0 %v6648_v10  ;;  %v6727_v9 = vld [vmem:[#allocation5 + $0x1e0] ss:$16 sps:$4 sm:$0xff]   ;;  %v6730_v10 = vld [vmem:[#allocation5 + $0x1e8] ss:$16 sps:$4 sm:$0xff]  }
 0x57c   :  { %3795 = vmatpush1.bf16.msra.mxu1 %v6643_v12  ;;  %3959 = vmatpush1.bf16.msra.mxu0 %v6646_v13  ;;  %v6735_v12 = vld [vmem:[#allocation5 + $0x204] ss:$16 sps:$4 sm:$0xff]   ;;  %v6738_v13 = vld [vmem:[#allocation5 + $0x20c] ss:$16 sps:$4 sm:$0xff]  }
 0x57d   :  { %3796 = vmatprep.subr.bf16.mxu1 %v6651_v14  ;;  %3960 = vmatprep.subr.bf16.mxu0 %v6654_v15  ;;  %v7956_v14 = vld [vmem:[%s8888_s29 + $0x8] sm:$0xff]  ;;  %v1426_v15 = vld [vmem:[%s8888_s29] sm:$0xff] }
 0x580   :  { %3797 = vmatpush1.bf16.msra.mxu1 %v6649_v16  ;;  %3961 = vmatpush1.bf16.msra.mxu0 %v6652_v18  ;;  %v1515_v16 = vadd.f32 1e-05, %v7956_v14  ;;  %v1514_v18 = vadd.f32 1e-05, %v1426_v15 }
 0x581   :  { %3798 = vmatprep.subr.bf16.mxu1 %v6657_v20  ;;  %3962 = vmatprep.subr.bf16.mxu0 %v6660_v44  ;;  %v7965_v20 = vld [vmem:[%s8888_s29 + $0x10] sm:$0xff] }
 0x582   :  { %7217 = vrsqrt.f32 %v1515_v16 }
 0x583   :  { %7219 = vrsqrt.f32 %v1514_v18 }
 0x584   :  { %3799 = vmatpush1.bf16.msra.mxu1 %v6655_v24  ;;  %3963 = vmatpush1.bf16.msra.mxu0 %v6658_v26  ;;  %v7970_v24 = vld [vmem:[%s8888_s29 + $0x18] sm:$0xff] }
 0x585   :  { %3800 = vmatprep.subr.bf16.mxu1 %v6663_v29  ;;  %3964 = vmatprep.subr.bf16.mxu0 %v6666_v30  ;;  %v1516_v29 = vadd.f32 1e-05, %v7965_v20 }
 0x587   :  { %7221 = vrsqrt.f32 %v1516_v29 }
 0x588   :  { %3801 = vmatpush1.bf16.msra.mxu1 %v6661_v28  ;;  %3965 = vmatpush1.bf16.msra.mxu0 %v6664_v32  ;;  %v1517_v28 = vadd.f32 1e-05, %v7970_v24 }
 0x589   :  { %3802 = vmatprep.subr.bf16.mxu1 %v6669_v31  ;;  %3966 = vmatprep.subr.bf16.mxu0 %v6672_v33  ;;  %v7975_v31 = vsub.s32 2, %v7642_v22  ;;  %v7978_v33 = vsub.s32 6, %v7642_v22 }
 0x58a   :  { %7223 = vrsqrt.f32 %v1517_v28 }
 0x58c   :  { %3803 = vmatpush1.bf16.msra.mxu1 %v6667_v19  ;;  %3967 = vmatpush1.bf16.msra.mxu0 %v6670_v25  ;;  %v7218_v44 = vpop.eup %7217  ;;  %v7986_v25 = vld [vmem:[%s8887_s6] sm:$0xff] }
 0x58d   :  { %3804 = vmatprep.subr.bf16.mxu1 %v6675_v36  ;;  %3968 = vmatprep.subr.bf16.mxu0 %v6678_v37  ;;  %v7220_v26 = vpop.eup %7219  ;;  %v5990_v30 = vrot.slane %v7218_v44, 11  ;;  %v7989_v37 = vsub.s32 4, %v7642_v22 }
 0x58e   :  { %v5989_v32 = vrot.slane %v7220_v26, 11 }
 0x58f   :  { %v7981_v19 = vmul.f32 %v5990_v30, %v7956_v14 }
 0x590   :  { %3805 = vmatpush1.bf16.msra.mxu1 %v6673_v21  ;;  %3969 = vmatpush1.bf16.msra.mxu0 %v6676_v17  ;;  %v1538_v36 = vmul.f32 %v5989_v32, %v1426_v15  ;;  %v1437_v21 = vrot.slane %v1426_v15, %v7975_v31  ;;  %v1445_v17 = vrot.slane %v7956_v14, %v7975_v31 }
 0x591   :  { %3806 = vmatprep.subr.bf16.mxu1 %v6681_v35  ;;  %3970 = vmatprep.subr.bf16.mxu0 %v6684_v38  ;;  %v7995_v35 = vsub.s32 5, %v7642_v22  ;;  %v1441_v38 = vrot.slane %v1426_v15, %v7978_v33 }
 0x594   :  { %3807 = vmatpush1.bf16.msra.mxu1 %v6679_v39  ;;  %3971 = vmatpush1.bf16.msra.mxu0 %v6682_v34  ;;  %v698_v39 = vrot.slane %v7986_v25, %v7645_v23  ;;  %v706_v34 = vrot.slane %v7986_v25, %v7975_v31 }
 0x595   :  { %3808 = vmatprep.subr.bf16.mxu1 %v6687_v40  ;;  %3972 = vmatprep.subr.bf16.mxu0 %v6690_v41  ;;  %v1557_v40 = vrot.slane %v7981_v19, %v7645_v23  ;;  %v1549_v41 = vrot.slane %v1538_v36, %v7645_v23 }
 0x598   :  { %3809 = vmatpush1.bf16.msra.mxu1 %v6685_v42  ;;  %3973 = vmatpush1.bf16.msra.mxu0 %v6688_v43  ;;  %v702_v42 = vrot.slane %v7986_v25, %v7649_v27  ;;  %v1553_v43 = vrot.slane %v1538_v36, %v7989_v37 }
 0x599   :  { %3810 = vmatprep.subr.bf16.mxu1 %v6693_v45  ;;  %3974 = vmatprep.subr.bf16.mxu0 %v6696_v46  ;;  %v1477_v45 = vrot.slane %v1437_v21, %v7975_v31  ;;  %v1485_v46 = vrot.slane %v1445_v17, %v7975_v31  ;;  %v1449_v21 = vrot.slane %v7956_v14, %v7978_v33 }
 0x59c   :  { %3811 = vmatpush1.bf16.msra.mxu1 %v6691_v47  ;;  %3975 = vmatpush1.bf16.msra.mxu0 %v6694_v48  ;;  %v1637_v47 = vrot.slane %v7956_v14, %v7649_v27 }
 0x59d   :  { %3812 = vmatprep.subr.bf16.mxu1 %v6699_v49  ;;  %3976 = vmatprep.subr.bf16.mxu0 %v6702_v50  ;;  %v1481_v50 = vrot.slane %v1441_v38, %v7975_v31 }
 0x5a0   :  { %3813 = vmatpush1.bf16.msra.mxu1 %v6697_v51  ;;  %3977 = vmatpush1.bf16.msra.mxu0 %v6700_v52  ;;  %v1633_v51 = vrot.slane %v1426_v15, %v7995_v35 }
 0x5a1   :  { %3814 = vmatprep.subr.bf16.mxu1 %v6705_v53  ;;  %3978 = vmatprep.subr.bf16.mxu0 %v6708_v54  ;;  %v1629_v53 = vrot.slane %v1426_v15, %v7649_v27 }
 0x5a3   :  { %v1669_v15 = vrot.slane %v1629_v53, %v7649_v27 }
 0x5a4   :  { %3815 = vmatpush1.bf16.msra.mxu1 %v6703_v55  ;;  %3979 = vmatpush1.bf16.msra.mxu0 %v6706_v56  ;;  %v1597_v55 = vrot.slane %v1557_v40, %v7645_v23 }
 0x5a5   :  { %3816 = vmatprep.subr.bf16.mxu1 %v6711_v57  ;;  %3980 = vmatprep.subr.bf16.mxu0 %v6714_v58  ;;  %v7222_v58 = vpop.eup %7221 }
 0x5a6   :  { %v5991_v18 = vrot.slane %v7222_v58, 11 }
 0x5a8   :  { %3817 = vmatpush1.bf16.msra.mxu1 %v6709_v59  ;;  %3981 = vmatpush1.bf16.msra.mxu0 %v6712_v60  ;;  %v1589_v59 = vrot.slane %v1549_v41, %v7645_v23  ;;  %v8045_v38 = vmul.f32 %v5991_v18, %v7965_v20 }
 0x5a9   :  { %3818 = vmatprep.subr.bf16.mxu1 %v6717_v0  ;;  %3982 = vmatprep.subr.bf16.mxu0 %v6720_v1  ;;  %v1593_v0 = vrot.slane %v1553_v43, %v7645_v23  ;;  %v1561_v43 = vrot.slane %v7981_v19, %v7989_v37  ;;  %v1641_v19 = vrot.slane %v7956_v14, %v7995_v35 }
 0x5ac   :  { %3819 = vmatpush1.bf16.msra.mxu1 %v6715_v11  ;;  %3983 = vmatpush1.bf16.msra.mxu0 %v6718_v3  ;;  %v8021_v3 = vld [vmem:[%s8853_s14] sm:$0xff] }
 0x5ad   :  { %3820 = vmatprep.subr.bf16.mxu1 %v6723_v4  ;;  %3984 = vmatprep.subr.bf16.mxu0 %v6726_v5  ;;  %v7224_v4 = vpop.eup %7223  ;;  %v1966_v44 = vadd.f32 1e-05, %v8021_v3 }
 0x5ae   :  { %v5992_v30 = vrot.slane %v7224_v4, 11 }
 0x5af   :  { %7225 = vrsqrt.f32 %v1966_v44 }
 0x5b0   :  { %3821 = vmatpush1.bf16.msra.mxu1 %v6721_v6  ;;  %3985 = vmatpush1.bf16.msra.mxu0 %v6724_v7  ;;  %v1677_v7 = vrot.slane %v1637_v47, %v7649_v27  ;;  %v8053_v40 = vmul.f32 %v5992_v30, %v7970_v24  ;;  %v1461_v47 = vrot.slane %v7970_v24, %v7975_v31 }
 0x5b1   :  { %3822 = vmatprep.subr.bf16.mxu1 %v6729_v8  ;;  %3986 = vmatprep.subr.bf16.mxu0 %v6732_v63  ;;  %v8025_v8 = vsub.s32 3, %v7642_v22 }
 0x5b2   :  { %v1501_v14 = vrot.slane %v1461_v47, %v7975_v31  ;;  %v1577_v22 = vrot.slane %v8053_v40, %v7989_v37 }
 0x5b3   :  { %v710_v36 = vrot.slane %v7986_v25, %v8025_v8 }
 0x5b4   :  { %3823 = vmatpush1.bf16.msra.mxu1 %v6727_v9  ;;  %3987 = vmatpush1.bf16.msra.mxu0 %v6730_v10  ;;  %v8030_v10 = vld [vmem:[%s8853_s14 + $0x8] sm:$0xff] }
 0x5b5   :  { %3833 = vmatprep.subr.bf16.mxu1 %v6735_v12  ;;  %3997 = vmatprep.subr.bf16.mxu0 %v6738_v13  ;;  %v1673_v13 = vrot.slane %v1633_v51, %v7649_v27  ;;  %v1967_v28 = vadd.f32 1e-05, %v8030_v10  ;;  %v722_v51 = vrot.slane %v7986_v25, %v7978_v33 }
 0x5b7   :  { %7227 = vrsqrt.f32 %v1967_v28 }
 0x61a   :  { %v1132_v48 = vpop.f32.mrb[8].mxu1  ;;  %v1173_v49 = vpop.f32.mrb[12].mxu0 }
 0x61b   :  { %v1133_v52 = vadd.f32 %v1132_v48, %v698_v39  ;;  %v1174_v54 = vadd.f32 %v1173_v49, %v706_v34  ;;  %v1134_v56 = vpop.f32.mrb[9].mxu1  ;;  %v1175_v57 = vpop.f32.mrb[13].mxu0  ;;  %v714_v48 = vrot.slane %v7986_v25, %v7989_v37  ;;  %v1565_v49 = vrot.slane %v8045_v38, %v7645_v23 }
 0x61c   :  { %v1135_v60 = vadd.f32 %v1134_v56, %v702_v42  ;;  %v1136_v1 = vpop.f32.mrb[10].mxu1  ;;  %v1177_v11 = vpop.f32.mrb[14].mxu0  ;;  %v1176_v41 = vadd.f32 %v1175_v57, %v710_v36  ;;  %v1489_v42 = vrot.slane %v1449_v21, %v7975_v31  ;;  %v1645_v56 = vrot.slane %v7965_v20, %v7649_v27 }
 0x61d   :  { %v1506_v5 = vsub.f32 %v1133_v52, %v1477_v45  ;;  %v1508_v6 = vsub.f32 %v1174_v54, %v1485_v46  ;;  %v1137_v63 = vpop.f32.mrb[11].mxu1  ;;  %v1178_v9 = vpop.f32.mrb[15].mxu0  ;;  %v1453_v45 = vrot.slane %v7965_v20, %v7975_v31  ;;  %v1573_v52 = vrot.slane %v8053_v40, %v7645_v23 }
 0x61e   :  { %v1507_v12 = vsub.f32 %v1135_v60, %v1481_v50  ;;  %v1509_v53 = vsub.f32 %v1176_v41, %v1489_v42  ;;  %v1601_v54 = vrot.slane %v1561_v43, %v7645_v23  ;;  %v1653_v60 = vrot.slane %v7970_v24, %v7649_v27 }
 0x61f   :  { %v1620_v16 = vmul.f32 %v1597_v55, %v1508_v6  ;;  %v1618_v26 = vmul.f32 %v1589_v59, %v1506_v5  ;;  %v1493_v55 = vrot.slane %v1453_v45, %v7975_v31  ;;  %v1605_v1 = vrot.slane %v1565_v49, %v7645_v23 }
 0x620   :  { %v1619_v29 = vmul.f32 %v1593_v0, %v1507_v12  ;;  %v7226_v12 = vpop.eup %7225  ;;  %v1685_v18 = vrot.slane %v1645_v56, %v7649_v27  ;;  %v1693_v36 = vrot.slane %v1653_v60, %v7649_v27 }
 0x621   :  { %v8036_v32 = vadd.f32 %v1677_v7, %v1620_v16  ;;  %v8047_v39 = vadd.f32 %v1669_v15, %v1618_v26  ;;  %v1613_v7 = vrot.slane %v1573_v52, %v7645_v23  ;;  %v1681_v15 = vrot.slane %v1641_v19, %v7649_v27 }
 0x622   :  { %v8042_v17 = vadd.f32 %v1673_v13, %v1619_v29  ;;  %v1621_v13 = vmul.f32 %v1601_v54, %v1509_v53  ;;  %v7228_v29 = vpop.eup %7227  ;;  %v5993_v43 = vrot.slane %v7226_v12, 11  ;;  %v1929_v54 = vrot.slane %v8021_v3, %v7975_v31 }
 0x623   :  { %v8070_v50 = vmul.f32 0.70710677, %v8047_v39 }
 0x624   :  { %v8050_v34 = vmul.f32 0.70710677, %v8042_v17  ;;  %v8099_v45 = vadd.f32 %v1681_v15, %v1621_v13 }
 0x625   :  { %v8092_v5 = vand.u32 2147483647, %v8070_v50  ;;  %vm1882_vm9 = vcmp.ge.f32.partialorder %v8070_v50, 0.0 }
 0x626   :  { %v8061_v46 = vand.u32 2147483647, %v8050_v34  ;;  %v8109_v52 = vmul.f32 0.70710677, %v8099_v45  ;;  %vm1883_vm8 = vcmp.ge.f32.partialorder %v8050_v34, 0.0 }
 0x627   :  { %v1730_v41 = vmul.f32 0.3275911, %v8092_v5 }
 0x628   :  { %v1731_v57 = vmul.f32 0.3275911, %v8061_v46  ;;  %vm1885_vm10 = vcmp.ge.f32.partialorder %v8109_v52, 0.0 }
 0x629   :  { %v1738_v19 = vadd.f32 1.0, %v1730_v41 }
 0x62a   :  { %v1214_v58 = vpop.f32.mrb[12].mxu1  ;;  %v1255_v59 = vpop.f32.mrb[16].mxu0  ;;  %v1739_v30 = vadd.f32 1.0, %v1731_v57  ;;  %v8121_v57 = vand.u32 2147483647, %v8109_v52 }
 0x62b   :  { %v1215_v0 = vadd.f32 %v1214_v58, %v714_v48  ;;  %v8087_v11 = vpop.f32.mrb[13].mxu1  ;;  %v8089_v4 = vpop.f32.mrb[17].mxu0  ;;  %v1256_v6 = vadd.f32 %v1255_v59, %v722_v51  ;;  %v5994_v48 = vrot.slane %v7228_v29, 11  ;;  %v8106_v51 = vmul.f32 %v5993_v43, %v8021_v3 }
 0x62c   :  { %v1218_v63 = vpop.f32.mrb[14].mxu1  ;;  %v1259_v9 = vpop.f32.mrb[18].mxu0  ;;  %7229 = vrcp.f32 %v1739_v30  ;;  %v730_v58 = vrot.slane %v7946_v62, %v7645_v23  ;;  %v738_v59 = vrot.slane %v7946_v62, %v7975_v31 }
 0x62d   :  { %v1510_v16 = vsub.f32 %v1215_v0, %v1493_v55  ;;  %v1219_v44 = vpop.f32.mrb[15].mxu1  ;;  %v1260_v26 = vpop.f32.mrb[19].mxu0  ;;  %v1512_v28 = vsub.f32 %v1256_v6, %v1501_v14  ;;  %v8112_v53 = vmul.f32 %v5994_v48, %v8030_v10  ;;  %v1937_v55 = vrot.slane %v8030_v10, %v7975_v31 }
 0x62e   :  { %7231 = vrcp.f32 %v1738_v19  ;;  %v1985_v56 = vrot.slane %v8106_v51, %v7645_v23  ;;  %v2025_v0 = vrot.slane %v8021_v3, %v7649_v27  ;;  %v1949_v6 = vrot.slane %v1929_v54, %v7975_v31 }
 0x62f   :  { %v1622_v21 = vmul.f32 %v1605_v1, %v1510_v16  ;;  %v1624_v42 = vmul.f32 %v1613_v7, %v1512_v28  ;;  %v1993_v14 = vrot.slane %v8112_v53, %v7645_v23  ;;  %v1957_v7 = vrot.slane %v1937_v55, %v7975_v31 }
 0x630   :  { %v2033_v63 = vrot.slane %v8030_v10, %v7649_v27  ;;  %v2005_v15 = vrot.slane %v1985_v56, %v7645_v23  ;;  %v1733_v44 = vmul.f32 0.3275911, %v8121_v57  ;;  %v718_v10 = vrot.slane %v7986_v25, %v7995_v35 }
 0x631   :  { %v8101_v47 = vadd.f32 %v1685_v18, %v1622_v21  ;;  %v8103_v49 = vadd.f32 %v1693_v36, %v1624_v42  ;;  %v2013_v30 = vrot.slane %v1993_v14, %v7645_v23  ;;  %v1457_v21 = vrot.slane %v7965_v20, %v7978_v33 }
 0x632   :  { %v2045_v41 = vrot.slane %v2025_v0, %v7649_v27  ;;  %v2053_v48 = vrot.slane %v2033_v63, %v7649_v27  ;;  %v1741_v54 = vadd.f32 1.0, %v1733_v44  ;;  %v1835_v14 = vsub.f32 0.0, %v8061_v46 }
 0x633   :  { %v1569_v0 = vrot.slane %v8045_v38, %v7989_v37 }
 0x634   :  { %7233 = vrcp.f32 %v1741_v54 }
 0x635   :  { %v1609_v44 = vrot.slane %v1569_v0, %v7645_v23 }
 0x636   :  { %v8139_v13 = vpop.eup %7229 }
 0x637   :  { %v1763_v19 = vmul.f32 1.0614054, %v8139_v13 }
 0x63a   :  { %v1296_v60 = vpop.f32.mrb[16].mxu1  ;;  %v1337_v1 = vpop.f32.mrb[20].mxu0 }
 0x63b   :  { %v8135_v9 = vpop.f32.mrb[17].mxu1  ;;  %v8137_v12 = vpop.f32.mrb[21].mxu0  ;;  %v1297_v26 = vadd.f32 %v1296_v60, %v730_v58  ;;  %v1338_v29 = vadd.f32 %v1337_v1, %v738_v59  ;;  %v1771_v58 = vadd.f32 -1.4531521, %v1763_v19  ;;  %v1497_v60 = vrot.slane %v1457_v21, %v7975_v31 }
 0x63c   :  { %v1300_v16 = vpop.f32.mrb[18].mxu1  ;;  %v1341_v18 = vpop.f32.mrb[22].mxu0  ;;  %v1217_v1 = vadd.f32 %v8087_v11, %v718_v10  ;;  %v1649_v11 = vrot.slane %v7965_v20, %v7995_v35 }
 0x63d   :  { %v1301_v28 = vpop.f32.mrb[19].mxu1  ;;  %v1342_v36 = vpop.f32.mrb[23].mxu0  ;;  %v1962_v42 = vsub.f32 %v1297_v26, %v1949_v6  ;;  %v1964_v43 = vsub.f32 %v1338_v29, %v1957_v7  ;;  %v1779_v63 = vmul.f32 %v8139_v13, %v1771_v58  ;;  %v1843_v16 = vmul.f32 %v1835_v14, %v8061_v46 }
 0x63e   :  { %v8151_v59 = vpop.eup %7231  ;;  %v1511_v18 = vsub.f32 %v1217_v1, %v1497_v60  ;;  %v1834_v26 = vsub.f32 0.0, %v8092_v5  ;;  %v746_v29 = vrot.slane %v7946_v62, %v7989_v37  ;;  %v754_v36 = vrot.slane %v7946_v62, %v7978_v33 }
 0x63f   :  { %v2018_v55 = vmul.f32 %v2005_v15, %v1962_v42  ;;  %v2020_v56 = vmul.f32 %v2013_v30, %v1964_v43  ;;  %v1762_v15 = vmul.f32 1.0614054, %v8151_v59  ;;  %v1787_v38 = vadd.f32 1.4214138, %v1779_v63  ;;  %v7234_v0 = vpop.eup %7233 }
 0x640   :  { %v1852_v28 = vmul.f32 1.442695, %v1843_v16  ;;  %v1623_v10 = vmul.f32 %v1609_v44, %v1511_v18  ;;  %v1689_v46 = vrot.slane %v1649_v11, %v7649_v27  ;;  %v750_v42 = vrot.slane %v7946_v62, %v7995_v35 }
 0x641   :  { %v8158_v6 = vadd.f32 %v2045_v41, %v2018_v55  ;;  %v8160_v7 = vadd.f32 %v2053_v48, %v2020_v56  ;;  %v1770_v30 = vadd.f32 -1.4531521, %v1762_v15  ;;  %v1842_v20 = vmul.f32 %v1834_v26, %v8092_v5 }
 0x642   :  { %v1795_v19 = vmul.f32 %v8139_v13, %v1787_v38  ;;  %7235 = vpow2.f32 %v1852_v28  ;;  %v1837_v62 = vsub.f32 0.0, %v8121_v57  ;;  %v8184_v63 = vadd.f32 %v1689_v46, %v1623_v10 }
 0x643   :  { %v1778_v58 = vmul.f32 %v8151_v59, %v1770_v30  ;;  %v1850_v15 = vmul.f32 1.442695, %v1842_v20  ;;  %v8192_v11 = vmul.f32 0.70710677, %v8036_v32  ;;  %v1765_v26 = vmul.f32 1.0614054, %v7234_v0 }
 0x644   :  { %v1803_v18 = vadd.f32 -0.28449672, %v1795_v19  ;;  %v1845_v38 = vmul.f32 %v1837_v62, %v8121_v57 }
 0x645   :  { %v1786_v44 = vadd.f32 1.4214138, %v1778_v58  ;;  %7237 = vpow2.f32 %v1850_v15  ;;  %v1773_v10 = vadd.f32 -1.4531521, %v1765_v26  ;;  %vm1884_vm11 = vcmp.ge.f32.partialorder %v8192_v11, 0.0 }
 0x646   :  { %v1811_v30 = vmul.f32 %v8139_v13, %v1803_v18  ;;  %v1856_v46 = vmul.f32 1.442695, %v1845_v38 }
 0x647   :  { %v1781_v20 = vmul.f32 %v7234_v0, %v1773_v10 }
 0x648   :  { %v1819_v28 = vadd.f32 0.2548296, %v1811_v30  ;;  %7239 = vpow2.f32 %v1856_v46 }
 0x64a   :  { %v1378_v21 = vpop.f32.mrb[20].mxu1  ;;  %v1419_v41 = vpop.f32.mrb[24].mxu0 }
 0x64b   :  { %v1380_v43 = vpop.f32.mrb[21].mxu1  ;;  %v1421_v48 = vpop.f32.mrb[25].mxu0  ;;  %v8178_v54 = vadd.f32 %v1378_v21, %v746_v29  ;;  %v8181_v14 = vadd.f32 %v1419_v41, %v754_v36  ;;  %v8196_v29 = vmul.f32 0.70710677, %v8184_v63  ;;  %v1794_v36 = vmul.f32 %v8151_v59, %v1786_v44 }
 0x64c   :  { %v1382_v55 = vpop.f32.mrb[22].mxu1  ;;  %v1423_v56 = vpop.f32.mrb[26].mxu0  ;;  %v8186_v5 = vadd.f32 %v1380_v43, %v750_v42  ;;  %v8189_v16 = vadd.f32 %v1421_v48, %v7951_v2  ;;  %v8201_v2 = vand.u32 2147483647, %v8192_v11  ;;  %v1827_v41 = vmul.f32 %v8139_v13, %v1819_v28 }
 0x64d   :  { %v1383_v60 = vpop.f32.mrb[23].mxu1  ;;  %v1424_v1 = vpop.f32.mrb[27].mxu0  ;;  %v8204_v21 = vand.u32 2147483647, %v8196_v29  ;;  %v1802_v57 = vadd.f32 -0.28449672, %v1794_v36 }
 0x64e   :  { %v7236_v42 = vpop.eup %7235  ;;  %v1732_v19 = vmul.f32 0.3275911, %v8201_v2  ;;  %v1789_v55 = vadd.f32 1.4214138, %v1781_v20  ;;  %v1707_v28 = vmul.f32 0.5, %v8042_v17  ;;  %vm1887_vm12 = vcmp.ge.f32.partialorder %v8196_v29, 0.0 }
 0x64f   :  { %v1867_v43 = vmul.f32 %v7236_v42, %v1827_v41  ;;  %v1810_v48 = vmul.f32 %v8151_v59, %v1802_v57  ;;  %v1735_v56 = vmul.f32 0.3275911, %v8204_v21  ;;  %v7238_v18 = vpop.eup %7237  ;;  %v6826_v29 = vld [vmem:[#allocation5 + $0x3e8] ss:$16 sps:$4 sm:$0xff]  }
 0x650   :  { %v1797_v1 = vmul.f32 %v7234_v0, %v1789_v55  ;;  %v1740_v13 = vadd.f32 1.0, %v1732_v19 }
 0x651   :  { %v1875_v58 = vsub.f32 1.0, %v1867_v43  ;;  %v1818_v60 = vadd.f32 0.2548296, %v1810_v48  ;;  %v1743_v26 = vadd.f32 1.0, %v1735_v56  ;;  %v1706_v48 = vmul.f32 0.5, %v8047_v39 }
 0x652   :  { %v1805_v44 = vadd.f32 -0.28449672, %v1797_v1  ;;  %7241 = vrcp.f32 %v1740_v13  ;;  %v7240_v43 = vpop.eup %7239  ;;  %v1709_v13 = vmul.f32 0.5, %v8099_v45  ;;  %v6753_v45 = vld [vmem:[#allocation5 + $0x264] ss:$16 sps:$4 sm:$0xff]  }
 0x653   :  { %v1891_v62 = vsub.f32 0.0, %v1875_v58  ;;  %v1826_v15 = vmul.f32 %v8151_v59, %v1818_v60  ;;  %7243 = vrcp.f32 %v1743_v26  ;;  %v6736_v60 = vld [vmem:[#allocation5 + $0x208] ss:$16 sps:$4 sm:$0xff]   ;;  %v6739_v26 = vld [vmem:[#allocation5 + $0x220] ss:$16 sps:$4 sm:$0xff]  }
 0x654   :  { %v1813_v10 = vmul.f32 %v7234_v0, %v1805_v44 }
 0x655   :  { %v1899_v38 = vsel %vm1883_vm8, %v1875_v58, %v1891_v62  ;;  %v1866_v30 = vmul.f32 %v7238_v18, %v1826_v15  ;;  %v6733_v58 = vld [vmem:[#allocation5 + $0x200] ss:$16 sps:$4 sm:$0xff]   ;;  %v6741_v15 = vld [vmem:[#allocation5 + $0x224] ss:$16 sps:$4 sm:$0xff]   ;;  %v6744_v18 = vld [vmem:[#allocation5 + $0x22c] ss:$16 sps:$4 sm:$0xff]  }
 0x656   :  { %v1907_v36 = vadd.f32 1.0, %v1899_v38  ;;  %v1821_v57 = vadd.f32 0.2548296, %v1813_v10  ;;  %v6742_v38 = vld [vmem:[#allocation5 + $0x228] ss:$16 sps:$4 sm:$0xff]  }
 0x657   :  { %v1874_v46 = vsub.f32 1.0, %v1866_v30  ;;  %v6747_v30 = vld [vmem:[#allocation5 + $0x244] ss:$16 sps:$4 sm:$0xff]  }
 0x658   :  { %v1915_v41 = vmul.f32 %v1907_v36, %v1707_v28  ;;  %v1829_v20 = vmul.f32 %v7234_v0, %v1821_v57  ;;  %v6750_v28 = vld [vmem:[#allocation5 + $0x24c] ss:$16 sps:$4 sm:$0xff]   ;;  %v6748_v57 = vld [vmem:[#allocation5 + $0x248] ss:$16 sps:$4 sm:$0xff]  }
 0x659   :  { %v1890_v42 = vsub.f32 0.0, %v1874_v46 }
 0x65a   :  { %v2227_v59 = vpack.c.bf16 %v1915_v41, %v1915_v41  ;;  %v1869_v17 = vmul.f32 %v7240_v43, %v1829_v20  ;;  %v6745_v41 = vld [vmem:[#allocation5 + $0x240] ss:$16 sps:$4 sm:$0xff]  }
 0x65b   :  { %v1898_v34 = vsel %vm1882_vm9, %v1874_v46, %v1890_v42  ;;  %v6756_v42 = vld [vmem:[#allocation5 + $0x26c] ss:$16 sps:$4 sm:$0xff]   ;;  %v6751_v43 = vld [vmem:[#allocation5 + $0x260] ss:$16 sps:$4 sm:$0xff]  }
 0x65c   :  { %3824 = vmatprep.mubr.bf16.mxu1 %v2227_v59  ;;  %3988 = vmatprep.mubr.bf16.mxu0 %v2227_v59  ;;  %v1906_v19 = vadd.f32 1.0, %v1898_v34  ;;  %v1877_v56 = vsub.f32 1.0, %v1869_v17  ;;  %v8216_v50 = vpop.eup %7241  ;;  %v6754_v34 = vld [vmem:[#allocation5 + $0x268] ss:$16 sps:$4 sm:$0xff]  }
 0x65d   :  { %v8218_v39 = vpop.eup %7243  ;;  %v1764_v52 = vmul.f32 1.0614054, %v8216_v50 }
 0x65e   :  { %v1914_v55 = vmul.f32 %v1906_v19, %v1706_v48  ;;  %v1893_v62 = vsub.f32 0.0, %v1877_v56  ;;  %v1767_v10 = vmul.f32 1.0614054, %v8218_v39  ;;  %v6759_v48 = vld [vmem:[#allocation5 + $0x284] ss:$16 sps:$4 sm:$0xff]  }
 0x65f   :  { %v1772_v59 = vadd.f32 -1.4531521, %v1764_v52  ;;  %v6762_v19 = vld [vmem:[#allocation5 + $0x28c] ss:$16 sps:$4 sm:$0xff]   ;;  %v1465_v52 = vrot.slane %v7970_v24, %v7978_v33 }
 0x660   :  { %v2226_v1 = vpack.c.bf16 %v1914_v55, %v1914_v55  ;;  %v1901_v0 = vsel %vm1885_vm10, %v1877_v56, %v1893_v62  ;;  %v1775_v20 = vadd.f32 -1.4531521, %v1767_v10  ;;  %v6757_v56 = vld [vmem:[#allocation5 + $0x280] ss:$16 sps:$4 sm:$0xff]  }
 0x661   :  { %v1909_v44 = vadd.f32 1.0, %v1901_v0  ;;  %v1780_v17 = vmul.f32 %v8216_v50, %v1772_v59  ;;  %v1839_v0 = vsub.f32 0.0, %v8204_v21  ;;  %v1505_v59 = vrot.slane %v1465_v52, %v7975_v31  ;;  %v6793_v52 = vld [vmem:[#allocation5 + $0x340] ss:$16 sps:$4 sm:$0xff]  }
 0x662   :  { %3825 = vmatmul.mubr.bf16.vlgmr.msra.gmra.mrb[24].mxu1 %v2226_v1  ;;  %3989 = vmatmul.mubr.bf16.vlgmr.msra.gmra.mrb[28].mxu0 %v2226_v1  ;;  %v1783_v55 = vmul.f32 %v8218_v39, %v1775_v20  ;;  %v6768_v1 = vld [vmem:[#allocation5 + $0x2ac] ss:$16 sps:$4 sm:$0xff]  }
 0x663   :  { %3834 = vmatpush1.bf16.msra.mxu1 %v6733_v58  ;;  %3998 = vmatpush1.bf16.msra.mxu0 %v6736_v60  ;;  %v1917_v36 = vmul.f32 %v1909_v44, %v1709_v13  ;;  %v6760_v58 = vld [vmem:[#allocation5 + $0x288] ss:$16 sps:$4 sm:$0xff]   ;;  %v6765_v60 = vld [vmem:[#allocation5 + $0x2a4] ss:$16 sps:$4 sm:$0xff]   ;;  %v1788_v62 = vadd.f32 1.4214138, %v1780_v17  ;;  %v1617_v17 = vrot.slane %v1577_v22, %v7645_v23 }
 0x664   :  { %3835 = vmatprep.subr.bf16.mxu1 %v6741_v15  ;;  %3999 = vmatprep.subr.bf16.mxu0 %v6744_v18  ;;  %v1836_v15 = vsub.f32 0.0, %v8201_v2  ;;  %v1791_v18 = vadd.f32 1.4214138, %v1783_v55  ;;  %v6763_v13 = vld [vmem:[#allocation5 + $0x2a0] ss:$16 sps:$4 sm:$0xff]  }
 0x665   :  { %v2229_v46 = vpack.c.bf16 %v1917_v36, %v1917_v36  ;;  %v6766_v44 = vld [vmem:[#allocation5 + $0x2a8] ss:$16 sps:$4 sm:$0xff]   ;;  %v726_v36 = vrot.slane %v7986_v25, %v725_v61 }
 0x666   :  { %v1799_v10 = vmul.f32 %v8218_v39, %v1791_v18 }
 0x667   :  { %3836 = vmatpush1.bf16.msra.mxu1 %v6739_v26  ;;  %4000 = vmatpush1.bf16.msra.mxu0 %v6742_v38  ;;  %v6771_v26 = vld [vmem:[#allocation5 + $0x2c4] ss:$16 sps:$4 sm:$0xff]   ;;  %v6774_v38 = vld [vmem:[#allocation5 + $0x2cc] ss:$16 sps:$4 sm:$0xff]   ;;  %v1258_v25 = vadd.f32 %v8089_v4, %v726_v36  ;;  %v1657_v4 = vrot.slane %v7970_v24, %v7995_v35  ;;  %v6790_v24 = vld [vmem:[#allocation5 + $0x328] ss:$16 sps:$4 sm:$0xff]  }
 0x668   :  { %3837 = vmatprep.subr.bf16.mxu1 %v6747_v30  ;;  %4001 = vmatprep.subr.bf16.mxu0 %v6750_v28  ;;  %v1796_v30 = vmul.f32 %v8216_v50, %v1788_v62  ;;  %v1844_v28 = vmul.f32 %v1836_v15, %v8201_v2  ;;  %v1807_v20 = vadd.f32 -0.28449672, %v1799_v10  ;;  %v6792_v62 = vld [vmem:[#allocation5 + $0x32c] ss:$16 sps:$4 sm:$0xff]   ;;  %v6796_v10 = vld [vmem:[#allocation5 + $0x348] ss:$16 sps:$4 sm:$0xff]  }
 0x669   :  { %3865 = vmatprep.mubr.bf16.mxu1 %v2229_v46  ;;  %4029 = vmatprep.mubr.bf16.mxu0 %v2229_v46  ;;  %v1847_v46 = vmul.f32 %v1839_v0, %v8204_v21  ;;  %v6775_v21 = vld [vmem:[#allocation5 + $0x2e0] ss:$16 sps:$4 sm:$0xff]   ;;  %v1513_v55 = vsub.f32 %v1258_v25, %v1505_v59  ;;  %v1697_v0 = vrot.slane %v1657_v4, %v7649_v27  ;;  %v6807_v59 = vld [vmem:[#allocation5 + $0x384] ss:$16 sps:$4 sm:$0xff]  }
 0x66a   :  { %v1804_v2 = vadd.f32 -0.28449672, %v1796_v30  ;;  %v1854_v61 = vmul.f32 1.442695, %v1844_v28 }
 0x66b   :  { %3838 = vmatpush1.bf16.msra.mxu1 %v6745_v41  ;;  %4002 = vmatpush1.bf16.msra.mxu0 %v6748_v57  ;;  %v6769_v41 = vld [vmem:[#allocation5 + $0x2c0] ss:$16 sps:$4 sm:$0xff]   ;;  %v6772_v57 = vld [vmem:[#allocation5 + $0x2c8] ss:$16 sps:$4 sm:$0xff]   ;;  %v1625_v18 = vmul.f32 %v1617_v17, %v1513_v55  ;;  %v6816_v55 = vld [vmem:[#allocation5 + $0x3ac] ss:$16 sps:$4 sm:$0xff]  }
 0x66c   :  { %3839 = vmatprep.subr.bf16.mxu1 %v6753_v45  ;;  %4003 = vmatprep.subr.bf16.mxu0 %v6756_v42  ;;  %v6777_v45 = vld [vmem:[#allocation5 + $0x2e4] ss:$16 sps:$4 sm:$0xff]   ;;  %v6780_v42 = vld [vmem:[#allocation5 + $0x2ec] ss:$16 sps:$4 sm:$0xff]   ;;  %v1812_v40 = vmul.f32 %v8216_v50, %v1804_v2  ;;  %7245 = vpow2.f32 %v1854_v61  ;;  %v6802_v61 = vld [vmem:[#allocation5 + $0x368] ss:$16 sps:$4 sm:$0xff]  }
 0x66d   :  { %v8247_v28 = vadd.f32 %v1697_v0, %v1625_v18  ;;  %v6822_v18 = vld [vmem:[#allocation5 + $0x3cc] ss:$16 sps:$4 sm:$0xff]  }
 0x66e   :  { %v1820_v15 = vadd.f32 0.2548296, %v1812_v40  ;;  %v6813_v40 = vld [vmem:[#allocation5 + $0x3a4] ss:$16 sps:$4 sm:$0xff]  }
 0x66f   :  { %3840 = vmatpush1.bf16.msra.mxu1 %v6751_v43  ;;  %4004 = vmatpush1.bf16.msra.mxu0 %v6754_v34  ;;  %v1860_v43 = vmul.f32 1.442695, %v1847_v46  ;;  %v6778_v34 = vld [vmem:[#allocation5 + $0x2e8] ss:$16 sps:$4 sm:$0xff]  }
 0x670   :  { %3841 = vmatprep.subr.bf16.mxu1 %v6759_v48  ;;  %4005 = vmatprep.subr.bf16.mxu0 %v6762_v19  ;;  %v6783_v48 = vld [vmem:[#allocation5 + $0x304] ss:$16 sps:$4 sm:$0xff]   ;;  %v6786_v19 = vld [vmem:[#allocation5 + $0x30c] ss:$16 sps:$4 sm:$0xff]   ;;  %v1828_v30 = vmul.f32 %v8216_v50, %v1820_v15  ;;  %v8254_v50 = vmul.f32 0.70710677, %v8247_v28 }
 0x671   :  { %7247 = vpow2.f32 %v1860_v43  ;;  %v6819_v15 = vld [vmem:[#allocation5 + $0x3c4] ss:$16 sps:$4 sm:$0xff]  }
 0x672   :  { %vm1889_vm14 = vcmp.ge.f32.partialorder %v8254_v50, 0.0 }
 0x673   :  { %3842 = vmatpush1.bf16.msra.mxu1 %v6757_v56  ;;  %4006 = vmatpush1.bf16.msra.mxu0 %v6760_v58  ;;  %v1815_v56 = vmul.f32 %v8218_v39, %v1807_v20  ;;  %v6781_v58 = vld [vmem:[#allocation5 + $0x300] ss:$16 sps:$4 sm:$0xff]   ;;  %v6810_v20 = vld [vmem:[#allocation5 + $0x38c] ss:$16 sps:$4 sm:$0xff]  }
 0x674   :  { %3843 = vmatprep.subr.bf16.mxu1 %v6765_v60  ;;  %4007 = vmatprep.subr.bf16.mxu0 %v6768_v1  ;;  %v6784_v60 = vld [vmem:[#allocation5 + $0x308] ss:$16 sps:$4 sm:$0xff]   ;;  %v6789_v1 = vld [vmem:[#allocation5 + $0x324] ss:$16 sps:$4 sm:$0xff]  }
 0x676   :  { %v7246_v46 = vpop.eup %7245 }
 0x677   :  { %3844 = vmatpush1.bf16.msra.mxu1 %v6763_v13  ;;  %4008 = vmatpush1.bf16.msra.mxu0 %v6766_v44  ;;  %v1823_v13 = vadd.f32 0.2548296, %v1815_v56  ;;  %v6787_v44 = vld [vmem:[#allocation5 + $0x320] ss:$16 sps:$4 sm:$0xff]   ;;  %v1868_v22 = vmul.f32 %v7246_v46, %v1828_v30  ;;  %v6828_v30 = vld [vmem:[#allocation5 + $0x3ec] ss:$16 sps:$4 sm:$0xff]  }
 0x678   :  { %3845 = vmatprep.subr.bf16.mxu1 %v6771_v26  ;;  %4009 = vmatprep.subr.bf16.mxu0 %v6774_v38  ;;  %v6795_v26 = vld [vmem:[#allocation5 + $0x344] ss:$16 sps:$4 sm:$0xff]   ;;  %v6798_v38 = vld [vmem:[#allocation5 + $0x34c] ss:$16 sps:$4 sm:$0xff]   ;;  %v1711_v46 = vmul.f32 0.5, %v8184_v63 }
 0x679   :  { %v1831_v36 = vmul.f32 %v8218_v39, %v1823_v13  ;;  %v6799_v39 = vld [vmem:[#allocation5 + $0x360] ss:$16 sps:$4 sm:$0xff]   ;;  %v1876_v43 = vsub.f32 1.0, %v1868_v22 }
 0x67a   :  { %v6835_v63 = vld [vmem:[#allocation5 + $0x420] ss:$16 sps:$4 sm:$0xff]  }
 0x67b   :  { %3846 = vmatpush1.bf16.msra.mxu1 %v6769_v41  ;;  %4010 = vmatpush1.bf16.msra.mxu0 %v6772_v57  ;;  %v8251_v41 = vmul.f32 0.70710677, %v8101_v47  ;;  %v6801_v57 = vld [vmem:[#allocation5 + $0x364] ss:$16 sps:$4 sm:$0xff]   ;;  %v1892_v4 = vsub.f32 0.0, %v1876_v43 }
 0x67c   :  { %3847 = vmatprep.subr.bf16.mxu1 %v6777_v45  ;;  %4011 = vmatprep.subr.bf16.mxu0 %v6780_v42  ;;  %v6804_v45 = vld [vmem:[#allocation5 + $0x36c] ss:$16 sps:$4 sm:$0xff]   ;;  %v7248_v42 = vpop.eup %7247 }
 0x67d   :  { %v1871_v2 = vmul.f32 %v7248_v42, %v1831_v36  ;;  %v8257_v25 = vand.u32 2147483647, %v8251_v41  ;;  %v1900_v0 = vsel %vm1884_vm11, %v1876_v43, %v1892_v4  ;;  %v6834_v42 = vld [vmem:[#allocation5 + $0x40c] ss:$16 sps:$4 sm:$0xff]   ;;  %vm1886_vm13 = vcmp.ge.f32.partialorder %v8251_v41, 0.0 }
 0x67e   :  { %v1908_v11 = vadd.f32 1.0, %v1900_v0  ;;  %v6855_v0 = vld [vmem:[#allocation5 + $0x484] ss:$16 sps:$4 sm:$0xff]  }
 0x67f   :  { %3848 = vmatpush1.bf16.msra.mxu1 %v6775_v21  ;;  %4012 = vmatpush1.bf16.msra.mxu0 %v6778_v34  ;;  %v8260_v21 = vand.u32 2147483647, %v8254_v50  ;;  %v1879_v34 = vsub.f32 1.0, %v1871_v2  ;;  %v1734_v17 = vmul.f32 0.3275911, %v8257_v25 }
 0x680   :  { %3849 = vmatprep.subr.bf16.mxu1 %v6783_v48  ;;  %4013 = vmatprep.subr.bf16.mxu0 %v6786_v19  ;;  %v6805_v48 = vld [vmem:[#allocation5 + $0x380] ss:$16 sps:$4 sm:$0xff]   ;;  %v6808_v19 = vld [vmem:[#allocation5 + $0x388] ss:$16 sps:$4 sm:$0xff]  }
 0x681   :  { %v1737_v56 = vmul.f32 0.3275911, %v8260_v21  ;;  %v6829_v2 = vld [vmem:[#allocation5 + $0x400] ss:$16 sps:$4 sm:$0xff]   ;;  %v6922_v50 = vld [vmem:[#allocation5 + $0x5e8] ss:$16 sps:$4 sm:$0xff]  }
 0x683   :  { %3850 = vmatpush1.bf16.msra.mxu1 %v6781_v58  ;;  %4014 = vmatpush1.bf16.msra.mxu0 %v6784_v60  ;;  %v1895_v58 = vsub.f32 0.0, %v1879_v34  ;;  %v6811_v60 = vld [vmem:[#allocation5 + $0x3a0] ss:$16 sps:$4 sm:$0xff]   ;;  %v1745_v13 = vadd.f32 1.0, %v1737_v56  ;;  %v6844_v56 = vld [vmem:[#allocation5 + $0x448] ss:$16 sps:$4 sm:$0xff]  }
 0x684   :  { %3851 = vmatprep.subr.bf16.mxu1 %v6789_v1  ;;  %4015 = vmatprep.subr.bf16.mxu0 %v6792_v62  ;;  %v6814_v1 = vld [vmem:[#allocation5 + $0x3a8] ss:$16 sps:$4 sm:$0xff]   ;;  %v1742_v62 = vadd.f32 1.0, %v1734_v17  ;;  %v6846_v17 = vld [vmem:[#allocation5 + $0x44c] ss:$16 sps:$4 sm:$0xff]  }
 0x686   :  { %7249 = vrcp.f32 %v1742_v62  ;;  %v6847_v62 = vld [vmem:[#allocation5 + $0x460] ss:$16 sps:$4 sm:$0xff]  }
 0x687   :  { %3852 = vmatpush1.bf16.msra.mxu1 %v6787_v44  ;;  %4016 = vmatpush1.bf16.msra.mxu0 %v6790_v24  ;;  %v1903_v44 = vsel %vm1887_vm12, %v1879_v34, %v1895_v58  ;;  %v6817_v24 = vld [vmem:[#allocation5 + $0x3c0] ss:$16 sps:$4 sm:$0xff]   ;;  %7251 = vrcp.f32 %v1745_v13  ;;  %v6849_v58 = vld [vmem:[#allocation5 + $0x464] ss:$16 sps:$4 sm:$0xff]   ;;  %v6858_v13 = vld [vmem:[#allocation5 + $0x48c] ss:$16 sps:$4 sm:$0xff]  }
 0x688   :  { %3853 = vmatprep.subr.bf16.mxu1 %v6795_v26  ;;  %4017 = vmatprep.subr.bf16.mxu0 %v6798_v38  ;;  %v6820_v26 = vld [vmem:[#allocation5 + $0x3c8] ss:$16 sps:$4 sm:$0xff]   ;;  %v6825_v38 = vld [vmem:[#allocation5 + $0x3e4] ss:$16 sps:$4 sm:$0xff]   ;;  %v1911_v36 = vadd.f32 1.0, %v1903_v44  ;;  %vm5859_vm12 = vcmask 558592  }
 0x68a   :  { %v1919_v22 = vmul.f32 %v1911_v36, %v1711_v46  ;;  %v1841_v46 = vsub.f32 0.0, %v8260_v21 }
 0x68b   :  { %3854 = vmatpush1.bf16.msra.mxu1 %v6793_v52  ;;  %4018 = vmatpush1.bf16.msra.mxu0 %v6796_v10  ;;  %v1708_v52 = vmul.f32 0.5, %v8036_v32  ;;  %v6823_v10 = vld [vmem:[#allocation5 + $0x3e0] ss:$16 sps:$4 sm:$0xff]  }
 0x68c   :  { %3855 = vmatprep.subr.bf16.mxu1 %v6801_v57  ;;  %4019 = vmatprep.subr.bf16.mxu0 %v6804_v45  ;;  %v6831_v45 = vld [vmem:[#allocation5 + $0x404] ss:$16 sps:$4 sm:$0xff]   ;;  %v2231_v32 = vpack.c.bf16 %v1919_v22, %v1919_v22 }
 0x68d   :  { %v1916_v57 = vmul.f32 %v1908_v11, %v1708_v52  ;;  %v6864_v11 = vld [vmem:[#allocation5 + $0x4ac] ss:$16 sps:$4 sm:$0xff]   ;;  %v1838_v52 = vsub.f32 0.0, %v8257_v25 }
 0x68f   :  { %3856 = vmatpush1.bf16.msra.mxu1 %v6799_v39  ;;  %4020 = vmatpush1.bf16.msra.mxu0 %v6802_v61  ;;  %v2228_v39 = vpack.c.bf16 %v1916_v57, %v1916_v57  ;;  %v6832_v61 = vld [vmem:[#allocation5 + $0x408] ss:$16 sps:$4 sm:$0xff]  }
 0x690   :  { %3857 = vmatprep.subr.bf16.mxu1 %v6807_v59  ;;  %4021 = vmatprep.subr.bf16.mxu0 %v6810_v20  ;;  %v6837_v59 = vld [vmem:[#allocation5 + $0x424] ss:$16 sps:$4 sm:$0xff]   ;;  %v6840_v20 = vld [vmem:[#allocation5 + $0x42c] ss:$16 sps:$4 sm:$0xff]   ;;  %v8268_v43 = vpop.eup %7249  ;;  %v6862_v57 = vld [vmem:[#allocation5 + $0x4a8] ss:$16 sps:$4 sm:$0xff]  }
 0x691   :  { %v8270_v34 = vpop.eup %7251 }
 0x692   :  { %v1769_v4 = vmul.f32 1.0614054, %v8270_v34 }
 0x693   :  { %3858 = vmatpush1.bf16.msra.mxu1 %v6805_v48  ;;  %4022 = vmatpush1.bf16.msra.mxu0 %v6808_v19  ;;  %v6838_v48 = vld [vmem:[#allocation5 + $0x428] ss:$16 sps:$4 sm:$0xff]   ;;  %v6843_v19 = vld [vmem:[#allocation5 + $0x444] ss:$16 sps:$4 sm:$0xff]  }
 0x694   :  { %3859 = vmatprep.subr.bf16.mxu1 %v6813_v40  ;;  %4023 = vmatprep.subr.bf16.mxu0 %v6816_v55  ;;  %v1766_v40 = vmul.f32 1.0614054, %v8268_v43  ;;  %v6841_v55 = vld [vmem:[#allocation5 + $0x440] ss:$16 sps:$4 sm:$0xff]  }
 0x697   :  { %3860 = vmatpush1.bf16.msra.mxu1 %v6811_v60  ;;  %4024 = vmatpush1.bf16.msra.mxu0 %v6814_v1  ;;  %v6852_v60 = vld [vmem:[#allocation5 + $0x46c] ss:$16 sps:$4 sm:$0xff]   ;;  %v1774_v1 = vadd.f32 -1.4531521, %v1766_v40 }
 0x698   :  { %3861 = vmatprep.subr.bf16.mxu1 %v6819_v15  ;;  %4025 = vmatprep.subr.bf16.mxu0 %v6822_v18  ;;  %v1777_v15 = vadd.f32 -1.4531521, %v1769_v4  ;;  %v6850_v18 = vld [vmem:[#allocation5 + $0x468] ss:$16 sps:$4 sm:$0xff]  }
 0x699   :  { %v1782_v44 = vmul.f32 %v8268_v43, %v1774_v1  ;;  %v6879_v1 = vld [vmem:[#allocation5 + $0x504] ss:$16 sps:$4 sm:$0xff]  }
 0x69b   :  { %3862 = vmatpush1.bf16.msra.mxu1 %v6817_v24  ;;  %4026 = vmatpush1.bf16.msra.mxu0 %v6820_v26  ;;  %v6853_v24 = vld [vmem:[#allocation5 + $0x480] ss:$16 sps:$4 sm:$0xff]   ;;  %v1785_v26 = vmul.f32 %v8270_v34, %v1777_v15  ;;  %v1790_v36 = vadd.f32 1.4214138, %v1782_v44 }
 0x69c   :  { %3863 = vmatprep.subr.bf16.mxu1 %v6825_v38  ;;  %4027 = vmatprep.subr.bf16.mxu0 %v6828_v30  ;;  %v6856_v38 = vld [vmem:[#allocation5 + $0x488] ss:$16 sps:$4 sm:$0xff]   ;;  %v6861_v30 = vld [vmem:[#allocation5 + $0x4a4] ss:$16 sps:$4 sm:$0xff]  }
 0x69d   :  { %v1798_v22 = vmul.f32 %v8268_v43, %v1790_v36 }
 0x69f   :  { %3864 = vmatpush1.bf16.msra.mxu1 %v6823_v10  ;;  %4028 = vmatpush1.bf16.msra.mxu0 %v6826_v29  ;;  %v6859_v10 = vld [vmem:[#allocation5 + $0x4a0] ss:$16 sps:$4 sm:$0xff]   ;;  %v1793_v29 = vadd.f32 1.4214138, %v1785_v26  ;;  %v6885_v26 = vld [vmem:[#allocation5 + $0x524] ss:$16 sps:$4 sm:$0xff]  }
 0x6a0   :  { %3874 = vmatprep.subr.bf16.mxu1 %v6831_v45  ;;  %4038 = vmatprep.subr.bf16.mxu0 %v6834_v42  ;;  %v6867_v45 = vld [vmem:[#allocation5 + $0x4c4] ss:$16 sps:$4 sm:$0xff]   ;;  %v6870_v42 = vld [vmem:[#allocation5 + $0x4cc] ss:$16 sps:$4 sm:$0xff]  }
 0x6a2   :  { %3866 = vmatmul.mubr.bf16.vlgmr.msra.gmra.mrb[24].mxu1 %v2228_v39  ;;  %4030 = vmatmul.mubr.bf16.vlgmr.msra.gmra.mrb[28].mxu0 %v2228_v39  ;;  %v8283_v39 = vld [vmem:[%s8887_s6 + $0x8] sm:$0xff] }
 0x6a3   :  { %3875 = vmatpush1.bf16.msra.mxu1 %v6829_v2  ;;  %3906 = vmatprep.mubr.bf16.mxu1 %v2231_v32  ;;  %v1846_v2 = vmul.f32 %v1838_v52, %v8257_v25  ;;  %v6868_v25 = vld [vmem:[#allocation5 + $0x4c8] ss:$16 sps:$4 sm:$0xff]   ;;  %v6883_v52 = vld [vmem:[#allocation5 + $0x520] ss:$16 sps:$4 sm:$0xff]  }
 0x6a4   :  { %4039 = vmatpush1.bf16.msra.mxu0 %v6832_v61  ;;  %4070 = vmatprep.mubr.bf16.mxu0 %v2231_v32  ;;  %v734_v61 = vrot.slane %v8283_v39, %v7649_v27  ;;  %v1933_v32 = vrot.slane %v8021_v3, %v7978_v33  ;;  %v1989_v3 = vrot.slane %v8106_v51, %v7989_v37  ;;  %v7316_v51 = vld [vmem:[%s8853_s14] sm:$0xff] }
 0x6a5   :  { %3876 = vmatprep.subr.bf16.mxu1 %v6837_v59  ;;  %4040 = vmatprep.subr.bf16.mxu0 %v6840_v20  ;;  %v6865_v59 = vld [vmem:[#allocation5 + $0x4c0] ss:$16 sps:$4 sm:$0xff]   ;;  %v1801_v20 = vmul.f32 %v8270_v34, %v1793_v29  ;;  %v1858_v40 = vmul.f32 1.442695, %v1846_v2  ;;  %v6886_v29 = vld [vmem:[#allocation5 + $0x528] ss:$16 sps:$4 sm:$0xff]  }
 0x6a6   :  { %v1953_v4 = vrot.slane %v1933_v32, %v7975_v31  ;;  %v8308_v32 = vmul.f32 0.70710677, %v8103_v49 }
 0x6a7   :  { %3877 = vmatpush1.bf16.msra.mxu1 %v6835_v63  ;;  %v1849_v63 = vmul.f32 %v1841_v46, %v8260_v21  ;;  %v6874_v21 = vld [vmem:[#allocation5 + $0x4e8] ss:$16 sps:$4 sm:$0xff]   ;;  %7253 = vpow2.f32 %v1858_v40  ;;  %v6891_v46 = vld [vmem:[#allocation5 + $0x544] ss:$16 sps:$4 sm:$0xff]  }
 0x6a8   :  { %4041 = vmatpush1.bf16.msra.mxu0 %v6838_v48  ;;  %3878 = vmatprep.subr.bf16.mxu1 %v6843_v19  ;;  %v6873_v48 = vld [vmem:[#allocation5 + $0x4e4] ss:$16 sps:$4 sm:$0xff]   ;;  %v6876_v19 = vld [vmem:[#allocation5 + $0x4ec] ss:$16 sps:$4 sm:$0xff]   ;;  %v6898_v40 = vld [vmem:[#allocation5 + $0x568] ss:$16 sps:$4 sm:$0xff]  }
 0x6a9   :  { %4042 = vmatprep.subr.bf16.mxu0 %v6846_v17  ;;  %v1806_v17 = vadd.f32 -0.28449672, %v1798_v22  ;;  %v6889_v22 = vld [vmem:[#allocation5 + $0x540] ss:$16 sps:$4 sm:$0xff]   ;;  %vm1888_vm15 = vcmp.ge.f32.partialorder %v8308_v32, 0.0 }
 0x6ab   :  { %3879 = vmatpush1.bf16.msra.mxu1 %v6841_v55  ;;  %v1299_v55 = vadd.f32 %v8135_v9, %v734_v61  ;;  %v1814_v15 = vmul.f32 %v8268_v43, %v1806_v17  ;;  %v2009_v9 = vrot.slane %v1989_v3, %v7645_v23 }
 0x6ac   :  { %4043 = vmatpush1.bf16.msra.mxu0 %v6844_v56  ;;  %3880 = vmatprep.subr.bf16.mxu1 %v6849_v58  ;;  %v6871_v56 = vld [vmem:[#allocation5 + $0x4e0] ss:$16 sps:$4 sm:$0xff]   ;;  %v1809_v58 = vadd.f32 -0.28449672, %v1801_v20  ;;  %v6897_v20 = vld [vmem:[#allocation5 + $0x564] ss:$16 sps:$4 sm:$0xff]  }
 0x6ad   :  { %4044 = vmatprep.subr.bf16.mxu0 %v6852_v60  ;;  %v1864_v60 = vmul.f32 1.442695, %v1849_v63  ;;  %v6900_v63 = vld [vmem:[#allocation5 + $0x56c] ss:$16 sps:$4 sm:$0xff]  }
 0x6ae   :  { %v1817_v44 = vmul.f32 %v8270_v34, %v1809_v58  ;;  %v6901_v58 = vld [vmem:[#allocation5 + $0x580] ss:$16 sps:$4 sm:$0xff]  }
 0x6af   :  { %3881 = vmatpush1.bf16.msra.mxu1 %v6847_v62  ;;  %v6882_v62 = vld [vmem:[#allocation5 + $0x50c] ss:$16 sps:$4 sm:$0xff]   ;;  %7255 = vpow2.f32 %v1864_v60 }
 0x6b0   :  { %4045 = vmatpush1.bf16.msra.mxu0 %v6850_v18  ;;  %3882 = vmatprep.subr.bf16.mxu1 %v6855_v0  ;;  %v1963_v18 = vsub.f32 %v1299_v55, %v1953_v4  ;;  %v2029_v0 = vrot.slane %v7316_v51, %v7995_v35  ;;  %v6903_v55 = vld [vmem:[#allocation5 + $0x584] ss:$16 sps:$4 sm:$0xff]   ;;  %v6906_v4 = vld [vmem:[#allocation5 + $0x58c] ss:$16 sps:$4 sm:$0xff]   ;;  %v6907_v51 = vld [vmem:[#allocation5 + $0x5a0] ss:$16 sps:$4 sm:$0xff]  }
 0x6b1   :  { %4046 = vmatprep.subr.bf16.mxu0 %v6858_v13  ;;  %v6877_v13 = vld [vmem:[#allocation5 + $0x500] ss:$16 sps:$4 sm:$0xff]   ;;  %v7254_v61 = vpop.eup %7253 }
 0x6b2   :  { %v2049_v36 = vrot.slane %v2029_v0, %v7649_v27 }
 0x6b3   :  { %3883 = vmatpush1.bf16.msra.mxu1 %v6853_v24  ;;  %v6880_v24 = vld [vmem:[#allocation5 + $0x508] ss:$16 sps:$4 sm:$0xff]  }
 0x6b4   :  { %4047 = vmatpush1.bf16.msra.mxu0 %v6856_v38  ;;  %3884 = vmatprep.subr.bf16.mxu1 %v6861_v30  ;;  %v6888_v38 = vld [vmem:[#allocation5 + $0x52c] ss:$16 sps:$4 sm:$0xff]   ;;  %v1822_v30 = vadd.f32 0.2548296, %v1814_v15 }
 0x6b5   :  { %4048 = vmatprep.subr.bf16.mxu0 %v6864_v11  ;;  %v2019_v11 = vmul.f32 %v2009_v9, %v1963_v18  ;;  %v6912_v15 = vld [vmem:[#allocation5 + $0x5ac] ss:$16 sps:$4 sm:$0xff]  }
 0x6b7   :  { %3885 = vmatpush1.bf16.msra.mxu1 %v6859_v10  ;;  %v1825_v10 = vadd.f32 0.2548296, %v1817_v44  ;;  %v6910_v44 = vld [vmem:[#allocation5 + $0x5a8] ss:$16 sps:$4 sm:$0xff]  }
 0x6b8   :  { %4049 = vmatpush1.bf16.msra.mxu0 %v6862_v57  ;;  %3886 = vmatprep.subr.bf16.mxu1 %v6867_v45  ;;  %v6894_v57 = vld [vmem:[#allocation5 + $0x54c] ss:$16 sps:$4 sm:$0xff]   ;;  %v1830_v45 = vmul.f32 %v8268_v43, %v1822_v30 }
 0x6b9   :  { %4050 = vmatprep.subr.bf16.mxu0 %v6870_v42  ;;  %v8304_v42 = vadd.f32 %v2049_v36, %v2019_v11  ;;  %v1833_v2 = vmul.f32 %v8270_v34, %v1825_v10  ;;  %v8314_v34 = vand.u32 2147483647, %v8308_v32  ;;  %v6913_v11 = vld [vmem:[#allocation5 + $0x5c0] ss:$16 sps:$4 sm:$0xff]   ;;  %v6921_v10 = vld [vmem:[#allocation5 + $0x5e4] ss:$16 sps:$4 sm:$0xff]  }
 0x6bb   :  { %3887 = vmatpush1.bf16.msra.mxu1 %v6865_v59  ;;  %v6892_v59 = vld [vmem:[#allocation5 + $0x548] ss:$16 sps:$4 sm:$0xff]   ;;  %v8311_v43 = vmul.f32 0.70710677, %v8304_v42 }
 0x6bc   :  { %4051 = vmatpush1.bf16.msra.mxu0 %v6868_v25  ;;  %3888 = vmatprep.subr.bf16.mxu1 %v6873_v48  ;;  %v1870_v25 = vmul.f32 %v7254_v61, %v1830_v45  ;;  %v7256_v48 = vpop.eup %7255  ;;  %v6919_v45 = vld [vmem:[#allocation5 + $0x5e0] ss:$16 sps:$4 sm:$0xff]   ;;  %v1713_v61 = vmul.f32 0.5, %v8247_v28 }
 0x6bd   :  { %4052 = vmatprep.subr.bf16.mxu0 %v6876_v19  ;;  %v6895_v19 = vld [vmem:[#allocation5 + $0x560] ss:$16 sps:$4 sm:$0xff]   ;;  %v1873_v17 = vmul.f32 %v7256_v48, %v1833_v2  ;;  %v6927_v2 = vld [vmem:[#allocation5 + $0x604] ss:$16 sps:$4 sm:$0xff]   ;;  %vm2151_vm0 = vcmp.ge.f32.partialorder %v8311_v43, 0.0 }
 0x6be   :  { %v1878_v3 = vsub.f32 1.0, %v1870_v25  ;;  %v6933_v48 = vld [vmem:[#allocation5 + $0x624] ss:$16 sps:$4 sm:$0xff]  }
 0x6bf   :  { %3889 = vmatpush1.bf16.msra.mxu1 %v6871_v56  ;;  %v8317_v56 = vand.u32 2147483647, %v8311_v43  ;;  %v1881_v60 = vsub.f32 1.0, %v1873_v17  ;;  %v7018_v43 = vld [vmem:[#allocation5 + $0x7e8] ss:$16 sps:$4 sm:$0xff]  }
 0x6c0   :  { %4053 = vmatpush1.bf16.msra.mxu0 %v6874_v21  ;;  %3890 = vmatprep.subr.bf16.mxu1 %v6879_v1  ;;  %v1736_v21 = vmul.f32 0.3275911, %v8314_v34  ;;  %v6904_v1 = vld [vmem:[#allocation5 + $0x588] ss:$16 sps:$4 sm:$0xff]   ;;  %v1894_v18 = vsub.f32 0.0, %v1878_v3 }
 0x6c1   :  { %4054 = vmatprep.subr.bf16.mxu0 %v6882_v62  ;;  %v6909_v62 = vld [vmem:[#allocation5 + $0x5a4] ss:$16 sps:$4 sm:$0xff]   ;;  %v2075_v9 = vmul.f32 0.3275911, %v8317_v56  ;;  %v1897_v0 = vsub.f32 0.0, %v1881_v60 }
 0x6c3   :  { %3891 = vmatpush1.bf16.msra.mxu1 %v6877_v13  ;;  %v1744_v13 = vadd.f32 1.0, %v1736_v21  ;;  %v2079_v30 = vadd.f32 1.0, %v2075_v9  ;;  %v1905_v36 = vsel %vm1889_vm14, %v1881_v60, %v1897_v0  ;;  %v6937_v21 = vld [vmem:[#allocation5 + $0x640] ss:$16 sps:$4 sm:$0xff]   ;;  %vm5871_vm14 = vcmask 632400  }
 0x6c4   :  { %4055 = vmatpush1.bf16.msra.mxu0 %v6880_v24  ;;  %3892 = vmatprep.subr.bf16.mxu1 %v6885_v26  ;;  %v6915_v24 = vld [vmem:[#allocation5 + $0x5c4] ss:$16 sps:$4 sm:$0xff]   ;;  %v6918_v26 = vld [vmem:[#allocation5 + $0x5cc] ss:$16 sps:$4 sm:$0xff]  }
 0x6c5   :  { %4056 = vmatprep.subr.bf16.mxu0 %v6888_v38  ;;  %v1902_v38 = vsel %vm1886_vm13, %v1878_v3, %v1894_v18  ;;  %7257 = vrcp.f32 %v1744_v13  ;;  %v6939_v3 = vld [vmem:[#allocation5 + $0x644] ss:$16 sps:$4 sm:$0xff]   ;;  %v6948_v18 = vld [vmem:[#allocation5 + $0x66c] ss:$16 sps:$4 sm:$0xff]   ;;  %v6946_v13 = vld [vmem:[#allocation5 + $0x668] ss:$16 sps:$4 sm:$0xff]  }
 0x6c6   :  { %v1910_v41 = vadd.f32 1.0, %v1902_v38  ;;  %7259 = vrcp.f32 %v2079_v30  ;;  %v6949_v38 = vld [vmem:[#allocation5 + $0x680] ss:$16 sps:$4 sm:$0xff]   ;;  %vm5865_vm13 = vcmask 599592  }
 0x6c7   :  { %3893 = vmatpush1.bf16.msra.mxu1 %v6883_v52  ;;  %v6916_v52 = vld [vmem:[#allocation5 + $0x5c8] ss:$16 sps:$4 sm:$0xff]  }
 0x6c8   :  { %4057 = vmatpush1.bf16.msra.mxu0 %v6886_v29  ;;  %3894 = vmatprep.subr.bf16.mxu1 %v6891_v46  ;;  %v6924_v29 = vld [vmem:[#allocation5 + $0x5ec] ss:$16 sps:$4 sm:$0xff]   ;;  %v1710_v46 = vmul.f32 0.5, %v8101_v47  ;;  %v6928_v47 = vld [vmem:[#allocation5 + $0x608] ss:$16 sps:$4 sm:$0xff]  }
 0x6c9   :  { %4058 = vmatprep.subr.bf16.mxu0 %v6894_v57  ;;  %v1913_v57 = vadd.f32 1.0, %v1905_v36  ;;  %v6957_v36 = vld [vmem:[#allocation5 + $0x6a4] ss:$16 sps:$4 sm:$0xff]  }
 0x6cb   :  { %3895 = vmatpush1.bf16.msra.mxu1 %v6889_v22  ;;  %v1918_v22 = vmul.f32 %v1910_v41, %v1710_v46  ;;  %v1840_v41 = vsub.f32 0.0, %v8314_v34 }
 0x6cc   :  { %4059 = vmatpush1.bf16.msra.mxu0 %v6892_v59  ;;  %3896 = vmatprep.subr.bf16.mxu1 %v6897_v20  ;;  %v6930_v59 = vld [vmem:[#allocation5 + $0x60c] ss:$16 sps:$4 sm:$0xff]   ;;  %v1921_v20 = vmul.f32 %v1913_v57, %v1713_v61  ;;  %v2127_v57 = vsub.f32 0.0, %v8317_v56 }
 0x6cd   :  { %4060 = vmatprep.subr.bf16.mxu0 %v6900_v63  ;;  %v6925_v63 = vld [vmem:[#allocation5 + $0x600] ss:$16 sps:$4 sm:$0xff]   ;;  %v2230_v25 = vpack.c.bf16 %v1918_v22, %v1918_v22  ;;  %v742_v22 = vrot.slane %v8283_v39, %v8025_v8  ;;  %v6964_v39 = vld [vmem:[#allocation5 + $0x6c8] ss:$16 sps:$4 sm:$0xff]  }
 0x6ce   :  { %v2233_v17 = vpack.c.bf16 %v1921_v20, %v1921_v20 }
 0x6cf   :  { %3897 = vmatpush1.bf16.msra.mxu1 %v6895_v19  ;;  %v8325_v19 = vpop.eup %7257 }
 0x6d0   :  { %4061 = vmatpush1.bf16.msra.mxu0 %v6898_v40  ;;  %3898 = vmatprep.subr.bf16.mxu1 %v6903_v55  ;;  %v6936_v40 = vld [vmem:[#allocation5 + $0x62c] ss:$16 sps:$4 sm:$0xff]   ;;  %v6931_v55 = vld [vmem:[#allocation5 + $0x620] ss:$16 sps:$4 sm:$0xff]   ;;  %v8327_v28 = vpop.eup %7259  ;;  %v1768_v60 = vmul.f32 1.0614054, %v8325_v19 }
 0x6d1   :  { %4062 = vmatprep.subr.bf16.mxu0 %v6906_v4  ;;  %v6934_v4 = vld [vmem:[#allocation5 + $0x628] ss:$16 sps:$4 sm:$0xff]  }
 0x6d2   :  { %v1776_v9 = vadd.f32 -1.4531521, %v1768_v60  ;;  %v6967_v60 = vld [vmem:[#allocation5 + $0x6e0] ss:$16 sps:$4 sm:$0xff]  }
 0x6d3   :  { %3899 = vmatpush1.bf16.msra.mxu1 %v6901_v58  ;;  %v6942_v58 = vld [vmem:[#allocation5 + $0x64c] ss:$16 sps:$4 sm:$0xff]  }
 0x6d4   :  { %4063 = vmatpush1.bf16.msra.mxu0 %v6904_v1  ;;  %3900 = vmatprep.subr.bf16.mxu1 %v6909_v62  ;;  %v2091_v1 = vmul.f32 1.0614054, %v8327_v28  ;;  %v6940_v62 = vld [vmem:[#allocation5 + $0x648] ss:$16 sps:$4 sm:$0xff]  }
 0x6d5   :  { %4064 = vmatprep.subr.bf16.mxu0 %v6912_v15  ;;  %v6945_v15 = vld [vmem:[#allocation5 + $0x664] ss:$16 sps:$4 sm:$0xff]  }
 0x6d6   :  { %v2095_v0 = vadd.f32 -1.4531521, %v2091_v1 }
 0x6d7   :  { %3901 = vmatpush1.bf16.msra.mxu1 %v6907_v51  ;;  %v6943_v51 = vld [vmem:[#allocation5 + $0x660] ss:$16 sps:$4 sm:$0xff]  }
 0x6d8   :  { %4065 = vmatpush1.bf16.msra.mxu0 %v6910_v44  ;;  %3902 = vmatprep.subr.bf16.mxu1 %v6915_v24  ;;  %v6951_v44 = vld [vmem:[#allocation5 + $0x684] ss:$16 sps:$4 sm:$0xff]   ;;  %v6954_v24 = vld [vmem:[#allocation5 + $0x68c] ss:$16 sps:$4 sm:$0xff]   ;;  %v2099_v30 = vmul.f32 %v8327_v28, %v2095_v0 }
 0x6d9   :  { %4066 = vmatprep.subr.bf16.mxu0 %v6918_v26  ;;  %v1784_v26 = vmul.f32 %v8325_v19, %v1776_v9  ;;  %v6978_v9 = vld [vmem:[#allocation5 + $0x70c] ss:$16 sps:$4 sm:$0xff]  }
 0x6da   :  { %v2103_v46 = vadd.f32 1.4214138, %v2099_v30 }
 0x6db   :  { %3903 = vmatpush1.bf16.msra.mxu1 %v6913_v11  ;;  %v6952_v11 = vld [vmem:[#allocation5 + $0x688] ss:$16 sps:$4 sm:$0xff]  }
 0x6dc   :  { %4067 = vmatpush1.bf16.msra.mxu0 %v6916_v52  ;;  %3904 = vmatprep.subr.bf16.mxu1 %v6921_v10  ;;  %v6960_v52 = vld [vmem:[#allocation5 + $0x6ac] ss:$16 sps:$4 sm:$0xff]   ;;  %v1792_v10 = vadd.f32 1.4214138, %v1784_v26 }
 0x6dd   :  { %4068 = vmatprep.subr.bf16.mxu0 %v6924_v29  ;;  %v6955_v29 = vld [vmem:[#allocation5 + $0x6a0] ss:$16 sps:$4 sm:$0xff]  }
 0x6de   :  { %v1800_v20 = vmul.f32 %v8325_v19, %v1792_v10  ;;  %v6987_v10 = vld [vmem:[#allocation5 + $0x744] ss:$16 sps:$4 sm:$0xff]  }
 0x6df   :  { %3905 = vmatpush1.bf16.msra.mxu1 %v6919_v45  ;;  %v6958_v45 = vld [vmem:[#allocation5 + $0x6a8] ss:$16 sps:$4 sm:$0xff]  }
 0x6e0   :  { %4069 = vmatpush1.bf16.msra.mxu0 %v6922_v50  ;;  %3915 = vmatprep.subr.bf16.mxu1 %v6927_v2  ;;  %v6963_v50 = vld [vmem:[#allocation5 + $0x6c4] ss:$16 sps:$4 sm:$0xff]  }
 0x6e1   :  { %4079 = vmatprep.subr.bf16.mxu0 %v6930_v59  ;;  %v7317_v2 = vld [vmem:[%s8853_s14 + $0x8] sm:$0xff]  ;;  %v6966_v59 = vld [vmem:[#allocation5 + $0x6cc] ss:$16 sps:$4 sm:$0xff]  }
 0x6e2   :  { %3907 = vmatmul.mubr.bf16.vlgmr.msra.gmra.mrb[24].mxu1 %v2230_v25  ;;  %v1941_v61 = vrot.slane %v7317_v2, %v7978_v33 }
 0x6e3   :  { %4071 = vmatmul.mubr.bf16.vlgmr.msra.gmra.mrb[28].mxu0 %v2230_v25  ;;  %3916 = vmatpush1.bf16.msra.mxu1 %v6925_v63  ;;  %v1848_v63 = vmul.f32 %v1840_v41, %v8314_v34  ;;  %v6961_v25 = vld [vmem:[#allocation5 + $0x6c0] ss:$16 sps:$4 sm:$0xff]   ;;  %v1808_v34 = vadd.f32 -0.28449672, %v1800_v20  ;;  %v6996_v20 = vld [vmem:[#allocation5 + $0x76c] ss:$16 sps:$4 sm:$0xff]  }
 0x6e4   :  { %3947 = vmatprep.mubr.bf16.mxu1 %v2233_v17  ;;  %4080 = vmatpush1.bf16.msra.mxu0 %v6928_v47  ;;  %v2107_v47 = vmul.f32 %v8327_v28, %v2103_v46 }
 0x6e5   :  { %4111 = vmatprep.mubr.bf16.mxu0 %v2233_v17  ;;  %3917 = vmatprep.subr.bf16.mxu1 %v6933_v48  ;;  %v2131_v48 = vmul.f32 %v2127_v57, %v8317_v56  ;;  %v6969_v17 = vld [vmem:[#allocation5 + $0x6e4] ss:$16 sps:$4 sm:$0xff]   ;;  %v6970_v56 = vld [vmem:[#allocation5 + $0x6e8] ss:$16 sps:$4 sm:$0xff]   ;;  %v6985_v57 = vld [vmem:[#allocation5 + $0x740] ss:$16 sps:$4 sm:$0xff]  }
 0x6e6   :  { %4081 = vmatprep.subr.bf16.mxu0 %v6936_v40  ;;  %v1340_v40 = vadd.f32 %v8137_v12, %v742_v22  ;;  %v8359_v22 = vmul.f32 0.70710677, %v8158_v6 }
 0x6e7   :  { %3918 = vmatpush1.bf16.msra.mxu1 %v6931_v55  ;;  %v1961_v55 = vrot.slane %v1941_v61, %v7975_v31  ;;  %v2136_v1 = vmul.f32 1.442695, %v2131_v48  ;;  %v6993_v61 = vld [vmem:[#allocation5 + $0x764] ss:$16 sps:$4 sm:$0xff]   ;;  %v6994_v48 = vld [vmem:[#allocation5 + $0x768] ss:$16 sps:$4 sm:$0xff]  }
 0x6e8   :  { %4082 = vmatpush1.bf16.msra.mxu0 %v6934_v4  ;;  %3919 = vmatprep.subr.bf16.mxu1 %v6939_v3  ;;  %v1997_v4 = vrot.slane %v8112_v53, %v7989_v37  ;;  %v6972_v3 = vld [vmem:[#allocation5 + $0x6ec] ss:$16 sps:$4 sm:$0xff]   ;;  %v1816_v53 = vmul.f32 %v8325_v19, %v1808_v34  ;;  %vm2150_vm1 = vcmp.ge.f32.partialorder %v8359_v22, 0.0 }
 0x6e9   :  { %4083 = vmatprep.subr.bf16.mxu0 %v6942_v58  ;;  %v1862_v58 = vmul.f32 1.442695, %v1848_v63 }
 0x6ea   :  { %v2017_v12 = vrot.slane %v1997_v4, %v7645_v23  ;;  %v1824_v30 = vadd.f32 0.2548296, %v1816_v53  ;;  %v6997_v4 = vld [vmem:[#allocation5 + $0x780] ss:$16 sps:$4 sm:$0xff]  }
 0x6eb   :  { %3920 = vmatpush1.bf16.msra.mxu1 %v6937_v21  ;;  %v2111_v21 = vadd.f32 -0.28449672, %v2107_v47  ;;  %7261 = vpow2.f32 %v1862_v58  ;;  %v7000_v58 = vld [vmem:[#allocation5 + $0x788] ss:$16 sps:$4 sm:$0xff]  }
 0x6ec   :  { %4084 = vmatpush1.bf16.msra.mxu0 %v6940_v62  ;;  %3921 = vmatprep.subr.bf16.mxu1 %v6945_v15  ;;  %v6975_v62 = vld [vmem:[#allocation5 + $0x704] ss:$16 sps:$4 sm:$0xff]   ;;  %v1965_v15 = vsub.f32 %v1340_v40, %v1961_v55  ;;  %7263 = vpow2.f32 %v2136_v1  ;;  %v1832_v46 = vmul.f32 %v8325_v19, %v1824_v30  ;;  %v6991_v19 = vld [vmem:[#allocation5 + $0x760] ss:$16 sps:$4 sm:$0xff]   ;;  %v7002_v40 = vld [vmem:[#allocation5 + $0x78c] ss:$16 sps:$4 sm:$0xff]  }
 0x6ed   :  { %4085 = vmatprep.subr.bf16.mxu0 %v6948_v18  ;;  %v2037_v18 = vrot.slane %v7317_v2, %v7995_v35  ;;  %v2115_v0 = vmul.f32 %v8327_v28, %v2111_v21  ;;  %v6988_v2 = vld [vmem:[#allocation5 + $0x748] ss:$16 sps:$4 sm:$0xff]   ;;  %v7008_v1 = vld [vmem:[#allocation5 + $0x7ac] ss:$16 sps:$4 sm:$0xff]   ;;  %v1712_v30 = vmul.f32 0.5, %v8103_v49 }
 0x6ef   :  { %3922 = vmatpush1.bf16.msra.mxu1 %v6943_v51  ;;  %v6973_v51 = vld [vmem:[#allocation5 + $0x700] ss:$16 sps:$4 sm:$0xff]   ;;  %v2057_v26 = vrot.slane %v2037_v18, %v7649_v27  ;;  %v7006_v18 = vld [vmem:[#allocation5 + $0x7a8] ss:$16 sps:$4 sm:$0xff]  }
 0x6f0   :  { %4086 = vmatpush1.bf16.msra.mxu0 %v6946_v13  ;;  %3923 = vmatprep.subr.bf16.mxu1 %v6951_v44  ;;  %v6976_v13 = vld [vmem:[#allocation5 + $0x708] ss:$16 sps:$4 sm:$0xff]   ;;  %v6981_v44 = vld [vmem:[#allocation5 + $0x724] ss:$16 sps:$4 sm:$0xff]  }
 0x6f1   :  { %4087 = vmatprep.subr.bf16.mxu0 %v6954_v24  ;;  %v2021_v24 = vmul.f32 %v2017_v12, %v1965_v15 }
 0x6f3   :  { %3924 = vmatpush1.bf16.msra.mxu1 %v6949_v38  ;;  %v6984_v38 = vld [vmem:[#allocation5 + $0x72c] ss:$16 sps:$4 sm:$0xff]   ;;  %v8354_v41 = vadd.f32 %v2057_v26, %v2021_v24  ;;  %v7012_v24 = vld [vmem:[#allocation5 + $0x7c8] ss:$16 sps:$4 sm:$0xff]   ;;  %v7017_v26 = vld [vmem:[#allocation5 + $0x7e4] ss:$16 sps:$4 sm:$0xff]  }
 0x6f4   :  { %4088 = vmatpush1.bf16.msra.mxu0 %v6952_v11  ;;  %3925 = vmatprep.subr.bf16.mxu1 %v6957_v36  ;;  %v6979_v11 = vld [vmem:[#allocation5 + $0x720] ss:$16 sps:$4 sm:$0xff]   ;;  %v2119_v36 = vadd.f32 0.2548296, %v2115_v0 }
 0x6f5   :  { %4089 = vmatprep.subr.bf16.mxu0 %v6960_v52  ;;  %v6982_v52 = vld [vmem:[#allocation5 + $0x728] ss:$16 sps:$4 sm:$0xff]  }
 0x6f7   :  { %3926 = vmatpush1.bf16.msra.mxu1 %v6955_v29  ;;  %v6990_v29 = vld [vmem:[#allocation5 + $0x74c] ss:$16 sps:$4 sm:$0xff]  }
 0x6f8   :  { %4090 = vmatpush1.bf16.msra.mxu0 %v6958_v45  ;;  %3927 = vmatprep.subr.bf16.mxu1 %v6963_v50  ;;  %v2123_v45 = vmul.f32 %v8327_v28, %v2119_v36  ;;  %v7262_v50 = vpop.eup %7261  ;;  %v8365_v28 = vand.u32 2147483647, %v8359_v22  ;;  %v7015_v36 = vld [vmem:[#allocation5 + $0x7e0] ss:$16 sps:$4 sm:$0xff]   ;;  %v2065_v22 = vmul.f32 0.5, %v8354_v41 }
 0x6f9   :  { %4091 = vmatprep.subr.bf16.mxu0 %v6966_v59  ;;  %v8362_v59 = vmul.f32 0.70710677, %v8354_v41  ;;  %v1872_v63 = vmul.f32 %v7262_v50, %v1832_v46  ;;  %v7026_v50 = vld [vmem:[#allocation8 + $0x14] ss:$8 sps:$4 sm:$0xff]   ;;  %v7075_v41 = vld [vmem:[#allocation8 + $0x120] ss:$8 sps:$4 sm:$0xff]  }
 0x6fa   :  { %v2074_v34 = vmul.f32 0.3275911, %v8365_v28 }
 0x6fb   :  { %3928 = vmatpush1.bf16.msra.mxu1 %v6961_v25  ;;  %v7264_v25 = vpop.eup %7263  ;;  %v1880_v55 = vsub.f32 1.0, %v1872_v63  ;;  %vm2153_vm2 = vcmp.ge.f32.partialorder %v8362_v59, 0.0 }
 0x6fc   :  { %4092 = vmatpush1.bf16.msra.mxu0 %v6964_v39  ;;  %3929 = vmatprep.subr.bf16.mxu1 %v6969_v17  ;;  %v2143_v47 = vmul.f32 %v7264_v25, %v2123_v45  ;;  %v6999_v39 = vld [vmem:[#allocation5 + $0x784] ss:$16 sps:$4 sm:$0xff]   ;;  %v8368_v17 = vand.u32 2147483647, %v8362_v59  ;;  %v2078_v12 = vadd.f32 1.0, %v2074_v34 }
 0x6fd   :  { %4093 = vmatprep.subr.bf16.mxu0 %v6972_v3  ;;  %v7033_v34 = vld [vmem:[#allocation8 + $0x40] ss:$8 sps:$4 sm:$0xff]  }
 0x6fe   :  { %v2147_v3 = vsub.f32 1.0, %v2143_v47  ;;  %v2077_v21 = vmul.f32 0.3275911, %v8368_v17  ;;  %7265 = vrcp.f32 %v2078_v12  ;;  %v7032_v47 = vld [vmem:[#allocation8 + $0x34] ss:$8 sps:$4 sm:$0xff]  }
 0x6ff   :  { %3930 = vmatpush1.bf16.msra.mxu1 %v6967_v60  ;;  %v7005_v60 = vld [vmem:[#allocation5 + $0x7a4] ss:$16 sps:$4 sm:$0xff]   ;;  %v7069_v59 = vld [vmem:[#allocation8 + $0x100] ss:$8 sps:$4 sm:$0xff]  }
 0x700   :  { %4094 = vmatpush1.bf16.msra.mxu0 %v6970_v56  ;;  %3931 = vmatprep.subr.bf16.mxu1 %v6975_v62  ;;  %v1896_v56 = vsub.f32 0.0, %v1880_v55  ;;  %v7003_v62 = vld [vmem:[#allocation5 + $0x7a0] ss:$16 sps:$4 sm:$0xff]   ;;  %v2155_v15 = vsub.f32 0.0, %v2147_v3  ;;  %v2081_v53 = vadd.f32 1.0, %v2077_v21  ;;  %v2126_v21 = vsub.f32 0.0, %v8365_v28 }
 0x701   :  { %4095 = vmatprep.subr.bf16.mxu0 %v6978_v9  ;;  %v7011_v9 = vld [vmem:[#allocation5 + $0x7c4] ss:$16 sps:$4 sm:$0xff]  }
 0x702   :  { %v1904_v0 = vsel %vm1888_vm15, %v1880_v55, %v1896_v56  ;;  %7267 = vrcp.f32 %v2081_v53  ;;  %v7035_v55 = vld [vmem:[#allocation8 + $0x44] ss:$8 sps:$4 sm:$0xff]   ;;  %v2129_v56 = vsub.f32 0.0, %v8368_v17  ;;  %vm5877_vm15 = vcmask 673392  }
 0x703   :  { %3932 = vmatpush1.bf16.msra.mxu1 %v6973_v51  ;;  %v7014_v51 = vld [vmem:[#allocation5 + $0x7cc] ss:$16 sps:$4 sm:$0xff]   ;;  %v1912_v32 = vadd.f32 1.0, %v1904_v0 }
 0x704   :  { %4096 = vmatpush1.bf16.msra.mxu0 %v6976_v13  ;;  %3933 = vmatprep.subr.bf16.mxu1 %v6981_v44  ;;  %v7009_v13 = vld [vmem:[#allocation5 + $0x7c0] ss:$16 sps:$4 sm:$0xff]   ;;  %v2159_v44 = vsel %vm2151_vm0, %v2147_v3, %v2155_v15  ;;  %v7041_v15 = vld [vmem:[#allocation8 + $0x64] ss:$8 sps:$4 sm:$0xff]   ;;  %v2133_v53 = vmul.f32 %v2129_v56, %v8368_v17  ;;  %v7044_v0 = vld [vmem:[#allocation8 + $0x74] ss:$8 sps:$4 sm:$0xff]  }
 0x705   :  { %4097 = vmatprep.subr.bf16.mxu0 %v6984_v38  ;;  %v7020_v38 = vld [vmem:[#allocation5 + $0x7ec] ss:$16 sps:$4 sm:$0xff]   ;;  %v7045_v17 = vld [vmem:[#allocation8 + $0x80] ss:$8 sps:$4 sm:$0xff]  }
 0x706   :  { %v7068_v56 = vld [vmem:[#allocation8 + $0xf4] ss:$8 sps:$4 sm:$0xff]  }
 0x707   :  { %3934 = vmatpush1.bf16.msra.mxu1 %v6979_v11  ;;  %v2163_v11 = vadd.f32 1.0, %v2159_v44 }
 0x708   :  { %4098 = vmatpush1.bf16.msra.mxu0 %v6982_v52  ;;  %3935 = vmatprep.subr.bf16.mxu1 %v6987_v10  ;;  %v1920_v52 = vmul.f32 %v1912_v32, %v1712_v30  ;;  %v7023_v10 = vld [vmem:[#allocation8 + $0x4] ss:$8 sps:$4 sm:$0xff]   ;;  %v7042_v32 = vld [vmem:[#allocation8 + $0x70] ss:$8 sps:$4 sm:$0xff]  }
 0x709   :  { %4099 = vmatprep.subr.bf16.mxu0 %v6990_v29  ;;  %v2063_v29 = vmul.f32 0.5, %v8304_v42  ;;  %v7029_v42 = vld [vmem:[#allocation8 + $0x24] ss:$8 sps:$4 sm:$0xff]  }
 0x70a   :  { %v2232_v45 = vpack.c.bf16 %v1920_v52, %v1920_v52  ;;  %v7048_v52 = vld [vmem:[#allocation8 + $0x90] ss:$8 sps:$4 sm:$0xff]  }
 0x70b   :  { %3936 = vmatpush1.bf16.msra.mxu1 %v6985_v57  ;;  %v2167_v46 = vmul.f32 %v2163_v11, %v2063_v29  ;;  %v7021_v57 = vld [vmem:[#allocation8] ss:$8 sps:$4 sm:$0xff]   ;;  %v7050_v11 = vld [vmem:[#allocation8 + $0x94] ss:$8 sps:$4 sm:$0xff]  }
 0x70c   :  { %4100 = vmatpush1.bf16.msra.mxu0 %v6988_v2  ;;  %3937 = vmatprep.subr.bf16.mxu1 %v6993_v61  ;;  %v8376_v2 = vpop.eup %7265 }
 0x70d   :  { %4101 = vmatprep.subr.bf16.mxu0 %v6996_v20  ;;  %v4369_v49 = vpack.c.bf16 %v2167_v46, %v2167_v46  ;;  %v8378_v61 = vpop.eup %7267  ;;  %v7024_v20 = vld [vmem:[#allocation8 + $0x10] ss:$8 sps:$4 sm:$0xff]   ;;  %v2090_v63 = vmul.f32 1.0614054, %v8376_v2 }
 0x70e   :  { %v2093_v25 = vmul.f32 1.0614054, %v8378_v61 }
 0x70f   :  { %3938 = vmatpush1.bf16.msra.mxu1 %v6991_v19  ;;  %v7027_v19 = vld [vmem:[#allocation8 + $0x20] ss:$8 sps:$4 sm:$0xff]  }
 0x710   :  { %4102 = vmatpush1.bf16.msra.mxu0 %v6994_v48  ;;  %3939 = vmatprep.subr.bf16.mxu1 %v6999_v39  ;;  %v2094_v48 = vadd.f32 -1.4531521, %v2090_v63  ;;  %v2097_v39 = vadd.f32 -1.4531521, %v2093_v25  ;;  %v7054_v25 = vld [vmem:[#allocation8 + $0xb0] ss:$8 sps:$4 sm:$0xff]  }
 0x711   :  { %4103 = vmatprep.subr.bf16.mxu0 %v7002_v40  ;;  %v7030_v40 = vld [vmem:[#allocation8 + $0x30] ss:$8 sps:$4 sm:$0xff]  }
 0x712   :  { %v2101_v3 = vmul.f32 %v8378_v61, %v2097_v39 }
 0x713   :  { %3940 = vmatpush1.bf16.msra.mxu1 %v6997_v4  ;;  %v2098_v4 = vmul.f32 %v8376_v2, %v2094_v48  ;;  %v7057_v48 = vld [vmem:[#allocation8 + $0xc0] ss:$8 sps:$4 sm:$0xff]  }
 0x714   :  { %4104 = vmatpush1.bf16.msra.mxu0 %v7000_v58  ;;  %3941 = vmatprep.subr.bf16.mxu1 %v7005_v60  ;;  %v7038_v58 = vld [vmem:[#allocation8 + $0x54] ss:$8 sps:$4 sm:$0xff]  }
 0x715   :  { %4105 = vmatprep.subr.bf16.mxu0 %v7008_v1  ;;  %v2102_v60 = vadd.f32 1.4214138, %v2098_v4  ;;  %v2105_v1 = vadd.f32 1.4214138, %v2101_v3  ;;  %v7060_v3 = vld [vmem:[#allocation8 + $0xd0] ss:$8 sps:$4 sm:$0xff]  }
 0x717   :  { %3942 = vmatpush1.bf16.msra.mxu1 %v7003_v62  ;;  %v7036_v62 = vld [vmem:[#allocation8 + $0x50] ss:$8 sps:$4 sm:$0xff]   ;;  %v2106_v12 = vmul.f32 %v8376_v2, %v2102_v60 }
 0x718   :  { %4106 = vmatpush1.bf16.msra.mxu0 %v7006_v18  ;;  %3943 = vmatprep.subr.bf16.mxu1 %v7011_v9  ;;  %v2130_v18 = vmul.f32 %v2126_v21, %v8365_v28  ;;  %v2109_v9 = vmul.f32 %v8378_v61, %v2105_v1  ;;  %v7063_v1 = vld [vmem:[#allocation8 + $0xe0] ss:$8 sps:$4 sm:$0xff]  }
 0x719   :  { %4107 = vmatprep.subr.bf16.mxu0 %v7014_v51  ;;  %v7039_v51 = vld [vmem:[#allocation8 + $0x60] ss:$8 sps:$4 sm:$0xff]  }
 0x71a   :  { %v2134_v44 = vmul.f32 1.442695, %v2130_v18  ;;  %v7066_v18 = vld [vmem:[#allocation8 + $0xf0] ss:$8 sps:$4 sm:$0xff]  }
 0x71b   :  { %3944 = vmatpush1.bf16.msra.mxu1 %v7009_v13  ;;  %v2110_v13 = vadd.f32 -0.28449672, %v2106_v12  ;;  %v2062_v12 = vmul.f32 0.5, %v8158_v6  ;;  %v7077_v6 = vld [vmem:[#allocation8 + $0x124] ss:$8 sps:$4 sm:$0xff]  }
 0x71c   :  { %4108 = vmatpush1.bf16.msra.mxu0 %v7012_v24  ;;  %3945 = vmatprep.subr.bf16.mxu1 %v7017_v26  ;;  %v2113_v24 = vadd.f32 -0.28449672, %v2109_v9  ;;  %v2140_v26 = vmul.f32 1.442695, %v2133_v53  ;;  %7269 = vpow2.f32 %v2134_v44  ;;  %v7071_v53 = vld [vmem:[#allocation8 + $0x104] ss:$8 sps:$4 sm:$0xff]  }
 0x71d   :  { %4109 = vmatprep.subr.bf16.mxu0 %v7020_v38  ;;  %v7047_v38 = vld [vmem:[#allocation8 + $0x84] ss:$8 sps:$4 sm:$0xff]   ;;  %v2114_v30 = vmul.f32 %v8376_v2, %v2110_v13  ;;  %v7074_v13 = vld [vmem:[#allocation8 + $0x114] ss:$8 sps:$4 sm:$0xff]  }
 0x71e   :  { %v2117_v28 = vmul.f32 %v8378_v61, %v2113_v24  ;;  %7271 = vpow2.f32 %v2140_v26  ;;  %v7072_v26 = vld [vmem:[#allocation8 + $0x110] ss:$8 sps:$4 sm:$0xff]  }
 0x71f   :  { %3946 = vmatpush1.bf16.msra.mxu1 %v7015_v36  ;;  %v2118_v36 = vadd.f32 0.2548296, %v2114_v30 }
 0x720   :  { %4110 = vmatpush1.bf16.msra.mxu0 %v7018_v43  ;;  %4768 = vmatprep.subr.bf16.mxu1 %v7023_v10  ;;  %v2121_v43 = vadd.f32 0.2548296, %v2117_v28  ;;  %v7053_v10 = vld [vmem:[#allocation8 + $0xa4] ss:$8 sps:$4 sm:$0xff]   ;;  %v7078_v28 = vld [vmem:[#allocation8 + $0x130] ss:$8 sps:$4 sm:$0xff]  }
 0x721   :  { %v2122_v29 = vmul.f32 %v8376_v2, %v2118_v36  ;;  %v7059_v2 = vld [vmem:[#allocation8 + $0xc4] ss:$8 sps:$4 sm:$0xff]   ;;  %v7081_v36 = vld [vmem:[#allocation8 + $0x140] ss:$8 sps:$4 sm:$0xff]  }
 0x722   :  { %3948 = vmatmul.mubr.bf16.vlgmr.msra.gmra.mrb[24].mxu1 %v2232_v45  ;;  %v2125_v46 = vmul.f32 %v8378_v61, %v2121_v43  ;;  %v7086_v43 = vld [vmem:[#allocation8 + $0x154] ss:$8 sps:$4 sm:$0xff]  }
 0x723   :  { %4112 = vmatmul.mubr.bf16.vlgmr.msra.gmra.mrb[28].mxu0 %v2232_v45  ;;  %4769 = vmatpush1.bf16.msra.mxu1 %v7021_v57  ;;  %v7051_v57 = vld [vmem:[#allocation8 + $0xa0] ss:$8 sps:$4 sm:$0xff]  }
 0x724   :  { %4800 = vmatprep.mubr.bf16.mxu1 %v4369_v49  ;;  %4770 = vmatprep.subr.bf16.mxu1 %v7026_v50  ;;  %v8395_v50 = vmul.f32 0.70710677, %v8160_v7  ;;  %v7056_v49 = vld [vmem:[#allocation8 + $0xb4] ss:$8 sps:$4 sm:$0xff]  }
 0x726   :  { %v7270_v45 = vpop.eup %7269  ;;  %vm2152_vm3 = vcmp.ge.f32.partialorder %v8395_v50, 0.0 }
 0x727   :  { %4771 = vmatpush1.bf16.msra.mxu1 %v7024_v20 }
 0x728   :  { %4772 = vmatprep.subr.bf16.mxu1 %v7029_v42  ;;  %v7272_v20 = vpop.eup %7271  ;;  %v2142_v42 = vmul.f32 %v7270_v45, %v2122_v29  ;;  %v7084_v29 = vld [vmem:[#allocation8 + $0x150] ss:$8 sps:$4 sm:$0xff]  }
 0x729   :  { %v2145_v63 = vmul.f32 %v7272_v20, %v2125_v46  ;;  %v7089_v46 = vld [vmem:[#allocation8 + $0x164] ss:$8 sps:$4 sm:$0xff]   ;;  %v7092_v20 = vld [vmem:[#allocation8 + $0x174] ss:$8 sps:$4 sm:$0xff]  }
 0x72b   :  { %4773 = vmatpush1.bf16.msra.mxu1 %v7027_v19  ;;  %v8398_v19 = vand.u32 2147483647, %v8395_v50  ;;  %v2149_v61 = vsub.f32 1.0, %v2145_v63  ;;  %v7140_v50 = vld [vmem:[%s8851_s12 + $0x18] sm:$0xff]  }
 0x72c   :  { %4774 = vmatprep.subr.bf16.mxu1 %v7032_v47  ;;  %v2146_v47 = vsub.f32 1.0, %v2142_v42 }
 0x72d   :  { %v2076_v39 = vmul.f32 0.3275911, %v8398_v19  ;;  %v2157_v4 = vsub.f32 0.0, %v2149_v61 }
 0x72f   :  { %4775 = vmatpush1.bf16.msra.mxu1 %v7030_v40  ;;  %v7062_v40 = vld [vmem:[#allocation8 + $0xd4] ss:$8 sps:$4 sm:$0xff]   ;;  %v2161_v21 = vsel %vm2153_vm2, %v2149_v61, %v2157_v4  ;;  %v7093_v61 = vld [vmem:[#allocation8 + $0x180] ss:$8 sps:$4 sm:$0xff]  }
 0x730   :  { %4776 = vmatprep.subr.bf16.mxu1 %v7035_v55  ;;  %v2154_v55 = vsub.f32 0.0, %v2146_v47  ;;  %v7099_v4 = vld [vmem:[#allocation8 + $0x1a0] ss:$8 sps:$4 sm:$0xff]  }
 0x732   :  { %v2158_v60 = vsel %vm2150_vm1, %v2146_v47, %v2154_v55 }
 0x733   :  { %4777 = vmatpush1.bf16.msra.mxu1 %v7033_v34  ;;  %v2080_v34 = vadd.f32 1.0, %v2076_v39 }
 0x734   :  { %4778 = vmatprep.subr.bf16.mxu1 %v7038_v58  ;;  %v7065_v58 = vld [vmem:[#allocation8 + $0xe4] ss:$8 sps:$4 sm:$0xff]  }
 0x735   :  { %7273 = vrcp.f32 %v2080_v34  ;;  %v7104_v34 = vld [vmem:[#allocation8 + $0x1b4] ss:$8 sps:$4 sm:$0xff]  }
 0x737   :  { %4779 = vmatpush1.bf16.msra.mxu1 %v7036_v62  ;;  %v2162_v62 = vadd.f32 1.0, %v2158_v60  ;;  %v7102_v60 = vld [vmem:[#allocation8 + $0x1b0] ss:$8 sps:$4 sm:$0xff]  }
 0x738   :  { %4780 = vmatprep.subr.bf16.mxu1 %v7041_v15  ;;  %v2165_v15 = vadd.f32 1.0, %v2161_v21  ;;  %v7107_v21 = vld [vmem:[#allocation8 + $0x1c4] ss:$8 sps:$4 sm:$0xff]  }
 0x739   :  { %v2166_v9 = vmul.f32 %v2162_v62, %v2062_v12  ;;  %v7134_v62 = vld [vmem:[%s8851_s12] sm:$0xff]  }
 0x73a   :  { %v7105_v12 = vld [vmem:[#allocation8 + $0x1c0] ss:$8 sps:$4 sm:$0xff]  }
 0x73b   :  { %4781 = vmatpush1.bf16.msra.mxu1 %v7039_v51  ;;  %v2169_v51 = vmul.f32 %v2165_v15, %v2065_v22  ;;  %v7135_v15 = vld [vmem:[%s8851_s12 + $0x48] sm:$0xff]  }
 0x73c   :  { %4782 = vmatprep.subr.bf16.mxu1 %v7044_v0  ;;  %v4368_v0 = vpack.c.bf16 %v2166_v9, %v2166_v9  ;;  %v7136_v22 = vld [vmem:[%s8851_s12 + $0x8] sm:$0xff]  }
 0x73d   :  { %v4371_v44 = vpack.c.bf16 %v2169_v51, %v2169_v51  ;;  %v7108_v51 = vld [vmem:[#allocation8 + $0x1d0] ss:$8 sps:$4 sm:$0xff]  }
 0x73f   :  { %4783 = vmatpush1.bf16.msra.mxu1 %v7042_v32  ;;  %v7274_v24 = vpop.eup %7273 }
 0x740   :  { %4784 = vmatprep.subr.bf16.mxu1 %v7047_v38  ;;  %v2092_v32 = vmul.f32 1.0614054, %v7274_v24  ;;  %v7080_v38 = vld [vmem:[#allocation8 + $0x134] ss:$8 sps:$4 sm:$0xff]  }
 0x742   :  { %v2096_v30 = vadd.f32 -1.4531521, %v2092_v32  ;;  %v7141_v32 = vld [vmem:[%s8851_s12 + $0x60] sm:$0xff]  }
 0x743   :  { %4785 = vmatpush1.bf16.msra.mxu1 %v7045_v17  ;;  %v7083_v17 = vld [vmem:[#allocation8 + $0x144] ss:$8 sps:$4 sm:$0xff]  }
 0x744   :  { %4786 = vmatprep.subr.bf16.mxu1 %v7050_v11  ;;  %v2100_v11 = vmul.f32 %v7274_v24, %v2096_v30 }
 0x747   :  { %4787 = vmatpush1.bf16.msra.mxu1 %v7048_v52  ;;  %v2104_v52 = vadd.f32 1.4214138, %v2100_v11  ;;  %v2225_v11 = vmax.f32 %v8189_v16, 0.0  ;;  %v7144_v16 = vld [vmem:[%s8851_s12 + $0x28] sm:$0xff]  }
 0x748   :  { %4788 = vmatprep.subr.bf16.mxu1 %v7053_v10  ;;  %v2128_v10 = vsub.f32 0.0, %v8398_v19 }
 0x74a   :  { %v2132_v45 = vmul.f32 %v2128_v10, %v8398_v19  ;;  %v7101_v19 = vld [vmem:[#allocation8 + $0x1a4] ss:$8 sps:$4 sm:$0xff]   ;;  %v5676_v10 = vpack.c.bf16 %v2225_v11, %v2225_v11 }
 0x74b   :  { %4789 = vmatpush1.bf16.msra.mxu1 %v7051_v57  ;;  %v2108_v57 = vmul.f32 %v7274_v24, %v2104_v52  ;;  %v7119_v52 = vld [vmem:[%s8861_s22 + $0x48] sm:$0xff]  }
 0x74c   :  { %4790 = vmatprep.subr.bf16.mxu1 %v7056_v49  ;;  %v7087_v49 = vld [vmem:[#allocation8 + $0x160] ss:$8 sps:$4 sm:$0xff]   ;;  %v2138_v63 = vmul.f32 1.442695, %v2132_v45 }
 0x74d   :  { %v2112_v42 = vadd.f32 -0.28449672, %v2108_v57  ;;  %v7121_v57 = vld [vmem:[%s8861_s22 + $0x50] sm:$0xff]  }
 0x74e   :  { %7275 = vpow2.f32 %v2138_v63  ;;  %v7146_v45 = vld [vmem:[%s8851_s12 + $0x30] sm:$0xff]   ;;  %v7148_v63 = vld [vmem:[%s8851_s12 + $0x38] sm:$0xff]  }
 0x74f   :  { %4791 = vmatpush1.bf16.msra.mxu1 %v7054_v25  ;;  %v7090_v25 = vld [vmem:[#allocation8 + $0x170] ss:$8 sps:$4 sm:$0xff]   ;;  %v2116_v47 = vmul.f32 %v7274_v24, %v2112_v42 }
 0x750   :  { %4792 = vmatprep.subr.bf16.mxu1 %v7059_v2  ;;  %v7095_v2 = vld [vmem:[#allocation8 + $0x184] ss:$8 sps:$4 sm:$0xff]   ;;  %v7123_v42 = vld [vmem:[%s8861_s22 + $0x58] sm:$0xff]  }
 0x751   :  { %v2120_v39 = vadd.f32 0.2548296, %v2116_v47  ;;  %v7126_v47 = vld [vmem:[%s8861_s22 + $0x20] sm:$0xff]  }
 0x753   :  { %4793 = vmatpush1.bf16.msra.mxu1 %v7057_v48  ;;  %v7098_v48 = vld [vmem:[#allocation8 + $0x194] ss:$8 sps:$4 sm:$0xff]   ;;  %v2124_v55 = vmul.f32 %v7274_v24, %v2120_v39  ;;  %v7111_v24 = vld [vmem:[#allocation8 + $0x1e0] ss:$8 sps:$4 sm:$0xff]  }
 0x754   :  { %4794 = vmatprep.subr.bf16.mxu1 %v7062_v40  ;;  %v7096_v40 = vld [vmem:[#allocation8 + $0x190] ss:$8 sps:$4 sm:$0xff]  }
 0x755   :  { %v7129_v39 = vld [vmem:[%s8861_s22 + $0x70] sm:$0xff]  }
 0x757   :  { %4795 = vmatpush1.bf16.msra.mxu1 %v7060_v3 }
 0x758   :  { %4796 = vmatprep.subr.bf16.mxu1 %v7065_v58  ;;  %v7276_v3 = vpop.eup %7275 }
 0x759   :  { %v2144_v58 = vmul.f32 %v7276_v3, %v2124_v55  ;;  %v7131_v55 = vld [vmem:[%s8861_s22 + $0x78] sm:$0xff]   ;;  %v2224_v3 = vmax.f32 %v8181_v14, 0.0 }
 0x75b   :  { %4797 = vmatpush1.bf16.msra.mxu1 %v7063_v1  ;;  %v2148_v1 = vsub.f32 1.0, %v2144_v58  ;;  %v4120_v58 = vld [vmem:[%s8850_s11] sm:$0xff] }
 0x75c   :  { %4798 = vmatprep.subr.bf16.mxu1 %v7068_v56  ;;  %v7133_v56 = vld [vmem:[%s8851_s12 + $0x40] sm:$0xff]  }
 0x75d   :  { %6421 = vmatprep.subr.bf16.mxu0 %v7133_v56  ;;  %v2156_v9 = vsub.f32 0.0, %v2148_v1 }
 0x75e   :  { %6422 = vmatpush3.bf16.msra.mxu0 %v7134_v62 }
 0x75f   :  { %4799 = vmatpush1.bf16.msra.mxu1 %v7066_v18  ;;  %v7110_v18 = vld [vmem:[#allocation8 + $0x1d4] ss:$8 sps:$4 sm:$0xff]   ;;  %6423 = vmatprep.subr.bf16.mxu0 %v7135_v15 }
 0x760   :  { %4809 = vmatprep.subr.bf16.mxu1 %v7071_v53  ;;  %v7137_v53 = vld [vmem:[%s8851_s12 + $0x50] sm:$0xff]  }
 0x762   :  { %4801 = vmatmul.mubr.bf16.vlgmr.msra.gmra.mrb[28].mxu1 %v4368_v0  ;;  %6424 = vmatpush3.bf16.msra.mxu0 %v7136_v22  ;;  %v7138_v0 = vld [vmem:[%s8851_s12 + $0x10] sm:$0xff]  }
 0x763   :  { %4810 = vmatpush1.bf16.msra.mxu1 %v7069_v59  ;;  %4841 = vmatprep.mubr.bf16.mxu1 %v4371_v44  ;;  %v7113_v59 = vld [vmem:[#allocation8 + $0x1e4] ss:$8 sps:$4 sm:$0xff]   ;;  %v7139_v44 = vld [vmem:[%s8851_s12 + $0x58] sm:$0xff]  }
 0x764   :  { %4811 = vmatprep.subr.bf16.mxu1 %v7074_v13  ;;  %v2160_v13 = vsel %vm2152_vm3, %v2148_v1, %v2156_v9  ;;  %6425 = vmatprep.subr.bf16.mxu0 %v7137_v53  ;;  %v4127_v9 = vrot.slane %v4120_v58, %v7975_v31 }
 0x766   :  { %6426 = vmatpush3.bf16.msra.mxu0 %v7138_v0 }
 0x767   :  { %4812 = vmatpush1.bf16.msra.mxu1 %v7072_v26  ;;  %v7116_v26 = vld [vmem:[#allocation8 + $0x1f4] ss:$8 sps:$4 sm:$0xff]   ;;  %6427 = vmatprep.subr.bf16.mxu0 %v7139_v44 }
 0x768   :  { %4813 = vmatprep.subr.bf16.mxu1 %v7077_v6  ;;  %v2164_v6 = vadd.f32 1.0, %v2160_v13 }
 0x76a   :  { %6428 = vmatpush3.bf16.msra.mxu0 %v7140_v50  ;;  %v4147_v50 = vrot.slane %v4127_v9, %v7975_v31 }
 0x76b   :  { %4814 = vmatpush1.bf16.msra.mxu1 %v7075_v41  ;;  %v2064_v41 = vmul.f32 0.5, %v8160_v7  ;;  %6429 = vmatprep.subr.bf16.mxu0 %v7141_v32  ;;  %v7143_v7 = vld [vmem:[%s8851_s12 + $0x68] sm:$0xff]   ;;  %v4223_v32 = vrot.slane %v4120_v58, %v7649_v27 }
 0x76c   :  { %4815 = vmatprep.subr.bf16.mxu1 %v7080_v38  ;;  %v7114_v38 = vld [vmem:[#allocation8 + $0x1f0] ss:$8 sps:$4 sm:$0xff]  }
 0x76d   :  { %v2168_v30 = vmul.f32 %v2164_v6, %v2064_v41 }
 0x76f   :  { %4816 = vmatpush1.bf16.msra.mxu1 %v7078_v28  ;;  %v7117_v28 = vld [vmem:[%s8861_s22 + $0x40] sm:$0xff]  }
 0x770   :  { %4817 = vmatprep.subr.bf16.mxu1 %v7083_v17  ;;  %v7142_v17 = vld [vmem:[%s8851_s12 + $0x20] sm:$0xff]  }
 0x771   :  { %6430 = vmatpush3.bf16.msra.mxu0 %v7142_v17 }
 0x772   :  { %6431 = vmatprep.subr.bf16.mxu0 %v7143_v7  ;;  %v4227_v7 = vrot.slane %v4120_v58, %v7995_v35 }
 0x773   :  { %4818 = vmatpush1.bf16.msra.mxu1 %v7081_v36  ;;  %v7118_v36 = vld [vmem:[%s8861_s22] sm:$0xff]  }
 0x774   :  { %4819 = vmatprep.subr.bf16.mxu1 %v7086_v43  ;;  %v4370_v43 = vpack.c.bf16 %v2168_v30, %v2168_v30 }
 0x775   :  { %6432 = vmatpush3.bf16.msra.mxu0 %v7144_v16 }
 0x777   :  { %4820 = vmatpush1.bf16.msra.mxu1 %v7084_v29  ;;  %v7145_v29 = vld [vmem:[%s8851_s12 + $0x70] sm:$0xff]  }
 0x778   :  { %4821 = vmatprep.subr.bf16.mxu1 %v7089_v46  ;;  %v7120_v46 = vld [vmem:[%s8861_s22 + $0x8] sm:$0xff]   ;;  %6433 = vmatprep.subr.bf16.mxu0 %v7145_v29 }
 0x779   :  { %6434 = vmatpush3.bf16.msra.mxu0 %v7146_v45 }
 0x77b   :  { %4822 = vmatpush1.bf16.msra.mxu1 %v7087_v49  ;;  %v7147_v49 = vld [vmem:[%s8851_s12 + $0x78] sm:$0xff]  }
 0x77c   :  { %4823 = vmatprep.subr.bf16.mxu1 %v7092_v20  ;;  %v7122_v20 = vld [vmem:[%s8861_s22 + $0x10] sm:$0xff]   ;;  %6435 = vmatprep.subr.bf16.mxu0 %v7147_v49 }
 0x77d   :  { %6436 = vmatpush3.bf16.msra.mxu0 %v7148_v63  ;;  %v4243_v63 = vrot.slane %v4223_v32, %v7649_v27 }
 0x77f   :  { %4824 = vmatpush1.bf16.msra.mxu1 %v7090_v25  ;;  %v7124_v25 = vld [vmem:[%s8861_s22 + $0x18] sm:$0xff]  }
 0x780   :  { %4825 = vmatprep.subr.bf16.mxu1 %v7095_v2  ;;  %v7125_v2 = vld [vmem:[%s8861_s22 + $0x60] sm:$0xff]  }
 0x783   :  { %4826 = vmatpush1.bf16.msra.mxu1 %v7093_v61  ;;  %v7127_v61 = vld [vmem:[%s8861_s22 + $0x68] sm:$0xff]  }
 0x784   :  { %4827 = vmatprep.subr.bf16.mxu1 %v7098_v48  ;;  %v7128_v48 = vld [vmem:[%s8861_s22 + $0x28] sm:$0xff]  }
 0x787   :  { %4828 = vmatpush1.bf16.msra.mxu1 %v7096_v40  ;;  %v7149_v40 = vld [vmem:[%s8851_s12 + $0xc0] sm:$0xff]  }
 0x788   :  { %4829 = vmatprep.subr.bf16.mxu1 %v7101_v19  ;;  %6443 = vmatprep.subr.bf16.mxu0 %v7149_v40  ;;  %v7130_v19 = vld [vmem:[%s8861_s22 + $0x30] sm:$0xff]  }
 0x78b   :  { %4830 = vmatpush1.bf16.msra.mxu1 %v7099_v4  ;;  %v7132_v4 = vld [vmem:[%s8861_s22 + $0x38] sm:$0xff]  }
 0x78c   :  { %4831 = vmatprep.subr.bf16.mxu1 %v7104_v34  ;;  %v5675_v34 = vpack.c.bf16 %v2224_v3, %v2224_v3 }
 0x78f   :  { %4832 = vmatpush1.bf16.msra.mxu1 %v7102_v60  ;;  %v4121_v60 = vld [vmem:[%s8850_s11 + $0x8] sm:$0xff] }
 0x790   :  { %4833 = vmatprep.subr.bf16.mxu1 %v7107_v21  ;;  %v4164_v21 = vadd.f32 1e-05, %v4120_v58  ;;  %v4165_v1 = vadd.f32 1e-05, %v4121_v60  ;;  %v4135_v53 = vrot.slane %v4121_v60, %v7975_v31  ;;  %v4139_v13 = vrot.slane %v4121_v60, %v7978_v33 }
 0x791   :  { %v4231_v17 = vrot.slane %v4121_v60, %v7649_v27 }
 0x792   :  { %7277 = vrsqrt.f32 %v4164_v21 }
 0x793   :  { %4834 = vmatpush1.bf16.msra.mxu1 %v7105_v12  ;;  %7279 = vrsqrt.f32 %v4165_v1 }
 0x794   :  { %4835 = vmatprep.subr.bf16.mxu1 %v7110_v18  ;;  %v2490_v18 = vld [vmem:[%s8849_s10] sm:$0xf] }
 0x795   :  { %v2503_v44 = vrot.slane %v2490_v18, %v7975_v31  ;;  %v2507_v41 = vrot.slane %v2490_v18, %v8025_v8  ;;  %v4235_v8 = vrot.slane %v4121_v60, %v7995_v35 }
 0x797   :  { %4836 = vmatpush1.bf16.msra.mxu1 %v7108_v51  ;;  %v4131_v51 = vrot.slane %v4120_v58, %v7978_v33 }
 0x798   :  { %4837 = vmatprep.subr.bf16.mxu1 %v7113_v59  ;;  %v2495_v59 = vrot.slane %v2490_v18, %v7645_v23 }
 0x799   :  { %v4151_v11 = vrot.slane %v4131_v51, %v7975_v31 }
 0x79b   :  { %4838 = vmatpush1.bf16.msra.mxu1 %v7111_v24 }
 0x79c   :  { %4839 = vmatprep.subr.bf16.mxu1 %v7116_v26  ;;  %v7278_v56 = vpop.eup %7277  ;;  %v2499_v26 = vrot.slane %v2490_v18, %v7649_v27 }
 0x79d   :  { %v7280_v62 = vpop.eup %7279  ;;  %v6251_v15 = vrot.slane %v7278_v56, 11 }
 0x79e   :  { %v6252_v14 = vrot.slane %v7280_v62, 11 }
 0x79f   :  { %4840 = vmatpush1.bf16.msra.mxu1 %v7114_v38  ;;  %v4176_v12 = vmul.f32 %v6251_v15, %v4120_v58 }
 0x7a0   :  { %6509 = vmatprep.subr.bf16.mxu1 %v7117_v28  ;;  %v4177_v22 = vmul.f32 %v6252_v14, %v4121_v60  ;;  %v4155_v28 = vrot.slane %v4135_v53, %v7975_v31 }
 0x7a1   :  { %v4183_v0 = vrot.slane %v4176_v12, %v7645_v23  ;;  %v4187_v6 = vrot.slane %v4176_v12, %v7989_v37 }
 0x7a2   :  { %4842 = vmatmul.mubr.bf16.vlgmr.msra.gmra.mrb[28].mxu1 %v4370_v43  ;;  %v4191_v24 = vrot.slane %v4177_v22, %v7645_v23  ;;  %v4195_v38 = vrot.slane %v4177_v22, %v7989_v37 }
 0x7a3   :  { %6510 = vmatpush3.bf16.msra.mxu1 %v7118_v36  ;;  %5844 = vmatprep.mubr.bf16.mxu1 %v5676_v10  ;;  %v4203_v43 = vrot.slane %v4183_v0, %v7645_v23  ;;  %v4159_v10 = vrot.slane %v4139_v13, %v7975_v31  ;;  %v4207_v45 = vrot.slane %v4187_v6, %v7645_v23 }
 0x7a4   :  { %6511 = vmatprep.subr.bf16.mxu1 %v7119_v52 }
 0x7a7   :  { %6512 = vmatpush3.bf16.msra.mxu1 %v7120_v46  ;;  %v4211_v46 = vrot.slane %v4191_v24, %v7645_v23 }
 0x7a8   :  { %6513 = vmatprep.subr.bf16.mxu1 %v7121_v57 }
 0x7ab   :  { %6514 = vmatpush3.bf16.msra.mxu1 %v7122_v20 }
 0x7ac   :  { %6515 = vmatprep.subr.bf16.mxu1 %v7123_v42 }
 0x7af   :  { %6516 = vmatpush3.bf16.msra.mxu1 %v7124_v25 }
 0x7b0   :  { %6517 = vmatprep.subr.bf16.mxu1 %v7125_v2  ;;  %v4215_v2 = vrot.slane %v4195_v38, %v7645_v23 }
 0x7b3   :  { %6518 = vmatpush3.bf16.msra.mxu1 %v7126_v47 }
 0x7b4   :  { %6519 = vmatprep.subr.bf16.mxu1 %v7127_v61 }
 0x7b7   :  { %6520 = vmatpush3.bf16.msra.mxu1 %v7128_v48 }
 0x7b8   :  { %6521 = vmatprep.subr.bf16.mxu1 %v7129_v39  ;;  %v4251_v39 = vrot.slane %v4231_v17, %v7649_v27 }
 0x7bb   :  { %6522 = vmatpush3.bf16.msra.mxu1 %v7130_v19  ;;  %v4247_v19 = vrot.slane %v4227_v7, %v7649_v27 }
 0x7bc   :  { %6523 = vmatprep.subr.bf16.mxu1 %v7131_v55 }
 0x7bf   :  { %6524 = vmatpush3.bf16.msra.mxu1 %v7132_v4 }
 0x7c2   :  { %5845 = vmatmul.mubr.bf16.vlgmr.msra.gmra.mrb[32].mxu1 %v5675_v34  ;;  %v4255_v34 = vrot.slane %v4235_v8, %v7649_v27 }
 0x7f5   :  { %v3949_v30 = vpop.f32.mrb[24].mxu1 }
 0x7f6   :  { %v6577_v36 = vadd.f32 %v3949_v30, %v2495_v59  ;;  %v4113_v52 = vpop.f32.mrb[28].mxu0  ;;  %v3951_v16 = vpop.f32.mrb[25].mxu1 }
 0x7f7   :  { %v6579_v29 = vadd.f32 %v4113_v52, %v2503_v44  ;;  %v6578_v57 = vadd.f32 %v3951_v16, %v2499_v26  ;;  %v4115_v49 = vpop.f32.mrb[29].mxu0  ;;  %v3953_v20 = vpop.f32.mrb[26].mxu1 }
 0x7f8   :  { %v4160_v42 = vsub.f32 %v6577_v36, %v4147_v50  ;;  %v6580_v25 = vadd.f32 %v4115_v49, %v2507_v41  ;;  %v4117_v47 = vpop.f32.mrb[30].mxu0  ;;  %v3954_v61 = vpop.f32.mrb[27].mxu1 }
 0x7f9   :  { %v4162_v48 = vsub.f32 %v6579_v29, %v4155_v28  ;;  %v4161_v40 = vsub.f32 %v6578_v57, %v4151_v11  ;;  %v4118_v55 = vpop.f32.mrb[31].mxu0 }
 0x7fa   :  { %v4216_v4 = vmul.f32 %v4203_v43, %v4160_v42  ;;  %v4163_v3 = vsub.f32 %v6580_v25, %v4159_v10 }
 0x7fb   :  { %v4218_v58 = vmul.f32 %v4211_v46, %v4162_v48  ;;  %v4217_v60 = vmul.f32 %v4207_v45, %v4161_v40 }
 0x7fc   :  { %v8547_v21 = vadd.f32 %v4243_v63, %v4216_v4  ;;  %v4219_v1 = vmul.f32 %v4215_v2, %v4163_v3 }
 0x7fd   :  { %v8549_v56 = vadd.f32 %v4251_v39, %v4218_v58  ;;  %v8551_v62 = vadd.f32 %v4247_v19, %v4217_v60 }
 0x7fe   :  { %v8554_v15 = vmul.f32 0.70710677, %v8547_v21  ;;  %v8556_v14 = vadd.f32 %v4255_v34, %v4219_v1 }
 0x7ff   :  { %v8559_v12 = vmul.f32 0.70710677, %v8549_v56  ;;  %v8562_v18 = vmul.f32 0.70710677, %v8551_v62 }
 0x800   :  { %v4268_v22 = vand.u32 2147483647, %v8554_v15  ;;  %v8566_v9 = vmul.f32 0.70710677, %v8556_v14  ;;  %vm4348_vm4 = vcmp.ge.f32.partialorder %v8554_v15, 0.0  ;;  %v4261_v15 = vmul.f32 0.5, %v8551_v62 }
 0x801   :  { %v8569_v53 = vand.u32 2147483647, %v8559_v12  ;;  %v4269_v51 = vand.u32 2147483647, %v8562_v18  ;;  %vm4349_vm5 = vcmp.ge.f32.partialorder %v8562_v18, 0.0  ;;  %v7151_v62 = vld [vmem:[%s8851_s12 + $0xc8] sm:$0xff]  }
 0x802   :  { %v4272_v59 = vmul.f32 0.3275911, %v4268_v22  ;;  %v4271_v0 = vand.u32 2147483647, %v8566_v9  ;;  %v4324_v41 = vsub.f32 0.0, %v4268_v22  ;;  %vm4351_vm6 = vcmp.ge.f32.partialorder %v8566_v9, 0.0 }
 0x803   :  { %v4274_v13 = vmul.f32 0.3275911, %v8569_v53  ;;  %v4273_v44 = vmul.f32 0.3275911, %v4269_v51  ;;  %v4325_v28 = vsub.f32 0.0, %v4269_v51  ;;  %vm4350_vm7 = vcmp.ge.f32.partialorder %v8559_v12, 0.0 }
 0x804   :  { %v4276_v24 = vadd.f32 1.0, %v4272_v59  ;;  %v4275_v26 = vmul.f32 0.3275911, %v4271_v0  ;;  %v4328_v30 = vmul.f32 %v4324_v41, %v4268_v22  ;;  %v4327_v11 = vsub.f32 0.0, %v4271_v0  ;;  %v7164_v12 = vld [vmem:[%s8851_s12 + $0xb8] sm:$0xff]  }
 0x805   :  { %v4277_v6 = vadd.f32 1.0, %v4273_v44  ;;  %v4278_v50 = vadd.f32 1.0, %v4274_v13  ;;  %v4329_v52 = vmul.f32 %v4325_v28, %v4269_v51 }
 0x806   :  { %7281 = vrcp.f32 %v4276_v24  ;;  %v4279_v32 = vadd.f32 1.0, %v4275_v26  ;;  %v4332_v43 = vmul.f32 1.442695, %v4328_v30  ;;  %v4331_v46 = vmul.f32 %v4327_v11, %v4271_v0 }
 0x807   :  { %7283 = vrcp.f32 %v4277_v6  ;;  %v4334_v20 = vmul.f32 1.442695, %v4329_v52  ;;  %v4326_v26 = vsub.f32 0.0, %v8569_v53 }
 0x808   :  { %7285 = vrcp.f32 %v4278_v50  ;;  %v4338_v47 = vmul.f32 1.442695, %v4331_v46 }
 0x809   :  { %7287 = vrcp.f32 %v4279_v32 }
 0x80a   :  { %7289 = vpow2.f32 %v4332_v43 }
 0x80b   :  { %7291 = vpow2.f32 %v4334_v20 }
 0x80c   :  { %7293 = vpow2.f32 %v4338_v47 }
 0x810   :  { %v7282_v38 = vpop.eup %7281 }
 0x811   :  { %v4288_v17 = vmul.f32 1.0614054, %v7282_v38  ;;  %v7284_v36 = vpop.eup %7283 }
 0x812   :  { %v8574_v16 = vpop.eup %7285  ;;  %v4289_v10 = vmul.f32 1.0614054, %v7284_v36 }
 0x813   :  { %v4292_v7 = vadd.f32 -1.4531521, %v4288_v17  ;;  %v7288_v29 = vpop.eup %7287  ;;  %v4290_v42 = vmul.f32 1.0614054, %v8574_v16 }
 0x814   :  { %v4293_v57 = vadd.f32 -1.4531521, %v4289_v10  ;;  %v4291_v49 = vmul.f32 1.0614054, %v7288_v29  ;;  %v7290_v59 = vpop.eup %7289 }
 0x815   :  { %v4296_v8 = vmul.f32 %v7282_v38, %v4292_v7  ;;  %v4294_v40 = vadd.f32 -1.4531521, %v4290_v42  ;;  %v7292_v41 = vpop.eup %7291  ;;  %v4330_v7 = vmul.f32 %v4326_v26, %v8569_v53  ;;  %v7163_v26 = vld [vmem:[%s8851_s12 + $0xf8] sm:$0xff]  }
 0x816   :  { %v4297_v63 = vmul.f32 %v7284_v36, %v4293_v57  ;;  %v4295_v2 = vadd.f32 -1.4531521, %v4291_v49  ;;  %v7294_v11 = vpop.eup %7293 }
 0x817   :  { %v4300_v45 = vadd.f32 1.4214138, %v4296_v8  ;;  %v4298_v60 = vmul.f32 %v8574_v16, %v4294_v40  ;;  %v4336_v49 = vmul.f32 1.442695, %v4330_v7  ;;  %v8657_v7 = vmul.f32 0.70710677, %v8186_v5 }
 0x818   :  { %v4301_v61 = vadd.f32 1.4214138, %v4297_v63  ;;  %v4299_v39 = vmul.f32 %v7288_v29, %v4295_v2  ;;  %v4263_v2 = vmul.f32 0.5, %v8556_v14  ;;  %v7152_v14 = vld [vmem:[%s8851_s12 + $0x88] sm:$0xff]  }
 0x819   :  { %v4304_v25 = vmul.f32 %v7282_v38, %v4300_v45  ;;  %v4302_v24 = vadd.f32 1.4214138, %v4298_v60  ;;  %v4260_v45 = vmul.f32 0.5, %v8547_v21  ;;  %7295 = vpow2.f32 %v4336_v49  ;;  %v7150_v21 = vld [vmem:[%s8851_s12 + $0x80] sm:$0xff]   ;;  %v7156_v60 = vld [vmem:[%s8851_s12 + $0x98] sm:$0xff]   ;;  %v7175_v49 = vld [vmem:[%s8857_s18 + $0x68] sm:$0xff]  }
 0x81a   :  { %v4305_v19 = vmul.f32 %v7284_v36, %v4301_v61  ;;  %v4303_v4 = vadd.f32 1.4214138, %v4299_v39  ;;  %vm2215_vm8 = vcmp.ge.f32.partialorder %v8657_v7, 0.0 }
 0x81b   :  { %v4308_v48 = vadd.f32 -0.28449672, %v4304_v25 }
 0x81c   :  { %v4309_v3 = vadd.f32 -0.28449672, %v4305_v19  ;;  %v4307_v58 = vmul.f32 %v7288_v29, %v4303_v4  ;;  %v7153_v19 = vld [vmem:[%s8851_s12 + $0xd0] sm:$0xff]  }
 0x81d   :  { %v4312_v55 = vmul.f32 %v7282_v38, %v4308_v48  ;;  %v7154_v4 = vld [vmem:[%s8851_s12 + $0x90] sm:$0xff]  }
 0x81e   :  { %v4313_v1 = vmul.f32 %v7284_v36, %v4309_v3  ;;  %v4311_v51 = vadd.f32 -0.28449672, %v4307_v58 }
 0x81f   :  { %v4316_v34 = vadd.f32 0.2548296, %v4312_v55 }
 0x820   :  { %v4317_v0 = vadd.f32 0.2548296, %v4313_v1  ;;  %v4315_v44 = vmul.f32 %v7288_v29, %v4311_v51  ;;  %v7159_v51 = vld [vmem:[%s8851_s12 + $0xe8] sm:$0xff]  }
 0x821   :  { %v4320_v22 = vmul.f32 %v7282_v38, %v4316_v34  ;;  %v4306_v38 = vmul.f32 %v8574_v16, %v4302_v24  ;;  %v7155_v34 = vld [vmem:[%s8851_s12 + $0xd8] sm:$0xff]   ;;  %v7162_v24 = vld [vmem:[%s8851_s12 + $0xb0] sm:$0xff]  }
 0x822   :  { %v4321_v6 = vmul.f32 %v7284_v36, %v4317_v0  ;;  %v4319_v32 = vadd.f32 0.2548296, %v4315_v44  ;;  %v7160_v0 = vld [vmem:[%s8851_s12 + $0xa8] sm:$0xff]  }
 0x823   :  { %v4340_v13 = vmul.f32 %v7290_v59, %v4320_v22  ;;  %v4310_v36 = vadd.f32 -0.28449672, %v4306_v38  ;;  %v7296_v3 = vpop.eup %7295  ;;  %v7158_v22 = vld [vmem:[%s8851_s12 + $0xa0] sm:$0xff]   ;;  %v7169_v38 = vld [vmem:[%s8857_s18 + $0x50] sm:$0xff]  }
 0x824   :  { %v4341_v30 = vmul.f32 %v7292_v41, %v4321_v6  ;;  %v4323_v17 = vmul.f32 %v7288_v29, %v4319_v32  ;;  %v7165_v41 = vld [vmem:[%s8857_s18 + $0x40] sm:$0xff]  }
 0x825   :  { %v4344_v50 = vsub.f32 1.0, %v4340_v13  ;;  %v4314_v61 = vmul.f32 %v8574_v16, %v4310_v36  ;;  %v7161_v13 = vld [vmem:[%s8851_s12 + $0xf0] sm:$0xff]  }
 0x826   :  { %v4345_v43 = vsub.f32 1.0, %v4341_v30  ;;  %v4343_v10 = vmul.f32 %v7294_v11, %v4323_v17  ;;  %v7166_v30 = vld [vmem:[%s8857_s18] sm:$0xff]   ;;  %v7168_v11 = vld [vmem:[%s8857_s18 + $0x8] sm:$0xff]  }
 0x827   :  { %v4352_v28 = vsub.f32 0.0, %v4344_v50  ;;  %v4318_v40 = vadd.f32 0.2548296, %v4314_v61  ;;  %v8648_v17 = vld [vmem:[%s8856_s17] sm:$0xff] }
 0x828   :  { %v4353_v8 = vsub.f32 0.0, %v4345_v43  ;;  %v4347_v57 = vsub.f32 1.0, %v4343_v10  ;;  %v7171_v10 = vld [vmem:[%s8857_s18 + $0x58] sm:$0xff]   ;;  %v4436_v61 = vld [vmem:[%s8855_s16] sm:$0x3] }
 0x829   :  { %v4356_v52 = vsel %vm4348_vm4, %v4344_v50, %v4352_v28  ;;  %v4322_v55 = vmul.f32 %v8574_v16, %v4318_v40  ;;  %v7157_v16 = vld [vmem:[%s8851_s12 + $0xe0] sm:$0xff]   ;;  %v4262_v50 = vmul.f32 0.5, %v8549_v56  ;;  %v7167_v56 = vld [vmem:[%s8857_s18 + $0x48] sm:$0xff]   ;;  %v4445_v40 = vrot.slane %v4436_v61, %v7649_v27 }
 0x82a   :  { %v4360_v46 = vadd.f32 1.0, %v4356_v52  ;;  %v4357_v29 = vsel %vm4349_vm5, %v4345_v43, %v4353_v8  ;;  %v4355_v20 = vsub.f32 0.0, %v4347_v57  ;;  %v4872_v43 = vadd.f32 1e-05, %v8648_v17  ;;  %v7170_v52 = vld [vmem:[%s8857_s18 + $0x10] sm:$0xff]  }
 0x82b   :  { %v4361_v42 = vadd.f32 1.0, %v4357_v29  ;;  %v4342_v58 = vmul.f32 %v7296_v3, %v4322_v55  ;;  %v8667_v8 = vand.u32 2147483647, %v8657_v7  ;;  %v4903_v55 = vrot.slane %v8648_v17, %v7649_v27 }
 0x82c   :  { %v4364_v53 = vmul.f32 %v4360_v46, %v4260_v45  ;;  %v4359_v63 = vsel %vm4351_vm6, %v4347_v57, %v4355_v20  ;;  %7297 = vrsqrt.f32 %v4872_v43  ;;  %v7172_v46 = vld [vmem:[%s8857_s18 + $0x18] sm:$0xff]   ;;  %v7173_v57 = vld [vmem:[%s8857_s18 + $0x60] sm:$0xff]   ;;  %v7176_v20 = vld [vmem:[%s8857_s18 + $0x28] sm:$0xff]   ;;  %v4907_v3 = vrot.slane %v8648_v17, %v7995_v35 }
 0x82d   :  { %v4365_v25 = vmul.f32 %v4361_v42, %v4261_v15  ;;  %v4363_v47 = vadd.f32 1.0, %v4359_v63  ;;  %v4346_v1 = vsub.f32 1.0, %v4342_v58  ;;  %v2177_v36 = vmul.f32 0.3275911, %v8667_v8  ;;  %v7174_v45 = vld [vmem:[%s8857_s18 + $0x20] sm:$0xff]   ;;  %v7177_v42 = vld [vmem:[%s8857_s18 + $0x70] sm:$0xff]  }
 0x82e   :  { %v4974_v39 = vpack.c.bf16 %v4364_v53, %v4364_v53  ;;  %v7178_v63 = vld [vmem:[%s8857_s18 + $0x30] sm:$0xff]   ;;  %v4917_v35 = vrot.slane %v4907_v3, %v7649_v27  ;;  %v2171_v7 = vmul.f32 0.5, %v8186_v5 }
 0x82f   :  { %v4975_v18 = vpack.c.bf16 %v4365_v25, %v4365_v25  ;;  %v4367_v48 = vmul.f32 %v4363_v47, %v4263_v2  ;;  %v4354_v59 = vsub.f32 0.0, %v4346_v1  ;;  %v2179_v29 = vadd.f32 1.0, %v2177_v36  ;;  %v7179_v25 = vld [vmem:[%s8857_s18 + $0x78] sm:$0xff]  }
 0x830   :  { %v7180_v47 = vld [vmem:[%s8857_s18 + $0x38] sm:$0xff]  }
 0x831   :  { %5273 = vmatprep.mubr.bf16.mxu0 %v4975_v18  ;;  %v4977_v9 = vpack.c.bf16 %v4367_v48, %v4367_v48  ;;  %v4358_v44 = vsel %vm4350_vm7, %v4346_v1, %v4354_v59  ;;  %7299 = vrcp.f32 %v2179_v29  ;;  %v7181_v18 = vld [vmem:[%s8859_s20 + $0x40] sm:$0xff]   ;;  %v4859_v48 = vrot.slane %v8648_v17, %v7978_v33 }
 0x832   :  { %5274 = vmatmul.mubr.bf16.vlgmr.msra.gmra.mrb[32].mxu0 %v4974_v39  ;;  %v4362_v6 = vadd.f32 1.0, %v4358_v44  ;;  %v4441_v39 = vrot.slane %v4436_v61, %v7645_v23 }
 0x833   :  { %6444 = vmatpush3.bf16.msra.mxu0 %v7150_v21  ;;  %5313 = vmatprep.mubr.bf16.mxu0 %v4977_v9  ;;  %v4855_v21 = vrot.slane %v8648_v17, %v7975_v31  ;;  %v4869_v33 = vrot.slane %v4859_v48, %v7975_v31 }
 0x834   :  { %6445 = vmatprep.subr.bf16.mxu0 %v7151_v62  ;;  %v4366_v32 = vmul.f32 %v4362_v6, %v4262_v50 }
 0x836   :  { %v4976_v28 = vpack.c.bf16 %v4366_v32, %v4366_v32  ;;  %v7298_v15 = vpop.eup %7297 }
 0x837   :  { %6446 = vmatpush3.bf16.msra.mxu0 %v7152_v14  ;;  %v6317_v53 = vrot.slane %v7298_v15, 11 }
 0x838   :  { %6447 = vmatprep.subr.bf16.mxu0 %v7153_v19  ;;  %v4865_v19 = vrot.slane %v4855_v21, %v7975_v31 }
 0x839   :  { %v4878_v2 = vmul.f32 %v6317_v53, %v8648_v17 }
 0x83b   :  { %6448 = vmatpush3.bf16.msra.mxu0 %v7154_v4  ;;  %v4883_v62 = vrot.slane %v4878_v2, %v7645_v23  ;;  %v8710_v9 = vpop.eup %7299  ;;  %v4887_v14 = vrot.slane %v4878_v2, %v7989_v37 }
 0x83c   :  { %6449 = vmatprep.subr.bf16.mxu0 %v7155_v34 }
 0x83d   :  { %v4893_v58 = vrot.slane %v4883_v62, %v7645_v23  ;;  %v4897_v37 = vrot.slane %v4887_v14, %v7645_v23 }
 0x83f   :  { %6450 = vmatpush3.bf16.msra.mxu0 %v7156_v60 }
 0x840   :  { %6451 = vmatprep.subr.bf16.mxu0 %v7157_v16  ;;  %v2185_v16 = vmul.f32 1.0614054, %v8710_v9 }
 0x843   :  { %6452 = vmatpush3.bf16.msra.mxu0 %v7158_v22 }
 0x844   :  { %6453 = vmatprep.subr.bf16.mxu0 %v7159_v51  ;;  %v8724_v51 = vmul.f32 0.70710677, %v8178_v54 }
 0x846   :  { %v8729_v6 = vand.u32 2147483647, %v8724_v51  ;;  %vm2214_vm11 = vcmp.ge.f32.partialorder %v8724_v51, 0.0  ;;  %v7196_v51 = vld [vmem:[%s8859_s20 + $0x38] sm:$0xff]  }
 0x847   :  { %6454 = vmatpush3.bf16.msra.mxu0 %v7160_v0  ;;  %v4913_v0 = vrot.slane %v4903_v55, %v7649_v27 }
 0x848   :  { %6455 = vmatprep.subr.bf16.mxu0 %v7161_v13  ;;  %v2176_v27 = vmul.f32 0.3275911, %v8729_v6 }
 0x84a   :  { %v2178_v43 = vadd.f32 1.0, %v2176_v27 }
 0x84b   :  { %6456 = vmatpush3.bf16.msra.mxu0 %v7162_v24  ;;  %v2187_v24 = vadd.f32 -1.4531521, %v2185_v16 }
 0x84c   :  { %6457 = vmatprep.subr.bf16.mxu0 %v7163_v26 }
 0x84d   :  { %v2189_v32 = vmul.f32 %v8710_v9, %v2187_v24 }
 0x84f   :  { %6458 = vmatpush3.bf16.msra.mxu0 %v7164_v12  ;;  %v2191_v17 = vadd.f32 1.4214138, %v2189_v32 }
 0x850   :  { %6465 = vmatprep.subr.bf16.mxu0 %v7165_v41 }
 0x852   :  { %5314 = vmatmul.mubr.bf16.vlgmr.msra.gmra.mrb[36].mxu0 %v4976_v28 }
 0x853   :  { %6466 = vmatpush3.bf16.msra.mxu0 %v7166_v30 }
 0x854   :  { %6467 = vmatprep.subr.bf16.mxu0 %v7167_v56 }
 0x857   :  { %6468 = vmatpush3.bf16.msra.mxu0 %v7168_v11  ;;  %v2203_v11 = vsub.f32 0.0, %v8667_v8 }
 0x858   :  { %6469 = vmatprep.subr.bf16.mxu0 %v7169_v38 }
 0x85b   :  { %6470 = vmatpush3.bf16.msra.mxu0 %v7170_v52 }
 0x85c   :  { %6471 = vmatprep.subr.bf16.mxu0 %v7171_v10 }
 0x85f   :  { %6472 = vmatpush3.bf16.msra.mxu0 %v7172_v46  ;;  %v2193_v46 = vmul.f32 %v8710_v9, %v2191_v17 }
 0x860   :  { %6473 = vmatprep.subr.bf16.mxu0 %v7173_v57  ;;  %v2205_v57 = vmul.f32 %v2203_v11, %v8667_v8 }
 0x861   :  { %v2195_v36 = vadd.f32 -0.28449672, %v2193_v46 }
 0x863   :  { %6474 = vmatpush3.bf16.msra.mxu0 %v7174_v45  ;;  %v2208_v45 = vmul.f32 1.442695, %v2205_v57 }
 0x864   :  { %6475 = vmatprep.subr.bf16.mxu0 %v7175_v49 }
 0x867   :  { %6476 = vmatpush3.bf16.msra.mxu0 %v7176_v20  ;;  %v2197_v20 = vmul.f32 %v8710_v9, %v2195_v36 }
 0x868   :  { %6477 = vmatprep.subr.bf16.mxu0 %v7177_v42 }
 0x869   :  { %v2199_v61 = vadd.f32 0.2548296, %v2197_v20 }
 0x86b   :  { %6478 = vmatpush3.bf16.msra.mxu0 %v7178_v63  ;;  %v2201_v55 = vmul.f32 %v8710_v9, %v2199_v61 }
 0x86c   :  { %6479 = vmatprep.subr.bf16.mxu0 %v7179_v25 }
 0x86f   :  { %6480 = vmatpush3.bf16.msra.mxu0 %v7180_v47 }
 0x870   :  { %6487 = vmatprep.subr.bf16.mxu0 %v7181_v18 }
 0x875   :  { %v4843_v4 = vpop.f32.mrb[28].mxu1 }
 0x876   :  { %v6581_v34 = vadd.f32 %v4843_v4, %v4441_v39  ;;  %v4845_v60 = vpop.f32.mrb[29].mxu1 }
 0x877   :  { %v6582_v1 = vadd.f32 %v4845_v60, %v4445_v40  ;;  %v4847_v22 = vpop.f32.mrb[30].mxu1 }
 0x878   :  { %v4870_v59 = vsub.f32 %v6581_v34, %v4865_v19  ;;  %v4848_v31 = vpop.f32.mrb[31].mxu1 }
 0x879   :  { %v4871_v13 = vsub.f32 %v6582_v1, %v4869_v33 }
 0x87a   :  { %v4898_v44 = vmul.f32 %v4893_v58, %v4870_v59 }
 0x87b   :  { %v4899_v26 = vmul.f32 %v4897_v37, %v4871_v13 }
 0x87c   :  { %v8731_v50 = vadd.f32 %v4913_v0, %v4898_v44 }
 0x87d   :  { %v8733_v23 = vadd.f32 %v4917_v35, %v4899_v26 }
 0x87e   :  { %v8736_v12 = vmul.f32 0.70710677, %v8731_v50 }
 0x87f   :  { %v8740_v41 = vmul.f32 0.70710677, %v8733_v23 }
 0x880   :  { %v4924_v30 = vand.u32 2147483647, %v8736_v12  ;;  %vm4964_vm9 = vcmp.ge.f32.partialorder %v8736_v12, 0.0 }
 0x881   :  { %v4925_v28 = vand.u32 2147483647, %v8740_v41  ;;  %vm4965_vm10 = vcmp.ge.f32.partialorder %v8740_v41, 0.0  ;;  %v7182_v41 = vld [vmem:[%s8859_s20] sm:$0xff]  }
 0x882   :  { %v4926_v56 = vmul.f32 0.3275911, %v4924_v30  ;;  %v4952_v49 = vsub.f32 0.0, %v4924_v30 }
 0x883   :  { %v4927_v38 = vmul.f32 0.3275911, %v4925_v28  ;;  %v4953_v29 = vsub.f32 0.0, %v4925_v28 }
 0x884   :  { %v4928_v52 = vadd.f32 1.0, %v4926_v56  ;;  %v4954_v42 = vmul.f32 %v4952_v49, %v4924_v30  ;;  %v2202_v30 = vsub.f32 0.0, %v8729_v6 }
 0x885   :  { %v4929_v10 = vadd.f32 1.0, %v4927_v38  ;;  %v4955_v63 = vmul.f32 %v4953_v29, %v4925_v28 }
 0x886   :  { %7301 = vrcp.f32 %v4928_v52  ;;  %v4956_v8 = vmul.f32 1.442695, %v4954_v42  ;;  %v4920_v42 = vmul.f32 0.5, %v8731_v50  ;;  %v7183_v50 = vld [vmem:[%s8859_s20 + $0x48] sm:$0xff]  }
 0x887   :  { %7303 = vrcp.f32 %v4929_v10  ;;  %v4958_v39 = vmul.f32 1.442695, %v4955_v63  ;;  %v2204_v10 = vmul.f32 %v2202_v30, %v8729_v6  ;;  %v4921_v6 = vmul.f32 0.5, %v8733_v23 }
 0x888   :  { %7305 = vrcp.f32 %v2178_v43 }
 0x889   :  { %7307 = vpow2.f32 %v2208_v45 }
 0x88a   :  { %7309 = vpow2.f32 %v4956_v8 }
 0x88b   :  { %7311 = vpow2.f32 %v4958_v39  ;;  %v7185_v39 = vld [vmem:[%s8859_s20 + $0x50] sm:$0xff]  }
 0x890   :  { %v7302_v15 = vpop.eup %7301 }
 0x891   :  { %v7304_v53 = vpop.eup %7303  ;;  %v4934_v25 = vmul.f32 1.0614054, %v7302_v15 }
 0x892   :  { %v8749_v2 = vpop.eup %7305  ;;  %v4935_v47 = vmul.f32 1.0614054, %v7304_v53 }
 0x893   :  { %v4936_v18 = vadd.f32 -1.4531521, %v4934_v25  ;;  %v2184_v48 = vmul.f32 1.0614054, %v8749_v2  ;;  %v7308_v60 = vpop.eup %7307 }
 0x894   :  { %v4937_v21 = vadd.f32 -1.4531521, %v4935_v47  ;;  %v2211_v22 = vmul.f32 %v7308_v60, %v2201_v55  ;;  %v7310_v27 = vpop.eup %7309 }
 0x895   :  { %v6525_v62 = vpop.f32.mrb[32].mxu1  ;;  %v4938_v40 = vmul.f32 %v7302_v15, %v4936_v18  ;;  %v2186_v16 = vadd.f32 -1.4531521, %v2184_v48  ;;  %v7312_v17 = vpop.eup %7311  ;;  %v7184_v48 = vld [vmem:[%s8859_s20 + $0x8] sm:$0xff]  }
 0x896   :  { %v6526_v14 = vpop.f32.mrb[33].mxu1  ;;  %v4939_v19 = vmul.f32 %v7304_v53, %v4937_v21  ;;  %v2213_v9 = vsub.f32 1.0, %v2211_v22  ;;  %v7194_v22 = vld [vmem:[%s8859_s20 + $0x30] sm:$0xff]  }
 0x897   :  { %v8753_v4 = vadd.f32 %v6526_v14, %v6525_v62  ;;  %v6528_v33 = vpop.f32.mrb[34].mxu1  ;;  %v4940_v3 = vadd.f32 1.4214138, %v4938_v40  ;;  %v2188_v31 = vmul.f32 %v8749_v2, %v2186_v16  ;;  %v7186_v40 = vld [vmem:[%s8859_s20 + $0x10] sm:$0xff]   ;;  %v7192_v16 = vld [vmem:[%s8859_s20 + $0x28] sm:$0xff]  }
 0x898   :  { %v6529_v34 = vpop.f32.mrb[35].mxu1  ;;  %v4941_v58 = vadd.f32 1.4214138, %v4939_v19  ;;  %v2217_v56 = vsub.f32 0.0, %v2213_v9  ;;  %v7187_v19 = vld [vmem:[%s8859_s20 + $0x58] sm:$0xff]  }
 0x899   :  { %v4942_v1 = vmul.f32 %v7302_v15, %v4940_v3  ;;  %v2190_v26 = vadd.f32 1.4214138, %v2188_v31  ;;  %v7188_v33 = vld [vmem:[%s8859_s20 + $0x18] sm:$0xff]   ;;  %v7190_v34 = vld [vmem:[%s8859_s20 + $0x20] sm:$0xff]   ;;  %v2170_v31 = vmul.f32 0.5, %v8178_v54 }
 0x89a   :  { %v4943_v37 = vmul.f32 %v7304_v53, %v4941_v58  ;;  %v2219_v57 = vsel %vm2215_vm8, %v2213_v9, %v2217_v56  ;;  %v7191_v58 = vld [vmem:[%s8859_s20 + $0x68] sm:$0xff]  }
 0x89b   :  { %v4944_v59 = vadd.f32 -0.28449672, %v4942_v1  ;;  %v2192_v43 = vmul.f32 %v8749_v2, %v2190_v26  ;;  %v2221_v20 = vadd.f32 1.0, %v2219_v57  ;;  %v7193_v1 = vld [vmem:[%s8859_s20 + $0x70] sm:$0xff]  }
 0x89c   :  { %v4945_v0 = vadd.f32 -0.28449672, %v4943_v37 }
 0x89d   :  { %v4946_v13 = vmul.f32 %v7302_v15, %v4944_v59  ;;  %v2194_v49 = vadd.f32 -0.28449672, %v2192_v43  ;;  %v2223_v18 = vmul.f32 %v2221_v20, %v2171_v7  ;;  %v6368_v20 = vld [vmem:[%s8860_s21] ss:$0 sm:$0xff]  ;;  %s7403_s21 = smov [#allocation10]  }
 0x89e   :  { %v4947_v35 = vmul.f32 %v7304_v53, %v4945_v0  ;;  %v7195_v0 = vld [vmem:[%s8859_s20 + $0x78] sm:$0xff]   ;;  %s5885_s27 = sshll.u32 %s7403_s21, 4  ;;  %s5886_s27 = int_to_ptr.vmem [resolvable:$true] %s5885_s27 }
 0x89f   :  { %v4948_v44 = vadd.f32 0.2548296, %v4946_v13  ;;  %v2196_v61 = vmul.f32 %v8749_v2, %v2194_v49  ;;  %v5499_v23 = vpack.c.bf16 %v2223_v18, %v2223_v18  ;;  %s7362_s2 = scalar_lea.vmem %s5886_s27, 32  ;;  %p7367_p3 = scmp.lt.s32.totalorder %s5886_s27, %s5886_s27 }
 0x8a0   :  { %v4949_v24 = vadd.f32 0.2548296, %v4947_v35  ;;  %p7363_p2 = scmp.ne.s32.totalorder %s5886_s27, %s7362_s2  ;;  %p7368_p4 = scmp.lt.s32.totalorder %s7362_s2, %s7362_s2 }
 0x8a1   :  { %v4950_v32 = vmul.f32 %v7302_v15, %v4948_v44  ;;  %v2206_v15 = vmul.f32 1.442695, %v2204_v10  ;;  %v2198_v5 = vadd.f32 0.2548296, %v2196_v61 }
 0x8a2   :  { %v4951_v28 = vmul.f32 %v7304_v53, %v4949_v24  ;;  %p7369_p5 = por %p7368_p4, %p7367_p3 }
 0x8a3   :  { %v4960_v11 = vmul.f32 %v7310_v27, %v4950_v32  ;;  %7313 = vpow2.f32 %v2206_v15  ;;  %v2200_v62 = vmul.f32 %v8749_v2, %v2198_v5  ;;  %v7189_v2 = vld [vmem:[%s8859_s20 + $0x60] sm:$0xff]   ;;  %s7399_s20 = smov 64  }
 0x8a4   :  { %v4961_v38 = vmul.f32 %v7312_v17, %v4951_v28  ;;  %v6318_v27 = vld [vmem:[%s8852_s13] ss:$0 sm:$0xff]  ;;  %s7400_s13 = smov 69   ;;  %p7370_p6 = pnand %p7369_p5, %p7363_p2 }
 0x8a5   :  { %v4962_v52 = vsub.f32 1.0, %v4960_v11 }
 0x8a6   :  { %v4963_v46 = vsub.f32 1.0, %v4961_v38 }
 0x8a7   :  { %v4966_v36 = vsub.f32 0.0, %v4962_v52 }
 0x8a8   :  { %v4967_v45 = vsub.f32 0.0, %v4963_v46 }
 0x8a9   :  { %v4968_v29 = vsel %vm4964_vm9, %v4962_v52, %v4966_v36  ;;  %v6351_v52 = vld [vmem:[%s8858_s19] ss:$0 sm:$0xff] }
 0x8aa   :  { %v4969_v53 = vsel %vm4965_vm10, %v4963_v46, %v4967_v45  ;;  %v4970_v63 = vadd.f32 1.0, %v4968_v29 }
 0x8ab   :  { %v4971_v25 = vadd.f32 1.0, %v4969_v53 }
 0x8ac   :  { %v4972_v47 = vmul.f32 %v4970_v63, %v4920_v42 }
 0x8ad   :  { %v4973_v12 = vmul.f32 %v4971_v25, %v4921_v6  ;;  %v7314_v14 = vpop.eup %7313  ;;  %v6385_v6 = vld [vmem:[%s8862_s23] ss:$0 sm:$0xff] }
 0x8ae   :  { %v5321_v21 = vpack.c.bf16 %v4972_v47, %v4972_v47  ;;  %v2210_v55 = vmul.f32 %v7314_v14, %v2200_v62  ;;  %v5847_v25 = vadd.f32 %v8753_v4, %v6385_v6 }
 0x8af   :  { %v5322_v8 = vpack.c.bf16 %v4973_v12, %v4973_v12 }
 0x8b0   :  { %v2212_v3 = vsub.f32 1.0, %v2210_v55 }
 0x8b1   :  { %5490 = vmatprep.mubr.bf16.mxu0 %v5322_v8 }
 0x8b2   :  { %5491 = vmatmul.mubr.bf16.vlgmr.msra.gmra.mrb[40].mxu0 %v5321_v21  ;;  %v2216_v60 = vsub.f32 0.0, %v2212_v3 }
 0x8b3   :  { %6488 = vmatpush3.bf16.msra.mxu0 %v7182_v41  ;;  %5667 = vmatprep.mubr.bf16.mxu0 %v5499_v23 }
 0x8b4   :  { %6489 = vmatprep.subr.bf16.mxu0 %v7183_v50  ;;  %v2218_v37 = vsel %vm2214_vm11, %v2212_v3, %v2216_v60 }
 0x8b5   :  { %v2220_v59 = vadd.f32 1.0, %v2218_v37 }
 0x8b7   :  { %6490 = vmatpush3.bf16.msra.mxu0 %v7184_v48  ;;  %v2222_v13 = vmul.f32 %v2220_v59, %v2170_v31 }
 0x8b8   :  { %6491 = vmatprep.subr.bf16.mxu0 %v7185_v39 }
 0x8b9   :  { %v5498_v35 = vpack.c.bf16 %v2222_v13, %v2222_v13 }
 0x8bb   :  { %6492 = vmatpush3.bf16.msra.mxu0 %v7186_v40 }
 0x8bc   :  { %6493 = vmatprep.subr.bf16.mxu0 %v7187_v19 }
 0x8bf   :  { %6494 = vmatpush3.bf16.msra.mxu0 %v7188_v33 }
 0x8c0   :  { %6495 = vmatprep.subr.bf16.mxu0 %v7189_v2 }
 0x8c3   :  { %6496 = vmatpush3.bf16.msra.mxu0 %v7190_v34 }
 0x8c4   :  { %6497 = vmatprep.subr.bf16.mxu0 %v7191_v58 }
 0x8c7   :  { %6498 = vmatpush3.bf16.msra.mxu0 %v7192_v16 }
 0x8c8   :  { %6499 = vmatprep.subr.bf16.mxu0 %v7193_v1 }
 0x8cb   :  { %6500 = vmatpush3.bf16.msra.mxu0 %v7194_v22 }
 0x8cc   :  { %6501 = vmatprep.subr.bf16.mxu0 %v7195_v0 }
 0x8cf   :  { %6502 = vmatpush3.bf16.msra.mxu0 %v7196_v51 }
 0x8d2   :  { %5668 = vmatmul.mubr.bf16.vlgmr.msra.gmra.mrb[44].mxu0 %v5498_v35 }
 0x905   :  { %v6437_v9 = vpop.f32.mrb[32].mxu0 }
 0x906   :  { %v6438_v44 = vpop.f32.mrb[33].mxu0 }
 0x907   :  { %v6439_v24 = vadd.f32 %v6438_v44, %v6437_v9  ;;  %v6440_v26 = vpop.f32.mrb[34].mxu0 }
 0x908   :  { %v6441_v32 = vpop.f32.mrb[35].mxu0 }
 0x909   :  { %v5276_v28 = vadd.f32 %v6439_v24, %v6318_v27 }
 0x925   :  { %v6459_v54 = vpop.f32.mrb[36].mxu0 }
 0x926   :  { %v6460_v30 = vpop.f32.mrb[37].mxu0 }
 0x927   :  { %v6461_v56 = vadd.f32 %v6460_v30, %v6459_v54  ;;  %v6462_v17 = vpop.f32.mrb[38].mxu0 }
 0x928   :  { %v6463_v11 = vpop.f32.mrb[39].mxu0 }
 0x929   :  { %v5316_v38 = vadd.f32 %v6461_v56, %v5276_v28 }
 0x92b   :  { %5856 = vrot.lane.b32.xlu1 %v5316_v38, %s7399_s20 }
 0x985   :  { %v6481_v43 = vpop.f32.mrb[40].mxu0 }
 0x986   :  { %v6482_v10 = vpop.f32.mrb[41].mxu0 }
 0x987   :  { %v6483_v46 = vadd.f32 %v6482_v10, %v6481_v43  ;;  %v6484_v57 = vpop.f32.mrb[42].mxu0 }
 0x988   :  { %v6485_v36 = vpop.f32.mrb[43].mxu0 }
 0x989   :  { %v5493_v45 = vadd.f32 %v6483_v46, %v6351_v52 }
 0x98b   :  { %5862 = vrot.lane.b32.xlu1 %v5493_v45, %s7400_s13 }
 0x99d   :  { %v5857_v49 = vpop.permute.xlu1 %5856 }
 0x99e   :  { %5860 = vst.msk [vmem:[#allocation10] sm:$0x3] %vm5859_vm12, %v5857_v49 }
 0x9a5   :  { %v6503_v29 = vpop.f32.mrb[44].mxu0 }
 0x9a6   :  { %v6504_v15 = vpop.f32.mrb[45].mxu0 }
 0x9a7   :  { %v6505_v42 = vadd.f32 %v6504_v15, %v6503_v29  ;;  %v6506_v53 = vpop.f32.mrb[46].mxu0 }
 0x9a8   :  { %v6507_v63 = vpop.f32.mrb[47].mxu0 }
 0x9a9   :  { %v5670_v7 = vadd.f32 %v6505_v42, %v6368_v20 }
 0x9ab   :  { %5868 = vrot.lane.b32.xlu1 %v5670_v7, %s7401_s4 }
 0x9af   :  { %5874 = vrot.lane.b32.xlu1 %v5847_v25, %s7402_s1 }
 0x9fd   :  { %v5863_v47 = vpop.permute.xlu1 %5862 }
 0x9fe   :  { %5866 = vst.msk [vmem:[#allocation10] sm:$0x3] %vm5865_vm13, %v5863_v47 }
 0xa1d   :  { %v5869_v61 = vpop.permute.xlu1 %5868 }
 0xa1e   :  { %5872 = vst.msk [vmem:[#allocation10] sm:$0x3] %vm5871_vm14, %v5869_v61 }
 0xa21   :  { %v5875_v12 = vpop.permute.xlu1 %5874 }
 0xa22   :  { %5878 = vst.msk [vmem:[#allocation10] sm:$0x3] %vm5877_vm15, %v5875_v12 }
 0xa23   :  { %7373 = shalt.err (!%p7370_p6)
}
 0xa24   :  { %s7374_s12 = scalar_lea.hbm %s8863_s24, 32 }
 0xa25   :  { %p7375_p7 = scmp.ne.s32.totalorder %s8863_s24, %s7374_s12  ;;  %p7378_p8 = scmp.lt.u32.totalorder %s7374_s12, %s8863_s24 }
 0xa27   :  { %p7380_p9 = pnand %p7378_p8, %p7375_p7 }
 0xa29   :  { %7383 = shalt.err (!%p7380_p9)
}
 0xa2a   :  { %5888 = dma.vmem_to_hbm [thread:$0]  %s5886_s27, 32, %s8863_s24, [#allocation7]  }
 0xa2b   :  { %7388 = dma.done.wait [#allocation7], 32  }
 0xa2c   :  { %7389 = vsyncadd [#allocation7], 4294967264 }
 0xa2d   :  { %5892 = vsyncpa [#allocation6], 1 }
 0xa2e   :  { %5893 = vsyncpa [#allocation9], 1 }
 0xa2f   :  { %5894 = vsyncpa [#allocation7], 1 }

</bundles_post_ra>
